<compile_context>
chip_gen: v7x
topology: tpu7x:2x2x1
jax: 0.10.0
libtpu: 0.0.40
codegen_flags: <defaults>
</compile_context>

<pallas_src>
import functools

import jax
import jax.numpy as jnp
from jax.experimental import pallas as pl
from jax.experimental.pallas import tpu as pltpu

_SQRT_HALF = 0.7071067811865476


def _gelu_exact(x):
    # matches torch.nn.functional.gelu default (erf formulation)
    return 0.5 * x * (1.0 + jax.lax.erf(x * _SQRT_HALF))


# ----------------------------------------------------------------------------
# fused FeedForward kernel: one row-tile per grid step
#   x:(tm,d) f32->bf16  w1:(d,2*hid) bf16  b1:(1,2*hid) f32
#   w2:(hid,d) bf16     b2:(1,d) f32       o:(tm,d) f32
# ----------------------------------------------------------------------------
def _ff_kernel(x_ref, w1_ref, b1_ref, w2_ref, b2_ref, o_ref, *, hid, approx_gelu):
    x = x_ref[...].astype(jnp.bfloat16)
    h = jnp.dot(x, w1_ref[...], preferred_element_type=jnp.float32) + b1_ref[...]
    hv = h[:, :hid]                     # value half (torch chunk(2,-1)[0])
    hg = h[:, hid:]                     # gate  half (torch chunk(2,-1)[1])
    if approx_gelu:
        gate = jax.nn.gelu(hg, approximate=True)   # tanh -> EUP slot
    else:
        gate = _gelu_exact(hg)                     # exact erf (torch default)
    y = (hv * gate).astype(jnp.bfloat16)
    o_ref[...] = (jnp.dot(y, w2_ref[...], preferred_element_type=jnp.float32)
                  + b2_ref[...]).astype(o_ref.dtype)


# ----------------------------------------------------------------------------
# tiling / VMEM sizing helpers
# ----------------------------------------------------------------------------
def _vmem_bytes(tm, d, hid):
    # single-buffered resident weights/biases
    weights = d * (2 * hid) * 2 + hid * d * 2 + (2 * hid) * 4 + d * 4
    # double-buffered x (f32) and out (f32) row tiles
    io = 2 * tm * d * 4 + 2 * tm * d * 4
    # intermediates: x bf16, h f32, gelu/y f32, y bf16
    inter = tm * d * 2 + tm * (2 * hid) * 4 + tm * hid * 4 + tm * hid * 2
    return weights + io + inter


_VMEM_BUDGET = 48 * 1024 * 1024      # keep working set v7x-safe (64 MiB VMEM)


def _choose_row_tile(rows, requested, d, hid):
    tm = min(requested, rows)
    if rows >= 16:
        # keep >= 2 grid steps so the "parallel" axis can shard across v7x's
        # two TensorCores (no-op on single-TC v5e/v6e)
        cap = max(8, (pl.cdiv(rows, 2) // 8) * 8)
        tm = min(tm, cap)
    # shrink the row tile until the working set (with slack) fits the budget
    while tm > 8 and 3 * _vmem_bytes(tm, d, hid) // 2 > _VMEM_BUDGET:
        tm = max(8, tm // 2)
    if tm < rows:
        tm = max(8, (tm // 8) * 8)   # multiple of 8 sublanes for partial tiles
    return tm


# ----------------------------------------------------------------------------
# one-time weight prep (PyTorch layout -> kernel layout)
# ----------------------------------------------------------------------------
def prepare_ff_params(params, *, compute_dtype=jnp.bfloat16):
    """Call ONCE and reuse: transposes to (in,out), casts matmul operands to
    bf16 and reshapes biases so the per-call wrapper does no weight work."""
    d, hid = params["w2"].shape                       # torch: w2 is (dim, hid)
    return dict(
        w1t=jnp.transpose(params["w1"]).astype(compute_dtype),   # (d, 2*hid)
        b1=params["b1"].reshape(1, 2 * hid).astype(jnp.float32),
        w2t=jnp.transpose(params["w2"]).astype(compute_dtype),   # (hid, d)
        b2=params["b2"].reshape(1, d).astype(jnp.float32),
    )


# ----------------------------------------------------------------------------
# wrapper
# ----------------------------------------------------------------------------
def feed_forward(x, kernel_params, *, row_tile=256, approx_gelu=False):
    """Pallas implementation of FeedForward(dim, mult).forward(x).

    x: (..., dim). kernel_params: output of prepare_ff_params().
    """
    orig_shape = x.shape
    d = orig_shape[-1]
    w1t, b1 = kernel_params["w1t"], kernel_params["b1"]
    w2t, b2 = kernel_params["w2t"], kernel_params["b2"]
    hid = w2t.shape[0]
    assert w1t.shape == (d, 2 * hid), (w1t.shape, d, hid)

    # fold batch/seq into the sublane (row) axis; tile rows.
    x2 = x.reshape(-1, d)
    rows = x2.shape[0]
    tm = _choose_row_tile(rows, row_tile, d, hid)
    grid = (pl.cdiv(rows, tm),)

    est = _vmem_bytes(tm, d, hid)
    vmem_limit = int(min(max(2 * est, 32 * 1024 * 1024), 64 * 1024 * 1024))

    bytes_accessed = (rows * d * x2.dtype.itemsize        # x read
                      + rows * d * x2.dtype.itemsize      # out write
                      + w1t.size * 2 + w2t.size * 2
                      + b1.size * 4 + b2.size * 4)
    cost = pl.CostEstimate(flops=6 * rows * d * hid,
                           transcendentals=rows * hid,
                           bytes_accessed=int(bytes_accessed))

    kernel = functools.partial(_ff_kernel, hid=hid, approx_gelu=approx_gelu)

    def _call(single_buffer_weights):
        if single_buffer_weights:
            # constant block index -> keep resident with a single VMEM buffer
            def wspec(a):
                return pl.BlockSpec(a.shape, lambda i: (0,) * a.ndim,
                                    pipeline_mode=pl.Buffered(1))
        else:
            def wspec(a):
                return pl.BlockSpec(a.shape, lambda i: (0,) * a.ndim)
        return pl.pallas_call(
            kernel,
            out_shape=jax.ShapeDtypeStruct((rows, d), x.dtype),
            grid=grid,
            in_specs=[pl.BlockSpec((tm, d), lambda i: (i, 0)),
                      wspec(w1t), wspec(b1), wspec(w2t), wspec(b2)],
            out_specs=pl.BlockSpec((tm, d), lambda i: (i, 0)),
            compiler_params=pltpu.CompilerParams(
                dimension_semantics=("parallel",),
                vmem_limit_bytes=vmem_limit),
            cost_estimate=cost,
        )(x2, w1t, b1, w2t, b2)

    try:
        out = _call(True)
    except Exception:
        # fallback if this jax/libtpu build rejects Buffered(1) block specs
        out = _call(False)

    return out.reshape(orig_shape)


# ----------------------------------------------------------------------------
# parameters (PyTorch nn.Linear layout: weight (out, in), bias (out,))
# ----------------------------------------------------------------------------
def init_ff_params(key, dim, mult=4):
    hid = dim * mult
    k1, k2, k3, k4 = jax.random.split(key, 4)
    s1 = 1.0 / (dim ** 0.5)
    s2 = 1.0 / (hid ** 0.5)
    return dict(
        w1=jax.random.uniform(k1, (2 * hid, dim), jnp.float32, -s1, s1),
        b1=jax.random.uniform(k2, (2 * hid,), jnp.float32, -s1, s1),
        w2=jax.random.uniform(k3, (dim, hid), jnp.float32, -s2, s2),
        b2=jax.random.uniform(k4, (dim,), jnp.float32, -s2, s2),
    )


# ----------------------------------------------------------------------------
# references (mirror the PyTorch module)
# ----------------------------------------------------------------------------
def feed_forward_reference(x, p):
    # exact f32 torch-semantics reference
    h = x @ p["w1"].T + p["b1"]
    hid = p["w2"].shape[1]
    v, g = h[..., :hid], h[..., hid:]       # torch chunk(2, dim=-1)
    y = v * _gelu_exact(g)
    return y @ p["w2"].T + p["b2"]


def feed_forward_reference_bf16(x, p):
    # same math with bf16 MXU operands / f32 accumulation (matches kernel dtypes)
    bf = jnp.bfloat16
    w1t = p["w1"].T.astype(bf)
    w2t = p["w2"].T.astype(bf)
    h = jnp.dot(x.astype(bf), w1t, preferred_element_type=jnp.float32) + p["b1"]
    hid = p["w2"].shape[1]
    v, g = h[..., :hid], h[..., hid:]
    y = (v * _gelu_exact(g)).astype(bf)
    return jnp.dot(y, w2t, preferred_element_type=jnp.float32) + p["b2"]


# ----------------------------------------------------------------------------
if __name__ == "__main__":
    key = jax.random.PRNGKey(0)
    kx, kp, kx2, kx3 = jax.random.split(key, 4)

    # lane-dense main test: batch=2, seq=64, dim=128, mult=4 (hidden=512)
    B, N, D, MULT = 2, 64, 128, 4
    params = init_ff_params(kp, D, MULT)
    kparams = prepare_ff_params(params)            # one-time weight prep
    x = jax.random.normal(kx, (B, N, D), dtype=jnp.float32)

    out = jax.block_until_ready(feed_forward(x, kparams))
    assert out.shape == (B, N, D), out.shape
    ref16 = feed_forward_reference_bf16(x, params)
    ref32 = feed_forward_reference(x, params)
    assert jnp.allclose(out, ref16, atol=5e-3, rtol=5e-3), float(jnp.abs(out - ref16).max())
    assert jnp.allclose(out, ref32, atol=4e-2, rtol=4e-2), float(jnp.abs(out - ref32).max())

    # small / unaligned dim, rows < 16 (single full block)
    D2 = 32
    params2 = init_ff_params(kp, D2, MULT)
    kparams2 = prepare_ff_params(params2)
    x2 = jax.random.normal(kx2, (3, 5, D2), dtype=jnp.float32)
    out2 = jax.block_until_ready(feed_forward(x2, kparams2))
    assert out2.shape == (3, 5, D2), out2.shape
    ref2 = feed_forward_reference_bf16(x2, params2)
    assert jnp.allclose(out2, ref2, atol=5e-3, rtol=5e-3), float(jnp.abs(out2 - ref2).max())

    # ragged row count -> partial (masked) last block, no host-side padding
    x3 = jax.random.normal(kx3, (1, 50, D), dtype=jnp.float32)
    out3 = jax.block_until_ready(feed_forward(x3, kparams, row_tile=32))
    assert out3.shape == (1, 50, D), out3.shape
    ref3 = feed_forward_reference_bf16(x3, params)
    assert jnp.allclose(out3, ref3, atol=5e-3, rtol=5e-3), float(jnp.abs(out3 - ref3).max())

    print("KERNEL_OK")
</pallas_src>

<mosaic_0001>
module attributes {stable_mosaic.version = 11 : i64} {
  func.func @_ff_kernel(%arg0: i32, %arg1: memref<64x128xf32, #tpu.memory_space<vmem>>, %arg2: memref<128x1024xbf16, #tpu.memory_space<vmem>>, %arg3: memref<1x1024xf32, #tpu.memory_space<vmem>>, %arg4: memref<512x128xbf16, #tpu.memory_space<vmem>>, %arg5: memref<1x128xf32, #tpu.memory_space<vmem>>, %arg6: memref<64x128xf32, #tpu.memory_space<vmem>>) attributes {dimension_semantics = [#tpu.dimension_semantics<parallel>], iteration_bounds = array<i64: 2>, scalar_prefetch = 0 : i64, scratch_operands = 0 : i64, tpu.core_type = #tpu.core_type<tc>, window_params = [{transform_indices = @transform_0, window_bounds = array<i64: 64, 128>}, {pipeline_mode = #tpu.pipeline_mode<synchronous>, transform_indices = @transform_1, window_bounds = array<i64: 128, 1024>}, {pipeline_mode = #tpu.pipeline_mode<synchronous>, transform_indices = @transform_2, window_bounds = array<i64: 1, 1024>}, {pipeline_mode = #tpu.pipeline_mode<synchronous>, transform_indices = @transform_3, window_bounds = array<i64: 512, 128>}, {pipeline_mode = #tpu.pipeline_mode<synchronous>, transform_indices = @transform_4, window_bounds = array<i64: 1, 128>}, {transform_indices = @transform_5, window_bounds = array<i64: 64, 128>}]} {
    %c0 = arith.constant 0 : index
    %c0_0 = arith.constant 0 : index
    %0 = vector.load %arg1[%c0, %c0_0] : memref<64x128xf32, #tpu.memory_space<vmem>>, vector<64x128xf32>
    %1 = arith.truncf %0 : vector<64x128xf32> to vector<64x128xbf16>
    %c0_1 = arith.constant 0 : index
    %c0_2 = arith.constant 0 : index
    %2 = vector.load %arg2[%c0_1, %c0_2] : memref<128x1024xbf16, #tpu.memory_space<vmem>>, vector<128x1024xbf16>
    %cst = arith.constant dense<0.000000e+00> : vector<64x1024xf32>
    %3 = tpu.matmul %1, %2, %cst {dimension_numbers = #tpu.dot_dimension_numbers<[1], [0], [0], [1], [0, 0, 1, 1], [], []>} : vector<64x128xbf16>, vector<128x1024xbf16>, vector<64x1024xf32> -> vector<64x1024xf32>
    %c0_3 = arith.constant 0 : index
    %c0_4 = arith.constant 0 : index
    %4 = vector.load %arg3[%c0_3, %c0_4] : memref<1x1024xf32, #tpu.memory_space<vmem>>, vector<1x1024xf32>
    %5 = vector.broadcast %4 : vector<1x1024xf32> to vector<64x1024xf32>
    %6 = arith.addf %3, %5 : vector<64x1024xf32>
    %7 = vector.extract_strided_slice %6 {offsets = [0, 0], sizes = [64, 512], strides = [1, 1]} : vector<64x1024xf32> to vector<64x512xf32>
    %8 = vector.extract_strided_slice %6 {offsets = [0, 512], sizes = [64, 512], strides = [1, 1]} : vector<64x1024xf32> to vector<64x512xf32>
    %cst_5 = arith.constant 5.000000e-01 : f32
    %9 = vector.broadcast %cst_5 : f32 to vector<64x512xf32>
    %10 = arith.mulf %9, %8 : vector<64x512xf32>
    %cst_6 = arith.constant 0.707106769 : f32
    %11 = vector.broadcast %cst_6 : f32 to vector<64x512xf32>
    %12 = arith.mulf %8, %11 : vector<64x512xf32>
    %13 = math.erf %12 : vector<64x512xf32>
    %cst_7 = arith.constant 1.000000e+00 : f32
    %14 = vector.broadcast %cst_7 : f32 to vector<64x512xf32>
    %15 = arith.addf %14, %13 : vector<64x512xf32>
    %16 = arith.mulf %10, %15 : vector<64x512xf32>
    %17 = arith.mulf %7, %16 : vector<64x512xf32>
    %18 = arith.truncf %17 : vector<64x512xf32> to vector<64x512xbf16>
    %c0_8 = arith.constant 0 : index
    %c0_9 = arith.constant 0 : index
    %19 = vector.load %arg4[%c0_8, %c0_9] : memref<512x128xbf16, #tpu.memory_space<vmem>>, vector<512x128xbf16>
    %cst_10 = arith.constant dense<0.000000e+00> : vector<64x128xf32>
    %20 = tpu.matmul %18, %19, %cst_10 {dimension_numbers = #tpu.dot_dimension_numbers<[1], [0], [0], [1], [0, 0, 1, 1], [], []>} : vector<64x512xbf16>, vector<512x128xbf16>, vector<64x128xf32> -> vector<64x128xf32>
    %c0_11 = arith.constant 0 : index
    %c0_12 = arith.constant 0 : index
    %21 = vector.load %arg5[%c0_11, %c0_12] : memref<1x128xf32, #tpu.memory_space<vmem>>, vector<1x128xf32>
    %22 = vector.broadcast %21 : vector<1x128xf32> to vector<64x128xf32>
    %23 = arith.addf %20, %22 : vector<64x128xf32>
    %c0_13 = arith.constant 0 : index
    %c0_14 = arith.constant 0 : index
    %24 = vector.load %arg6[%c0_13, %c0_14] : memref<64x128xf32, #tpu.memory_space<vmem>>, vector<64x128xf32>
    tpu.vector_store %arg6[%c0_13, %c0_14], %23 {strides = array<i32>} : memref<64x128xf32, #tpu.memory_space<vmem>>, vector<64x128xf32>,
    return
  }
  func.func @transform_0(%arg0: i32) -> (i32, i32) {
    %c0_i32 = arith.constant 0 : i32
    %c0_i32_0 = arith.constant 0 : i32
    return %arg0, %c0_i32 : i32, i32
  }
  func.func @transform_1(%arg0: i32) -> (i32, i32) {
    %c0_i32 = arith.constant 0 : i32
    %c0_i32_0 = arith.constant 0 : i32
    %c0_i32_1 = arith.constant 0 : i32
    return %c0_i32, %c0_i32_0 : i32, i32
  }
  func.func @transform_2(%arg0: i32) -> (i32, i32) {
    %c0_i32 = arith.constant 0 : i32
    %c0_i32_0 = arith.constant 0 : i32
    %c0_i32_1 = arith.constant 0 : i32
    return %c0_i32, %c0_i32_0 : i32, i32
  }
  func.func @transform_3(%arg0: i32) -> (i32, i32) {
    %c0_i32 = arith.constant 0 : i32
    %c0_i32_0 = arith.constant 0 : i32
    %c0_i32_1 = arith.constant 0 : i32
    return %c0_i32, %c0_i32_0 : i32, i32
  }
  func.func @transform_4(%arg0: i32) -> (i32, i32) {
    %c0_i32 = arith.constant 0 : i32
    %c0_i32_0 = arith.constant 0 : i32
    %c0_i32_1 = arith.constant 0 : i32
    return %c0_i32, %c0_i32_0 : i32, i32
  }
  func.func @transform_5(%arg0: i32) -> (i32, i32) {
    %c0_i32 = arith.constant 0 : i32
    %c0_i32_0 = arith.constant 0 : i32
    return %arg0, %c0_i32 : i32, i32
  }
}

module attributes {stable_mosaic.version = 11 : i64} {
  func.func @_ff_kernel(%arg0: i32, %arg1: memref<64x128xf32, #tpu.memory_space<vmem>>, %arg2: memref<128x1024xbf16, #tpu.memory_space<vmem>>, %arg3: memref<1x1024xf32, #tpu.memory_space<vmem>>, %arg4: memref<512x128xbf16, #tpu.memory_space<vmem>>, %arg5: memref<1x128xf32, #tpu.memory_space<vmem>>, %arg6: memref<64x128xf32, #tpu.memory_space<vmem>>) attributes {dimension_semantics = [#tpu.dimension_semantics<parallel>], iteration_bounds = array<i64: 2>, scalar_prefetch = 0 : i64, scratch_operands = 0 : i64, tpu.core_type = #tpu.core_type<tc>, window_params = [{transform_indices = @transform_0, window_bounds = array<i64: 64, 128>}, {pipeline_mode = #tpu.pipeline_mode<synchronous>, transform_indices = @transform_1, window_bounds = array<i64: 128, 1024>}, {pipeline_mode = #tpu.pipeline_mode<synchronous>, transform_indices = @transform_2, window_bounds = array<i64: 1, 1024>}, {pipeline_mode = #tpu.pipeline_mode<synchronous>, transform_indices = @transform_3, window_bounds = array<i64: 512, 128>}, {pipeline_mode = #tpu.pipeline_mode<synchronous>, transform_indices = @transform_4, window_bounds = array<i64: 1, 128>}, {transform_indices = @transform_5, window_bounds = array<i64: 64, 128>}]} {
    %c0 = arith.constant 0 : index
    %c0_0 = arith.constant 0 : index
    %0 = vector.load %arg1[%c0, %c0_0] : memref<64x128xf32, #tpu.memory_space<vmem>>, vector<64x128xf32>
    %1 = arith.truncf %0 : vector<64x128xf32> to vector<64x128xbf16>
    %c0_1 = arith.constant 0 : index
    %c0_2 = arith.constant 0 : index
    %2 = vector.load %arg2[%c0_1, %c0_2] : memref<128x1024xbf16, #tpu.memory_space<vmem>>, vector<128x1024xbf16>
    %cst = arith.constant dense<0.000000e+00> : vector<64x1024xf32>
    %3 = tpu.matmul %1, %2, %cst {dimension_numbers = #tpu.dot_dimension_numbers<[1], [0], [0], [1], [0, 0, 1, 1], [], []>} : vector<64x128xbf16>, vector<128x1024xbf16>, vector<64x1024xf32> -> vector<64x1024xf32>
    %c0_3 = arith.constant 0 : index
    %c0_4 = arith.constant 0 : index
    %4 = vector.load %arg3[%c0_3, %c0_4] : memref<1x1024xf32, #tpu.memory_space<vmem>>, vector<1x1024xf32>
    %5 = vector.broadcast %4 : vector<1x1024xf32> to vector<64x1024xf32>
    %6 = arith.addf %3, %5 : vector<64x1024xf32>
    %7 = vector.extract_strided_slice %6 {offsets = [0, 0], sizes = [64, 512], strides = [1, 1]} : vector<64x1024xf32> to vector<64x512xf32>
    %8 = vector.extract_strided_slice %6 {offsets = [0, 512], sizes = [64, 512], strides = [1, 1]} : vector<64x1024xf32> to vector<64x512xf32>
    %cst_5 = arith.constant 5.000000e-01 : f32
    %9 = vector.broadcast %cst_5 : f32 to vector<64x512xf32>
    %10 = arith.mulf %9, %8 : vector<64x512xf32>
    %cst_6 = arith.constant 0.707106769 : f32
    %11 = vector.broadcast %cst_6 : f32 to vector<64x512xf32>
    %12 = arith.mulf %8, %11 : vector<64x512xf32>
    %13 = math.erf %12 : vector<64x512xf32>
    %cst_7 = arith.constant 1.000000e+00 : f32
    %14 = vector.broadcast %cst_7 : f32 to vector<64x512xf32>
    %15 = arith.addf %14, %13 : vector<64x512xf32>
    %16 = arith.mulf %10, %15 : vector<64x512xf32>
    %17 = arith.mulf %7, %16 : vector<64x512xf32>
    %18 = arith.truncf %17 : vector<64x512xf32> to vector<64x512xbf16>
    %c0_8 = arith.constant 0 : index
    %c0_9 = arith.constant 0 : index
    %19 = vector.load %arg4[%c0_8, %c0_9] : memref<512x128xbf16, #tpu.memory_space<vmem>>, vector<512x128xbf16>
    %cst_10 = arith.constant dense<0.000000e+00> : vector<64x128xf32>
    %20 = tpu.matmul %18, %19, %cst_10 {dimension_numbers = #tpu.dot_dimension_numbers<[1], [0], [0], [1], [0, 0, 1, 1], [], []>} : vector<64x512xbf16>, vector<512x128xbf16>, vector<64x128xf32> -> vector<64x128xf32>
    %c0_11 = arith.constant 0 : index
    %c0_12 = arith.constant 0 : index
    %21 = vector.load %arg5[%c0_11, %c0_12] : memref<1x128xf32, #tpu.memory_space<vmem>>, vector<1x128xf32>
    %22 = vector.broadcast %21 : vector<1x128xf32> to vector<64x128xf32>
    %23 = arith.addf %20, %22 : vector<64x128xf32>
    %c0_13 = arith.constant 0 : index
    %c0_14 = arith.constant 0 : index
    %24 = vector.load %arg6[%c0_13, %c0_14] : memref<64x128xf32, #tpu.memory_space<vmem>>, vector<64x128xf32>
    tpu.vector_store %arg6[%c0_13, %c0_14], %23 {strides = array<i32>} : memref<64x128xf32, #tpu.memory_space<vmem>>, vector<64x128xf32>,
    return
  }
  func.func @transform_0(%arg0: i32) -> (i32, i32) {
    %c0_i32 = arith.constant 0 : i32
    %c0_i32_0 = arith.constant 0 : i32
    return %arg0, %c0_i32 : i32, i32
  }
  func.func @transform_1(%arg0: i32) -> (i32, i32) {
    %c0_i32 = arith.constant 0 : i32
    %c0_i32_0 = arith.constant 0 : i32
    %c0_i32_1 = arith.constant 0 : i32
    return %c0_i32, %c0_i32_0 : i32, i32
  }
  func.func @transform_2(%arg0: i32) -> (i32, i32) {
    %c0_i32 = arith.constant 0 : i32
    %c0_i32_0 = arith.constant 0 : i32
    %c0_i32_1 = arith.constant 0 : i32
    return %c0_i32, %c0_i32_0 : i32, i32
  }
  func.func @transform_3(%arg0: i32) -> (i32, i32) {
    %c0_i32 = arith.constant 0 : i32
    %c0_i32_0 = arith.constant 0 : i32
    %c0_i32_1 = arith.constant 0 : i32
    return %c0_i32, %c0_i32_0 : i32, i32
  }
  func.func @transform_4(%arg0: i32) -> (i32, i32) {
    %c0_i32 = arith.constant 0 : i32
    %c0_i32_0 = arith.constant 0 : i32
    %c0_i32_1 = arith.constant 0 : i32
    return %c0_i32, %c0_i32_0 : i32, i32
  }
  func.func @transform_5(%arg0: i32) -> (i32, i32) {
    %c0_i32 = arith.constant 0 : i32
    %c0_i32_0 = arith.constant 0 : i32
    return %arg0, %c0_i32 : i32, i32
  }
}

</mosaic_0001>

<bundles_post_ra>
// kernel: tpu_custom_call.1
= control target key start
LH: loop header
LB: loop body
LE: loop exit
PB: predicated region body
PF: predicated region fallthrough
CT: control target
= control target key end

     0   :  { %10 = vsyncpa [#allocation3], 0  ;;  %s3016_s0 = inlined_call_operand.hbm [shape: f32[128,128], index: 0, kind: input, shape index: {}]   ;;  %s3017_s1 = inlined_call_operand.hbm [shape: bf16[128,1024], index: 1, kind: input, shape index: {}]   ;;  %s3018_s2 = inlined_call_operand.hbm [shape: f32[1,1024], index: 2, kind: input, shape index: {}]   ;;  %s3019_s3 = inlined_call_operand.hbm [shape: bf16[512,128], index: 3, kind: input, shape index: {}]   ;;  %s3020_s4 = inlined_call_operand.vmem [shape: f32[1,128], index: 4, kind: input, shape index: {}]   ;;  %s3021_s5 = inlined_call_operand.hbm [shape: f32[128,128], index: 5, kind: output, shape index: {}]  }
   0x1   :  { %12 = vsyncpa [#allocation3 + $0x1], 0 }
   0x2   :  { %13 = vsyncpa [#allocation6], 0 }
   0x3   :  { %14 = vsyncpa [#allocation9], 0 }
   0x4   :  { %15 = vsyncpa [#allocation4], 0 }
   0x5   :  { %17 = vsyncpa [#allocation4 + $0x1], 0  ;;  %s2358_s18 = smov 0   ;;  %s2360_s19 = smov 0  }
   0x6   :  { %s2362_s20 = smov 0   ;;  %s2364_s21 = smov 0  }
   0x7 LB: > { %s2379_s22 = sadd.s32 4294967295, %s2312_s21   ;;  %s1743_s23 = sadd.s32 4294967294, %s2312_s21   ;;  %s2312_s21 = sphi %s2364_s21, %s3082_s21   ;;  %s2308_s20 = sphi %s2362_s20, %s3081_s20   ;;  %s2304_s19 = sphi %s2360_s19, %s3080_s19   ;;  %s2300_s18 = sphi %s2358_s18, %s3079_s18  }
   0x8   : > { %p43_p0 = scmp.ne.s32.totalorder %s2304_s19, %s2300_s18  ;;  %p3022_p1 = scmp.eq.s32.totalorder %s2379_s22, 0 }
   0x9   : > { %p157_p3 = scmp.eq.s32.totalorder %s1743_s23, 1  ;;  %p1744_p5 = scmp.ge.s32.totalorder %s2312_s21, 1 }
   0xa   : > { %p2388_p4 = por %p3022_p1, %p43_p0  ;;  %p164_p7 = scmp.lt.s32.totalorder %s2312_s21, 3 }
   0xb   : > { %p2393_p6 = por %p157_p3, %p43_p0  ;;  %s2314_s27 = smov [#allocation5]  }
   0xc   : > { %s3027_s24 = scalar_select %p2388_p4, 1, 0 }
   0xd   : > { %s3028_s25 = scalar_select %p2393_p6, 1, 0 }
   0xe   : > { %p2398_p8 = pnand %p1744_p5, %p164_p7  ;;  %s176_s28 = sshll.u32 %s2314_s27, 4  ;;  %s2402_s28 = int_to_ptr.vmem [resolvable:$true] %s176_s28 }
   0xf   : > { %s2315_s30 = smov [#allocation7]   ;;  %s2316_s7 = smov [#allocation8]  }
  0x10   : > { %s3029_s26 = scalar_select %p2398_p8, 1, 0 }
  0x11   : > { %p1958_p9 = pneg %p2398_p8  ;;  %s190_s6 = sshll.u32 %s2315_s30, 4  ;;  %s2413_s6 = int_to_ptr.vmem [resolvable:$true] %s190_s6 }
  0x12   : > { %s2415_s8 = sshll.u32 %s2316_s7, 4  ;;  %s2124_s11 = scalar_lea.hbm %s3017_s1, 8192  ;;  %s201_s8 = int_to_ptr.vmem [resolvable:$true] %s2415_s8 }
  0x13   : > { %p2409_p11 = pnand %p1958_p9, %p3022_p1  ;;  %p2125_p12 = scmp.ne.s32.totalorder %s3017_s1, %s2124_s11 }
  0x14   : > { %p2131_p5 = scmp.lt.u32.totalorder %s2124_s11, %s3017_s1 }
  0x15   : > { %p2425_p13 = pneg %p2409_p11 }
  0x17   : > { %p2127_p0 = pnand %p2425_p13, %p2125_p12 }
  0x19   : > { %p2128_p3 = pneg %p2127_p0 }
  0x1b   : > { %p2133_p7 = pnand %p2131_p5, %p2128_p3 }
  0x1d   : > { %2136 = shalt.err (!%p2133_p7)
}
  0x1e   : > { %s2137_s17 = scalar_lea.vmem %s2402_s28, 8192  ;;  %p2145_p2 = scmp.lt.s32.totalorder %s2402_s28, %s2402_s28 }
  0x1f   : > { %p2138_p9 = scmp.ne.s32.totalorder %s2402_s28, %s2137_s17  ;;  %p2146_p6 = scmp.lt.s32.totalorder %s2137_s17, %s2137_s17 }
  0x21   : > { %p2140_p10 = pnand %p2138_p9, %p2425_p13  ;;  %p2147_p12 = por %p2146_p6, %p2145_p2 }
  0x23   : > { %p2141_p1 = pneg %p2140_p10 }
  0x25   : > { %p2148_p0 = pnand %p2147_p12, %p2141_p1 }
  0x27   : > { %2151 = shalt.err (!%p2148_p0)
}
  0x28   : > { %s2317_s23 = smov 512   ;;  %s2318_s27 = smov 32  }
  0x29   : > { %1961 = dma.hbm_to_vmem [thread:$0]  (!%p2409_p11), %s3017_s1, 8192, %s2402_s28, [#allocation6], %s2317_s23, %s2317_s23, %s2318_s27  }
  0x2a   : > { %s2152_s11 = scalar_lea.hbm %s3018_s2, 128 }
  0x2b   : > { %p2153_p2 = scmp.ne.s32.totalorder %s3018_s2, %s2152_s11  ;;  %p2159_p10 = scmp.lt.u32.totalorder %s2152_s11, %s3018_s2 }
  0x2d   : > { %p2155_p1 = pnand %p2153_p2, %p2425_p13 }
  0x2f   : > { %p2156_p6 = pneg %p2155_p1 }
  0x31   : > { %p2161_p3 = pnand %p2159_p10, %p2156_p6 }
  0x33   : > { %2164 = shalt.err (!%p2161_p3)
}
  0x34   : > { %s2165_s28 = scalar_lea.vmem %s2413_s6, 128  ;;  %p2173_p12 = scmp.lt.s32.totalorder %s2413_s6, %s2413_s6 }
  0x35   : > { %p2166_p5 = scmp.ne.s32.totalorder %s2413_s6, %s2165_s28  ;;  %p2174_p0 = scmp.lt.s32.totalorder %s2165_s28, %s2165_s28 }
  0x37   : > { %p2168_p7 = pnand %p2166_p5, %p2425_p13  ;;  %p2175_p2 = por %p2174_p0, %p2173_p12 }
  0x39   : > { %p2169_p9 = pneg %p2168_p7 }
  0x3b   : > { %p2176_p1 = pnand %p2175_p2, %p2169_p9 }
  0x3d   : > { %2179 = shalt.err (!%p2176_p1)
}
  0x3e   : > { %1964 = dma.hbm_to_vmem [thread:$0]  (!%p2409_p11), %s3018_s2, 128, %s2413_s6, [#allocation6]  }
  0x3f   : > { %s2180_s7 = scalar_lea.hbm %s3019_s3, 4096 }
  0x40   : > { %p2181_p6 = scmp.ne.s32.totalorder %s3019_s3, %s2180_s7  ;;  %p2187_p5 = scmp.lt.u32.totalorder %s2180_s7, %s3019_s3 }
  0x42   : > { %p2183_p10 = pnand %p2181_p6, %p2425_p13 }
  0x44   : > { %p2184_p3 = pneg %p2183_p10 }
  0x46   : > { %p2189_p7 = pnand %p2187_p5, %p2184_p3 }
  0x48   : > { %2192 = shalt.err (!%p2189_p7)
}
  0x49   : > { %s2193_s13 = scalar_lea.vmem %s201_s8, 4096  ;;  %p2201_p2 = scmp.lt.s32.totalorder %s201_s8, %s201_s8 }
  0x4a   : > { %p2194_p9 = scmp.ne.s32.totalorder %s201_s8, %s2193_s13  ;;  %p2202_p1 = scmp.lt.s32.totalorder %s2193_s13, %s2193_s13 }
  0x4c   : > { %p2196_p12 = pnand %p2194_p9, %p2425_p13  ;;  %p2203_p4 = por %p2202_p1, %p2201_p2 }
  0x4e   : > { %p2197_p0 = pneg %p2196_p12 }
  0x50   : > { %p2204_p8 = pnand %p2203_p4, %p2197_p0 }
  0x52   : > { %2207 = shalt.err (!%p2204_p8)
}
  0x53   : > { %s2319_s6 = smov 64   ;;  %s2320_s14 = smov 4  }
  0x54   : > { %1967 = dma.hbm_to_vmem [thread:$0]  (!%p2409_p11), %s3019_s3, 4096, %s201_s8, [#allocation9], %s2319_s6, %s2319_s6, %s2320_s14  }
  0x55   : > { %s2489_s28 = sadd.s32 1, %s2312_s21   ;;  %s30_s23 = sadd.s32 1, %s2308_s20 }
  0x56   : > { %s27_s17 = ssub.s32 %s2312_s21, %s2489_s28  ;;  %p37_p8 = scmp.ne.s32.totalorder %s2308_s20, %s2304_s19 }
  0x57   : > { %p28_p4 = scmp.eq.s32.totalorder %s27_s17, 0  ;;  %p38_p13 = scmp.eq.s32.totalorder %s2312_s21, 0 }
  0x58   : > { %p1979_p6 = scmp.lt.s32.totalorder %s2312_s21, 2  ;;  %p3032_p3 = scmp.eq.s32.totalorder %s2379_s22, 1 }
  0x59   : > { %s2499_s27 = scalar_select %p28_p4, %s2308_s20, %s30_s23  }
  0x5a   : > { %p39_p10 = por %p38_p13, %p37_p8  ;;  %p2503_p5 = por %p3032_p3, %p37_p8 }
  0x5b   : > { %s217_s29 = sand.u32 1, %s2308_s20   ;;  %s1860_s7 = sshll.u32 %s2312_s21, 10 }
  0x5c   : > { %s1749_s8 = sshll.u32 %s217_s29, 6  ;;  %s2512_s11 = scalar_lea.hbm %s3016_s0, %s1860_s7 }
  0x5d   : > { %s221_s12 = scalar_lea.vmem [#allocation2], %s1749_s8  ;;  %p2514_p11 = pnand %p1979_p6, %p39_p10 }
  0x5e   : > { %s228_s13 = sshll.u32 %s221_s12, 4  ;;  %s2520_s14 = scalar_lea.sflag [#allocation3], %s217_s29  ;;  %s2518_s13 = int_to_ptr.vmem [resolvable:$true] %s228_s13 }
  0x5f   : > { %s2208_s15 = scalar_lea.hbm %s2512_s11, 1024  ;;  %p2210_p9 = pneg %p2514_p11 }
  0x60   : > { %p2209_p7 = scmp.ne.s32.totalorder %s2512_s11, %s2208_s15  ;;  %s2213_s23 = scalar_lea.hbm %s3016_s0, 2048 }
  0x61   : > { %p2214_p2 = scmp.lt.u32.totalorder %s2512_s11, %s3016_s0  ;;  %p2215_p1 = scmp.lt.u32.totalorder %s2213_s23, %s2208_s15 }
  0x62   : > { %p2211_p12 = pnand %p2210_p9, %p2209_p7  ;;  %p2217_p8 = scmp.lt.u32.totalorder %s2208_s15, %s2512_s11 }
  0x63   : > { %p2216_p4 = por %p2215_p1, %p2214_p2 }
  0x64   : > { %p2212_p0 = pneg %p2211_p12 }
  0x65   : > { %p2218_p13 = por %p2217_p8, %p2216_p4 }
  0x67   : > { %p2219_p6 = pnand %p2218_p13, %p2212_p0 }
  0x69   : > { %2222 = shalt.err (!%p2219_p6)
}
  0x6a   : > { %s2223_s29 = scalar_lea.vmem %s2518_s13, 1024  ;;  %s2321_s9 = smov [#allocation2]  }
  0x6b   : > { %p2224_p10 = scmp.ne.s32.totalorder %s2518_s13, %s2223_s29  ;;  %s2228_s10 = sshll.u32 %s2321_s9, 4  ;;  %s2229_s10 = int_to_ptr.vmem [resolvable:$false] %s2228_s10 }
  0x6c   : > { %s2230_s12 = scalar_lea.vmem %s2229_s10, 2048  ;;  %p2231_p12 = scmp.lt.s32.totalorder %s2518_s13, %s2229_s10 }
  0x6d   : > { %p2226_p3 = pnand %p2224_p10, %p2210_p9  ;;  %p2232_p2 = scmp.lt.s32.totalorder %s2230_s12, %s2223_s29 }
  0x6f   : > { %p2227_p7 = pneg %p2226_p3  ;;  %p2233_p1 = por %p2232_p2, %p2231_p12 }
  0x71   : > { %p2234_p4 = pnand %p2233_p1, %p2227_p7 }
  0x73   : > { %2237 = shalt.err (!%p2234_p4)
}
  0x74   : > { %s2322_s15 = smov 128   ;;  %s2323_s16 = smov 8  }
  0x75   : > { %1971 = dma.hbm_to_vmem [thread:$0]  (!%p2514_p11), %s2512_s11, 1024, %s2518_s13, %s2520_s14, %s2322_s15, %s2322_s15, %s2323_s16  }
  0x76   : > { %p3035_p9 = scmp.ne.s32.totalorder %s3029_s26, 0 }
  0x78   : > { %240 = sbr.rel (%p3035_p9) target bundleno = 730 (0x2da), region = 40 }
  0x7f   : > { %s2551_s17 = sand.u32 1, %s2304_s19   ;;  %p3036_p0 = scmp.ne.s32.totalorder %s3027_s24, 0 }
  0x80   : > { %s1753_s23 = sshll.u32 %s2551_s17, 6  ;;  %s243_s7 = scalar_lea.sflag [#allocation3], %s2551_s17 }
  0x81   : > { %s2557_s8 = scalar_lea.vmem [#allocation2], %s1753_s23 }
  0x82   : > { %2283 = dma.done.wait (%p3036_p0), %s243_s7, 1024  }
  0x83   : > { %2285 = vsyncadd (%p3036_p0), %s243_s7, 4294966272  ;;  %p3037_p11 = scmp.eq.s32.totalorder %s2379_s22, 0 }
  0x85   : > { %2287 = dma.done.wait (%p3037_p11), [#allocation6], 8320   ;;  %p3038_p8 = pmov %p3037_p11 }
  0x87   : > { %2289 = vsyncadd (%p3038_p8), [#allocation6], 4294958976  ;;  %p3039_p13 = pmov %p3038_p8 }
  0x88   : > { %p3040_p6 = pmov %p3038_p8 }
  0x89   : > { %2291 = dma.done.wait (%p3039_p13), [#allocation9], 4096  }
  0x8a   : > { %2293 = vsyncadd (%p3040_p6), [#allocation9], 4294963200  ;;  %v2324_v0 = vmov 0   ;;  %v300_v1 = vld [vmem:[#allocation5] sm:$0xff]  ;;  %v301_v3 = vld [vmem:[#allocation5 + $0x8] sm:$0xff]  ;;  %s2949_s11 = scalar_lea.vmem [#allocation10], %s1753_s23 }
  0x8b   : > { %758 = vmatprep.mubr.bf16.mxu0 %v2324_v0  ;;  %831 = vmatprep.mubr.bf16.mxu1 %v2324_v0  ;;  %v304_v2 = vld [vmem:[#allocation5 + $0x20] sm:$0xff]  ;;  %v305_v5 = vld [vmem:[#allocation5 + $0x28] sm:$0xff]  ;;  %v302_v60 = vld [vmem:[#allocation5 + $0x10] sm:$0xff]  ;;  %s1641_s13 = sshll.u32 %s2949_s11, 4  ;;  %s1861_s6 = sshll.u32 %s2379_s22, 10  ;;  %s2964_s13 = int_to_ptr.vmem [resolvable:$true] %s1641_s13 }
  0x8c   : > { %v1759_v4 = vcombine.high %v300_v1, %v304_v2  ;;  %v1758_v6 = vcombine.low %v300_v1, %v304_v2  ;;  %v308_v7 = vld [vmem:[#allocation5 + $0x40] sm:$0xff]  ;;  %v1761_v9 = vcombine.high %v301_v3, %v305_v5  ;;  %v1760_v10 = vcombine.low %v301_v3, %v305_v5  ;;  %v309_v12 = vld [vmem:[#allocation5 + $0x48] sm:$0xff]  ;;  %v306_v61 = vld [vmem:[#allocation5 + $0x30] sm:$0xff]  ;;  %s2970_s9 = scalar_lea.hbm %s3021_s5, %s1861_s6  ;;  %s1628_s10 = scalar_lea.sflag [#allocation4], %s2551_s17 }
  0x8d   : > { %v312_v8 = vld [vmem:[#allocation5 + $0x60] sm:$0xff]  ;;  %v313_v13 = vld [vmem:[#allocation5 + $0x68] sm:$0xff]  ;;  %v303_v1 = vld [vmem:[#allocation5 + $0x18] sm:$0xff]  ;;  %s2238_s12 = scalar_lea.vmem %s2964_s13, 1024  ;;  %s2325_s22 = smov [#allocation10]  }
  0x8e   : > { %v1767_v11 = vcombine.high %v308_v7, %v312_v8  ;;  %v316_v14 = vld [vmem:[#allocation5 + $0x80] sm:$0xff]  ;;  %726 = vmatprep.subr.bf16.mxu0 %v1759_v4  ;;  %v1769_v15 = vcombine.high %v309_v12, %v313_v13  ;;  %v317_v17 = vld [vmem:[#allocation5 + $0x88] sm:$0xff]  ;;  %799 = vmatprep.subr.bf16.mxu1 %v1761_v9  ;;  %v1766_v19 = vcombine.low %v308_v7, %v312_v8  ;;  %v307_v2 = vld [vmem:[#allocation5 + $0x38] sm:$0xff]  ;;  %p2239_p10 = scmp.ne.s32.totalorder %s2964_s13, %s2238_s12  ;;  %s2242_s15 = sshll.u32 %s2325_s22, 4  ;;  %s2243_s15 = int_to_ptr.vmem [resolvable:$false] %s2242_s15 }
  0x8f   : > { %v320_v16 = vld [vmem:[#allocation5 + $0xa0] sm:$0xff]  ;;  %v321_v18 = vld [vmem:[#allocation5 + $0xa8] sm:$0xff]  ;;  %727 = vmatpush1.bf16.msra.mxu0 %v1758_v6  ;;  %800 = vmatpush1.bf16.msra.mxu1 %v1760_v10  ;;  %v1768_v20 = vcombine.low %v309_v12, %v313_v13  ;;  %v310_v7 = vld [vmem:[#allocation5 + $0x50] sm:$0xff]  ;;  %v1763_v10 = vcombine.high %v302_v60, %v306_v61  ;;  %v1765_v13 = vcombine.high %v303_v1, %v307_v2  ;;  %s2244_s16 = scalar_lea.vmem %s2243_s15, 2048  ;;  %p2245_p12 = scmp.lt.s32.totalorder %s2964_s13, %s2243_s15 }
  0x90   : > { %728 = vmatprep.subr.bf16.mxu0 %v1767_v11  ;;  %v1775_v21 = vcombine.high %v316_v14, %v320_v16  ;;  %801 = vmatprep.subr.bf16.mxu1 %v1769_v15  ;;  %v1777_v22 = vcombine.high %v317_v17, %v321_v18  ;;  %v324_v23 = vld [vmem:[#allocation5 + $0xc0] sm:$0xff]  ;;  %v325_v25 = vld [vmem:[#allocation5 + $0xc8] sm:$0xff]  ;;  %v1774_v27 = vcombine.low %v316_v14, %v320_v16  ;;  %v314_v8 = vld [vmem:[#allocation5 + $0x70] sm:$0xff]  ;;  %p2240_p3 = pnand %p2239_p10, %p2503_p5  ;;  %p2246_p2 = scmp.lt.s32.totalorder %s2244_s16, %s2238_s12 }
  0x91   : > { %v328_v24 = vld [vmem:[#allocation5 + $0xe0] sm:$0xff]  ;;  %v329_v26 = vld [vmem:[#allocation5 + $0xe8] sm:$0xff]  ;;  %v1776_v28 = vcombine.low %v317_v17, %v321_v18  ;;  %v311_v11 = vld [vmem:[#allocation5 + $0x58] sm:$0xff]  ;;  %v1762_v15 = vcombine.low %v302_v60, %v306_v61  ;;  %v1764_v18 = vcombine.low %v303_v1, %v307_v2 }
  0x92   : > { %v1783_v29 = vcombine.high %v324_v23, %v328_v24  ;;  %v1785_v30 = vcombine.high %v325_v25, %v329_v26  ;;  %v332_v31 = vld [vmem:[#allocation5 + $0x100] sm:$0xff]  ;;  %v333_v33 = vld [vmem:[#allocation5 + $0x108] sm:$0xff]  ;;  %v1782_v35 = vcombine.low %v324_v23, %v328_v24  ;;  %v1784_v36 = vcombine.low %v325_v25, %v329_v26  ;;  %v315_v12 = vld [vmem:[#allocation5 + $0x78] sm:$0xff]  ;;  %p2241_p7 = pneg %p2240_p3  ;;  %p2247_p1 = por %p2246_p2, %p2245_p12 }
  0x93   : > { %729 = vmatpush1.bf16.msra.mxu0 %v1766_v19  ;;  %802 = vmatpush1.bf16.msra.mxu1 %v1768_v20  ;;  %v336_v32 = vld [vmem:[#allocation5 + $0x120] sm:$0xff]  ;;  %v337_v34 = vld [vmem:[#allocation5 + $0x128] sm:$0xff]  ;;  %v318_v16 = vld [vmem:[#allocation5 + $0x90] sm:$0xff]  ;;  %v1771_v19 = vcombine.high %v310_v7, %v314_v8  ;;  %v1770_v25 = vcombine.low %v310_v7, %v314_v8 }
  0x94   : > { %730 = vmatprep.subr.bf16.mxu0 %v1775_v21  ;;  %803 = vmatprep.subr.bf16.mxu1 %v1777_v22  ;;  %v1791_v37 = vcombine.high %v332_v31, %v336_v32  ;;  %v1793_v38 = vcombine.high %v333_v33, %v337_v34  ;;  %v340_v39 = vld [vmem:[#allocation5 + $0x140] sm:$0xff]  ;;  %v341_v41 = vld [vmem:[#allocation5 + $0x148] sm:$0xff]  ;;  %v1790_v43 = vcombine.low %v332_v31, %v336_v32  ;;  %v322_v17 = vld [vmem:[#allocation5 + $0xb0] sm:$0xff]  ;;  %p2248_p4 = pnand %p2247_p1, %p2241_p7 }
  0x95   : > { %v344_v40 = vld [vmem:[#allocation5 + $0x160] sm:$0xff]  ;;  %v345_v42 = vld [vmem:[#allocation5 + $0x168] sm:$0xff]  ;;  %v1792_v44 = vcombine.low %v333_v33, %v337_v34  ;;  %v319_v20 = vld [vmem:[#allocation5 + $0x98] sm:$0xff]  ;;  %v1773_v22 = vcombine.high %v311_v11, %v315_v12  ;;  %v1778_v34 = vcombine.low %v318_v16, %v322_v17 }
  0x96   : > { %v1799_v45 = vcombine.high %v340_v39, %v344_v40  ;;  %v1801_v46 = vcombine.high %v341_v41, %v345_v42  ;;  %v348_v47 = vld [vmem:[#allocation5 + $0x180] sm:$0xff]  ;;  %v349_v49 = vld [vmem:[#allocation5 + $0x188] sm:$0xff]  ;;  %v1798_v51 = vcombine.low %v340_v39, %v344_v40  ;;  %v1800_v52 = vcombine.low %v341_v41, %v345_v42  ;;  %v323_v21 = vld [vmem:[#allocation5 + $0xb8] sm:$0xff] }
  0x97   : > { %731 = vmatpush1.bf16.msra.mxu0 %v1774_v27  ;;  %804 = vmatpush1.bf16.msra.mxu1 %v1776_v28  ;;  %v352_v48 = vld [vmem:[#allocation5 + $0x1a0] sm:$0xff]  ;;  %v353_v50 = vld [vmem:[#allocation5 + $0x1a8] sm:$0xff]  ;;  %v290_v23 = vld [vmem:[%s2557_s8 + $0x10] sm:$0xff]  ;;  %v1772_v28 = vcombine.low %v311_v11, %v315_v12  ;;  %v1781_v32 = vcombine.high %v319_v20, %v323_v21 }
  0x98   : > { %732 = vmatprep.subr.bf16.mxu0 %v1783_v29  ;;  %805 = vmatprep.subr.bf16.mxu1 %v1785_v30  ;;  %v1807_v53 = vcombine.high %v348_v47, %v352_v48  ;;  %v1809_v54 = vcombine.high %v349_v49, %v353_v50  ;;  %v356_v55 = vld [vmem:[#allocation5 + $0x1c0] sm:$0xff]  ;;  %v357_v57 = vld [vmem:[#allocation5 + $0x1c8] sm:$0xff]  ;;  %v1806_v59 = vcombine.low %v348_v47, %v352_v48  ;;  %v291_v24 = vld [vmem:[%s2557_s8 + $0x18] sm:$0xff] }
  0x99   : > { %v360_v56 = vld [vmem:[#allocation5 + $0x1e0] sm:$0xff]  ;;  %v361_v58 = vld [vmem:[#allocation5 + $0x1e8] sm:$0xff]  ;;  %v1808_v62 = vcombine.low %v349_v49, %v353_v50  ;;  %v326_v26 = vld [vmem:[#allocation5 + $0xd0] sm:$0xff]  ;;  %v1779_v29 = vcombine.high %v318_v16, %v322_v17  ;;  %v2583_v33 = vpack.c.bf16 %v291_v24, %v290_v23 }
  0x9a   : > { %v1815_v63 = vcombine.high %v356_v55, %v360_v56  ;;  %v1817_v3 = vcombine.high %v357_v57, %v361_v58  ;;  %v288_v4 = vld [vmem:[%s2557_s8] sm:$0xff]  ;;  %v289_v5 = vld [vmem:[%s2557_s8 + $0x8] sm:$0xff]  ;;  %v1814_v6 = vcombine.low %v356_v55, %v360_v56  ;;  %v1816_v9 = vcombine.low %v357_v57, %v361_v58  ;;  %v330_v27 = vld [vmem:[#allocation5 + $0xf0] sm:$0xff] }
  0x9b   : > { %733 = vmatpush1.bf16.msra.mxu0 %v1782_v35  ;;  %806 = vmatpush1.bf16.msra.mxu1 %v1784_v36  ;;  %v2575_v14 = vpack.c.bf16 %v289_v5, %v288_v4  ;;  %v327_v30 = vld [vmem:[#allocation5 + $0xd8] sm:$0xff]  ;;  %v334_v35 = vld [vmem:[#allocation5 + $0x110] sm:$0xff]  ;;  %v292_v42 = vld [vmem:[%s2557_s8 + $0x20] sm:$0xff] }
  0x9c   : > { %734 = vmatprep.subr.bf16.mxu0 %v1791_v37  ;;  %807 = vmatprep.subr.bf16.mxu1 %v1793_v38  ;;  %v331_v31 = vld [vmem:[#allocation5 + $0xf8] sm:$0xff]  ;;  %v338_v36 = vld [vmem:[#allocation5 + $0x130] sm:$0xff]  ;;  %v1780_v37 = vcombine.low %v319_v20, %v323_v21  ;;  %v1787_v38 = vcombine.high %v326_v26, %v330_v27  ;;  %v2029_v16 = vld [vmem:[#allocation8 + $0xc0] sm:$0xff]  }
  0x9d   : > { %v335_v39 = vld [vmem:[#allocation5 + $0x118] sm:$0xff]  ;;  %v1789_v41 = vcombine.high %v327_v30, %v331_v31  ;;  %v342_v48 = vld [vmem:[#allocation5 + $0x150] sm:$0xff]  ;;  %v2030_v17 = vld [vmem:[#allocation8] sm:$0xff]  }
  0x9e   : > { %v339_v40 = vld [vmem:[#allocation5 + $0x138] sm:$0xff]  ;;  %v346_v49 = vld [vmem:[#allocation5 + $0x170] sm:$0xff] }
  0x9f   : > { %735 = vmatpush1.bf16.msra.mxu0 %v1790_v43  ;;  %808 = vmatpush1.bf16.msra.mxu1 %v1792_v44  ;;  %v293_v43 = vld [vmem:[%s2557_s8 + $0x28] sm:$0xff]  ;;  %v1786_v44 = vcombine.low %v326_v26, %v330_v27  ;;  %v1797_v47 = vcombine.high %v335_v39, %v339_v40  ;;  %v1803_v55 = vcombine.high %v342_v48, %v346_v49  ;;  %v350_v57 = vld [vmem:[#allocation5 + $0x190] sm:$0xff]  ;;  %v355_v60 = vld [vmem:[#allocation5 + $0x1b8] sm:$0xff] }
  0xa0   : > { %736 = vmatprep.subr.bf16.mxu0 %v1799_v45  ;;  %809 = vmatprep.subr.bf16.mxu1 %v1801_v46  ;;  %v1788_v45 = vcombine.low %v327_v30, %v331_v31  ;;  %v1795_v46 = vcombine.high %v334_v35, %v338_v36  ;;  %v298_v50 = vpack.c.bf16 %v293_v43, %v292_v42  ;;  %v354_v58 = vld [vmem:[#allocation5 + $0x1b0] sm:$0xff]  ;;  %v359_v7 = vld [vmem:[#allocation5 + $0x1d8] sm:$0xff]  ;;  %v2040_v26 = vld [vmem:[#allocation8 + $0x58] sm:$0xff]  }
  0xa1   : > { %v1802_v61 = vcombine.low %v342_v48, %v346_v49  ;;  %v1811_v2 = vcombine.high %v350_v57, %v354_v58  ;;  %v358_v4 = vld [vmem:[#allocation5 + $0x1d0] sm:$0xff]  ;;  %v363_v8 = vld [vmem:[#allocation5 + $0x1f8] sm:$0xff]  ;;  %v2041_v27 = vld [vmem:[#allocation8 + $0xd8] sm:$0xff]  }
  0xa2   : > { %v362_v5 = vld [vmem:[#allocation5 + $0x1f0] sm:$0xff]  ;;  %v1821_v12 = vcombine.high %v359_v7, %v363_v8  ;;  %v2036_v23 = vld [vmem:[#allocation8 + $0x50] sm:$0xff]   ;;  %v2044_v30 = vld [vmem:[#allocation8 + $0x60] sm:$0xff]  }
  0xa3   : > { %737 = vmatpush1.bf16.msra.mxu0 %v1798_v51  ;;  %810 = vmatpush1.bf16.msra.mxu1 %v1800_v52  ;;  %v343_v51 = vld [vmem:[#allocation5 + $0x158] sm:$0xff]  ;;  %v1819_v11 = vcombine.high %v358_v4, %v362_v5  ;;  %v2033_v20 = vld [vmem:[#allocation8 + $0xc8] sm:$0xff]   ;;  %v2045_v31 = vld [vmem:[#allocation8 + $0xe0] sm:$0xff]  }
  0xa4   : > { %738 = vmatprep.subr.bf16.mxu0 %v1807_v53  ;;  %811 = vmatprep.subr.bf16.mxu1 %v1809_v54  ;;  %v347_v52 = vld [vmem:[#allocation5 + $0x178] sm:$0xff]  ;;  %v1794_v53 = vcombine.low %v334_v35, %v338_v36  ;;  %v1796_v54 = vcombine.low %v335_v39, %v339_v40  ;;  %v2034_v21 = vld [vmem:[#allocation8 + $0x8] sm:$0xff]   ;;  %v2056_v42 = vld [vmem:[#allocation8 + $0x78] sm:$0xff]  }
  0xa5   : > { %v1805_v56 = vcombine.high %v343_v51, %v347_v52  ;;  %v1804_v1 = vcombine.low %v343_v51, %v347_v52  ;;  %v2038_v24 = vld [vmem:[#allocation8 + $0x10] sm:$0xff]   ;;  %v2049_v35 = vld [vmem:[#allocation8 + $0xe8] sm:$0xff]   ;;  %v2057_v43 = vld [vmem:[#allocation8 + $0xf8] sm:$0xff]  }
  0xa6   : > { %v2050_v36 = vld [vmem:[#allocation8 + $0x28] sm:$0xff]   ;;  %v2053_v39 = vld [vmem:[#allocation8 + $0xf0] sm:$0xff]  }
  0xa7   : > { %739 = vmatpush1.bf16.msra.mxu0 %v1806_v59  ;;  %812 = vmatpush1.bf16.msra.mxu1 %v1808_v62  ;;  %v351_v59 = vld [vmem:[#allocation5 + $0x198] sm:$0xff]  ;;  %v294_v62 = vld [vmem:[%s2557_s8 + $0x30] sm:$0xff] }
  0xa8   : > { %740 = vmatprep.subr.bf16.mxu0 %v1815_v63  ;;  %813 = vmatprep.subr.bf16.mxu1 %v1817_v3  ;;  %v295_v63 = vld [vmem:[%s2557_s8 + $0x38] sm:$0xff]  ;;  %v1813_v3 = vcombine.high %v351_v59, %v355_v60 }
  0xa9   : > { %v2054_v40 = vld [vmem:[#allocation8 + $0x30] sm:$0xff]  }
  0xab   : > { %741 = vmatpush1.bf16.msra.mxu0 %v1814_v6  ;;  %814 = vmatpush1.bf16.msra.mxu1 %v1816_v9  ;;  %v299_v6 = vpack.c.bf16 %v295_v63, %v294_v62  ;;  %v1810_v9 = vcombine.low %v350_v57, %v354_v58 }
  0xac   : > { %872 = vmatprep.subr.bf16.mxu0 %v1763_v10  ;;  %945 = vmatprep.subr.bf16.mxu1 %v1765_v13  ;;  %v1812_v10 = vcombine.low %v351_v59, %v355_v60  ;;  %v1818_v13 = vcombine.low %v358_v4, %v362_v5 }
  0xae   : > { %759 = vmatmul.mubr.bf16.vlgmr.msra.gmra.mrb[0].mxu0 %v2575_v14  ;;  %832 = vmatmul.mubr.bf16.vlgmr.msra.gmra.mrb[0].mxu1 %v2575_v14 }
  0xaf   : > { %873 = vmatpush1.bf16.msra.mxu0 %v1762_v15  ;;  %946 = vmatpush1.bf16.msra.mxu1 %v1764_v18  ;;  %v1820_v15 = vcombine.low %v359_v7, %v363_v8  ;;  %v2031_v18 = vld [vmem:[#allocation8 + $0x80] sm:$0xff]  }
  0xb0   : > { %874 = vmatprep.subr.bf16.mxu0 %v1771_v19  ;;  %947 = vmatprep.subr.bf16.mxu1 %v1773_v22  ;;  %v2032_v19 = vld [vmem:[#allocation8 + $0x48] sm:$0xff]  }
  0xb1   : > { %768 = vmatprep.mubr.bf16.mxu0 %v2324_v0  ;;  %841 = vmatprep.mubr.bf16.mxu1 %v2324_v0  ;;  %v2035_v22 = vld [vmem:[#allocation8 + $0x88] sm:$0xff]  }
  0xb3   : > { %875 = vmatpush1.bf16.msra.mxu0 %v1770_v25  ;;  %948 = vmatpush1.bf16.msra.mxu1 %v1772_v28  ;;  %v2039_v25 = vld [vmem:[#allocation8 + $0x90] sm:$0xff]   ;;  %v2042_v28 = vld [vmem:[#allocation8 + $0x18] sm:$0xff]  }
  0xb4   : > { %876 = vmatprep.subr.bf16.mxu0 %v1779_v29  ;;  %949 = vmatprep.subr.bf16.mxu1 %v1781_v32  ;;  %v2043_v29 = vld [vmem:[#allocation8 + $0x98] sm:$0xff]   ;;  %v2046_v32 = vld [vmem:[#allocation8 + $0x20] sm:$0xff]  }
  0xb6   : > { %769 = vmatmul.mubr.bf16.gmra.mrb[4].mxu0 %v2583_v33  ;;  %842 = vmatmul.mubr.bf16.gmra.mrb[4].mxu1 %v2583_v33 }
  0xb7   : > { %877 = vmatpush1.bf16.msra.mxu0 %v1778_v34  ;;  %950 = vmatpush1.bf16.msra.mxu1 %v1780_v37  ;;  %v2048_v34 = vld [vmem:[#allocation8 + $0x68] sm:$0xff]  }
  0xb8   : > { %878 = vmatprep.subr.bf16.mxu0 %v1787_v38  ;;  %951 = vmatprep.subr.bf16.mxu1 %v1789_v41  ;;  %v2051_v37 = vld [vmem:[#allocation8 + $0xa8] sm:$0xff]   ;;  %v2052_v38 = vld [vmem:[#allocation8 + $0x70] sm:$0xff]  }
  0xb9   : > { %778 = vmatprep.mubr.bf16.mxu0 %v2324_v0  ;;  %851 = vmatprep.mubr.bf16.mxu1 %v2324_v0  ;;  %v2055_v41 = vld [vmem:[#allocation8 + $0xb0] sm:$0xff]  }
  0xbb   : > { %879 = vmatpush1.bf16.msra.mxu0 %v1786_v44  ;;  %952 = vmatpush1.bf16.msra.mxu1 %v1788_v45  ;;  %v2058_v44 = vld [vmem:[#allocation8 + $0x38] sm:$0xff]  }
  0xbc   : > { %880 = vmatprep.subr.bf16.mxu0 %v1795_v46  ;;  %953 = vmatprep.subr.bf16.mxu1 %v1797_v47  ;;  %v2059_v45 = vld [vmem:[#allocation8 + $0xb8] sm:$0xff]  }
  0xbe   : > { %779 = vmatmul.mubr.bf16.gmra.mrb[8].mxu0 %v298_v50  ;;  %852 = vmatmul.mubr.bf16.gmra.mrb[8].mxu1 %v298_v50 }
  0xbf   : > { %881 = vmatpush1.bf16.msra.mxu0 %v1794_v53  ;;  %954 = vmatpush1.bf16.msra.mxu1 %v1796_v54 }
  0xc0   : > { %882 = vmatprep.subr.bf16.mxu0 %v1803_v55  ;;  %955 = vmatprep.subr.bf16.mxu1 %v1805_v56 }
  0xc1   : > { %788 = vmatprep.mubr.bf16.mxu0 %v2324_v0  ;;  %861 = vmatprep.mubr.bf16.mxu1 %v2324_v0 }
  0xc3   : > { %883 = vmatpush1.bf16.msra.mxu0 %v1802_v61  ;;  %956 = vmatpush1.bf16.msra.mxu1 %v1804_v1  ;;  %v366_v61 = vlaneseq }
  0xc4   : > { %884 = vmatprep.subr.bf16.mxu0 %v1811_v2  ;;  %957 = vmatprep.subr.bf16.mxu1 %v1813_v3 }
  0xc5   : > { %v367_v63 = vshrl.u32 %v366_v61, 7 }
  0xc6   : > { %789 = vmatmul.mubr.bf16.gmra.mrb[12].mxu0 %v299_v6  ;;  %862 = vmatmul.mubr.bf16.gmra.mrb[12].mxu1 %v299_v6 }
  0xc7   : > { %885 = vmatpush1.bf16.msra.mxu0 %v1810_v9  ;;  %958 = vmatpush1.bf16.msra.mxu1 %v1812_v10  ;;  %v368_v8 = vsub.s32 0, %v367_v63  ;;  %v376_v9 = vsub.s32 2, %v367_v63  ;;  %v372_v10 = vsub.s32 1, %v367_v63 }
  0xc8   : > { %886 = vmatprep.subr.bf16.mxu0 %v1819_v11  ;;  %959 = vmatprep.subr.bf16.mxu1 %v1821_v12  ;;  %v380_v11 = vsub.s32 3, %v367_v63 }
  0xc9   : > { %904 = vmatprep.mubr.bf16.mxu0 %v2324_v0  ;;  %977 = vmatprep.mubr.bf16.mxu1 %v2324_v0 }
  0xcb   : > { %887 = vmatpush1.bf16.msra.mxu0 %v1818_v13  ;;  %960 = vmatpush1.bf16.msra.mxu1 %v1820_v15  ;;  %v364_v13 = vld [vmem:[#allocation7] sm:$0xff]  ;;  %v384_v15 = vsub.s32 4, %v367_v63 }
  0xcc   : > { %1902 = vmatprep.subr.bf16.mxu1 %v2029_v16  ;;  %v388_v16 = vsub.s32 5, %v367_v63 }
  0xce   : > { %905 = vmatmul.mubr.bf16.vlgmr.msra.gmra.mrb[16].mxu0 %v2575_v14  ;;  %978 = vmatmul.mubr.bf16.vlgmr.msra.gmra.mrb[16].mxu1 %v2575_v14  ;;  %v2028_v14 = vld [vmem:[#allocation8 + $0x40] sm:$0xff]  }
  0xcf   : > { %914 = vmatprep.mubr.bf16.mxu0 %v2324_v0  ;;  %987 = vmatprep.mubr.bf16.mxu1 %v2324_v0 }
  0xd0   : > { %1862 = vmatprep.subr.bf16.mxu0 %v2028_v14  ;;  %1903 = vmatpush3.bf16.msra.mxu1 %v2031_v18  ;;  %v392_v14 = vsub.s32 6, %v367_v63  ;;  %v369_v18 = vrot.slane %v364_v13, %v368_v8 }
  0xd1   : > { %1863 = vmatpush3.bf16.msra.mxu0 %v2030_v17  ;;  %1904 = vmatprep.subr.bf16.mxu1 %v2033_v20  ;;  %v396_v17 = vsub.s32 7, %v367_v63  ;;  %v2607_v20 = vrot.slane %v364_v13, %v372_v10 }
  0xd2   : > { %1864 = vmatprep.subr.bf16.mxu0 %v2032_v19  ;;  %v377_v19 = vrot.slane %v364_v13, %v376_v9 }
  0xd3   : > { %3041 = vst [vmem:[#allocation15_spill] sm:$0xff] %v2607_v20 }
  0xd4   : > { %1905 = vmatpush3.bf16.msra.mxu1 %v2035_v22 }
  0xd5   : > { %1865 = vmatpush3.bf16.msra.mxu0 %v2034_v21  ;;  %v2609_v21 = vrot.slane %v364_v13, %v380_v11 }
  0xd6   : > { %915 = vmatmul.mubr.bf16.gmra.mrb[20].mxu0 %v2583_v33  ;;  %988 = vmatmul.mubr.bf16.gmra.mrb[20].mxu1 %v2583_v33  ;;  %v2047_v33 = vld [vmem:[#allocation8 + $0xa0] sm:$0xff]  }
  0xd7   : > { %924 = vmatprep.mubr.bf16.mxu0 %v2324_v0  ;;  %997 = vmatprep.mubr.bf16.mxu1 %v2324_v0  ;;  %3042 = vst [vmem:[#allocation16_spill] sm:$0xff] %v2609_v21 }
  0xd8   : > { %1866 = vmatprep.subr.bf16.mxu0 %v2036_v23 }
  0xd9   : > { %1867 = vmatpush3.bf16.msra.mxu0 %v2038_v24 }
  0xda   : > { %1868 = vmatprep.subr.bf16.mxu0 %v2040_v26 }
  0xdd   : > { %1869 = vmatpush3.bf16.msra.mxu0 %v2042_v28  ;;  %v2613_v28 = vrot.slane %v364_v13, %v384_v15 }
  0xde   : > { %925 = vmatmul.mubr.bf16.gmra.mrb[24].mxu0 %v298_v50  ;;  %998 = vmatmul.mubr.bf16.gmra.mrb[24].mxu1 %v298_v50 }
  0xdf   : > { %934 = vmatprep.mubr.bf16.mxu0 %v2324_v0  ;;  %1007 = vmatprep.mubr.bf16.mxu1 %v2324_v0  ;;  %v2037_v0 = vld [vmem:[#allocation8 + $0xd0] sm:$0xff]  }
  0xe0   : > { %1906 = vmatprep.subr.bf16.mxu1 %v2037_v0  ;;  %1870 = vmatprep.subr.bf16.mxu0 %v2044_v30  ;;  %v2617_v30 = vrot.slane %v364_v13, %v388_v16 }
  0xe1   : > { %1907 = vmatpush3.bf16.msra.mxu1 %v2039_v25  ;;  %1871 = vmatpush3.bf16.msra.mxu0 %v2046_v32 }
  0xe2   : > { %1908 = vmatprep.subr.bf16.mxu1 %v2041_v27  ;;  %1872 = vmatprep.subr.bf16.mxu0 %v2048_v34 }
  0xe5   : > { %1909 = vmatpush3.bf16.msra.mxu1 %v2043_v29  ;;  %1873 = vmatpush3.bf16.msra.mxu0 %v2050_v36  ;;  %v2615_v29 = vrot.slane %v364_v13, %v392_v14 }
  0xe6   : > { %935 = vmatmul.mubr.bf16.gmra.mrb[28].mxu0 %v299_v6  ;;  %1008 = vmatmul.mubr.bf16.gmra.mrb[28].mxu1 %v299_v6 }
  0xe7   : > { %1910 = vmatprep.subr.bf16.mxu1 %v2045_v31  ;;  %1874 = vmatprep.subr.bf16.mxu0 %v2052_v38  ;;  %v2619_v31 = vrot.slane %v364_v13, %v396_v17 }
  0xe9   : > { %1911 = vmatpush3.bf16.msra.mxu1 %v2047_v33  ;;  %1875 = vmatpush3.bf16.msra.mxu0 %v2054_v40 }
  0xea   : > { %1912 = vmatprep.subr.bf16.mxu1 %v2049_v35  ;;  %1876 = vmatprep.subr.bf16.mxu0 %v2056_v42 }
  0xed   : > { %1913 = vmatpush3.bf16.msra.mxu1 %v2051_v37  ;;  %1877 = vmatpush3.bf16.msra.mxu0 %v2058_v44 }
  0xee   : > { %1914 = vmatprep.subr.bf16.mxu1 %v2053_v39 }
  0xf1   : > { %1915 = vmatpush3.bf16.msra.mxu1 %v2055_v41 }
  0xf2   : > { %1916 = vmatprep.subr.bf16.mxu1 %v2057_v43 }
  0xf5   : > { %1917 = vmatpush3.bf16.msra.mxu1 %v2059_v45 }
 0x181   : > { %v760_v46 = vpop.f32.mrb[0].mxu0  ;;  %v833_v47 = vpop.f32.mrb[0].mxu1 }
 0x182   : > { %v762_v48 = vpop.f32.mrb[1].mxu0  ;;  %v835_v49 = vpop.f32.mrb[1].mxu1  ;;  %v2621_v32 = vadd.f32 %v760_v46, %v369_v18  ;;  %v2623_v33 = vadd.f32 %v833_v47, %v377_v19 }
 0x183   : > { %v764_v50 = vpop.f32.mrb[2].mxu0  ;;  %v837_v51 = vpop.f32.mrb[2].mxu1  ;;  %v2626_v34 = vadd.f32 %v762_v48, %v2607_v20  ;;  %v2629_v35 = vadd.f32 %v835_v49, %v2609_v21 }
 0x184   : > { %v766_v52 = vpop.f32.mrb[3].mxu0  ;;  %v839_v53 = vpop.f32.mrb[3].mxu1  ;;  %v2633_v37 = vadd.f32 %v764_v50, %v369_v18  ;;  %v2635_v38 = vadd.f32 %v837_v51, %v377_v19 }
 0x185   : > { %v2638_v39 = vadd.f32 %v766_v52, %v2607_v20  ;;  %v2641_v40 = vadd.f32 %v839_v53, %v2609_v21 }
 0x189   : > { %v770_v54 = vpop.f32.mrb[4].mxu0  ;;  %v843_v55 = vpop.f32.mrb[4].mxu1 }
 0x18a   : > { %v772_v56 = vpop.f32.mrb[5].mxu0  ;;  %v845_v57 = vpop.f32.mrb[5].mxu1  ;;  %v2643_v41 = vadd.f32 %v770_v54, %v369_v18  ;;  %v2645_v42 = vadd.f32 %v843_v55, %v377_v19 }
 0x18b   : > { %v774_v58 = vpop.f32.mrb[6].mxu0  ;;  %v847_v59 = vpop.f32.mrb[6].mxu1  ;;  %v2648_v43 = vadd.f32 %v772_v56, %v2607_v20  ;;  %v2651_v44 = vadd.f32 %v845_v57, %v2609_v21 }
 0x18c   : > { %v776_v60 = vpop.f32.mrb[7].mxu0  ;;  %v849_v62 = vpop.f32.mrb[7].mxu1  ;;  %v2653_v45 = vadd.f32 %v774_v58, %v369_v18  ;;  %v2655_v46 = vadd.f32 %v847_v59, %v377_v19 }
 0x18d   : > { %v2658_v47 = vadd.f32 %v776_v60, %v2607_v20  ;;  %v2661_v48 = vadd.f32 %v849_v62, %v2609_v21 }
 0x191   : > { %v780_v1 = vpop.f32.mrb[8].mxu0  ;;  %v853_v2 = vpop.f32.mrb[8].mxu1 }
 0x192   : > { %v782_v3 = vpop.f32.mrb[9].mxu0  ;;  %v855_v4 = vpop.f32.mrb[9].mxu1  ;;  %v2663_v49 = vadd.f32 %v780_v1, %v369_v18  ;;  %v2665_v50 = vadd.f32 %v853_v2, %v377_v19 }
 0x193   : > { %v784_v5 = vpop.f32.mrb[10].mxu0  ;;  %v857_v6 = vpop.f32.mrb[10].mxu1  ;;  %v2668_v51 = vadd.f32 %v782_v3, %v2607_v20  ;;  %v2671_v52 = vadd.f32 %v855_v4, %v2609_v21 }
 0x194   : > { %v786_v7 = vpop.f32.mrb[11].mxu0  ;;  %v859_v12 = vpop.f32.mrb[11].mxu1  ;;  %3045 = vst [vmem:[#allocation19_spill] sm:$0xff] %v2663_v49  ;;  %3046 = vst [vmem:[#allocation20_spill] sm:$0xff] %v2665_v50  ;;  %v2673_v54 = vadd.f32 %v784_v5, %v369_v18  ;;  %v2675_v55 = vadd.f32 %v857_v6, %v377_v19 }
 0x195   : > { %3047 = vst [vmem:[#allocation21_spill] sm:$0xff] %v2671_v52  ;;  %v2678_v56 = vadd.f32 %v786_v7, %v2607_v20  ;;  %v2682_v60 = vadd.f32 %v859_v12, %v2609_v21 }
 0x196   : > { %3048 = vst [vmem:[#allocation22_spill] sm:$0xff] %v2673_v54  ;;  %3049 = vst [vmem:[#allocation23_spill] sm:$0xff] %v2675_v55 }
 0x197   : > { %3050 = vst [vmem:[#allocation24_spill] sm:$0xff] %v2678_v56  ;;  %3051 = vst [vmem:[#allocation25_spill] sm:$0xff] %v2682_v60 }
 0x199   : > { %v790_v22 = vpop.f32.mrb[12].mxu0  ;;  %v863_v23 = vpop.f32.mrb[12].mxu1 }
 0x19a   : > { %v792_v0 = vpop.f32.mrb[13].mxu0  ;;  %v865_v24 = vpop.f32.mrb[13].mxu1  ;;  %v2684_v61 = vadd.f32 %v790_v22, %v369_v18  ;;  %v2688_v3 = vadd.f32 %v863_v23, %v377_v19 }
 0x19b   : > { %v794_v25 = vpop.f32.mrb[14].mxu0  ;;  %v867_v26 = vpop.f32.mrb[14].mxu1  ;;  %v2693_v9 = vadd.f32 %v792_v0, %v2607_v20  ;;  %v2696_v10 = vadd.f32 %v865_v24, %v2609_v21 }
 0x19c   : > { %v2611_v27 = vpop.f32.mrb[15].mxu0  ;;  %v2631_v36 = vpop.f32.mrb[15].mxu1  ;;  %3052 = vst [vmem:[#allocation26_spill] sm:$0xff] %v2684_v61  ;;  %3053 = vst [vmem:[#allocation27_spill] sm:$0xff] %v2688_v3  ;;  %v2698_v13 = vadd.f32 %v794_v25, %v369_v18  ;;  %v2700_v15 = vadd.f32 %v867_v26, %v377_v19 }
 0x19d   : > { %3043 = vst [vmem:[#allocation17_spill] sm:$0xff] %v2611_v27  ;;  %3044 = vst [vmem:[#allocation18_spill] sm:$0xff] %v2631_v36 }
 0x19e   : > { %3054 = vst [vmem:[#allocation28_spill] sm:$0xff] %v2693_v9  ;;  %3055 = vst [vmem:[#allocation29_spill] sm:$0xff] %v2696_v10 }
 0x19f   : > { %3056 = vst [vmem:[#allocation30_spill] sm:$0xff] %v2698_v13  ;;  %3057 = vst [vmem:[#allocation31_spill] sm:$0xff] %v2700_v15 }
 0x1a1   : > { %v906_v53 = vpop.f32.mrb[16].mxu0  ;;  %v979_v58 = vpop.f32.mrb[16].mxu1 }
 0x1a2   : > { %v907_v57 = vadd.f32 %v906_v53, %v2613_v28  ;;  %v908_v59 = vpop.f32.mrb[17].mxu0  ;;  %v980_v62 = vadd.f32 %v979_v58, %v2615_v29  ;;  %v981_v1 = vpop.f32.mrb[17].mxu1 }
 0x1a3   : > { %v909_v63 = vadd.f32 %v908_v59, %v2617_v30  ;;  %v910_v2 = vpop.f32.mrb[18].mxu0  ;;  %v982_v5 = vadd.f32 %v981_v1, %v2619_v31  ;;  %v983_v7 = vpop.f32.mrb[18].mxu1 }
 0x1a4   : > { %v1050_v4 = vmul.f32 0.70710677, %v907_v57  ;;  %v911_v6 = vadd.f32 %v910_v2, %v2613_v28  ;;  %v912_v8 = vpop.f32.mrb[19].mxu0  ;;  %v1052_v11 = vmul.f32 0.70710677, %v980_v62  ;;  %v985_v16 = vpop.f32.mrb[19].mxu1  ;;  %v984_v22 = vadd.f32 %v983_v7, %v2615_v29 }
 0x1a5   : > { %v1051_v12 = vmul.f32 0.70710677, %v909_v63  ;;  %v1053_v14 = vmul.f32 0.70710677, %v982_v5  ;;  %v913_v23 = vadd.f32 %v912_v8, %v2617_v30  ;;  %v1018_v0 = vmul.f32 0.5, %v907_v57 }
 0x1a6   : > { %2060 = verf.f32 %v1050_v4  ;;  %v1054_v17 = vmul.f32 0.70710677, %v911_v6  ;;  %v2704_v53 = vmul.f32 0.5, %v980_v62  ;;  %v986_v24 = vadd.f32 %v985_v16, %v2619_v31 }
 0x1a7   : > { %2062 = verf.f32 %v1052_v11  ;;  %v2707_v58 = vmul.f32 0.5, %v909_v63  ;;  %v2709_v18 = vmul.f32 0.5, %v982_v5  ;;  %v1056_v19 = vmul.f32 0.70710677, %v984_v22 }
 0x1a8   : > { %2064 = verf.f32 %v1051_v12  ;;  %v2711_v26 = vmul.f32 0.5, %v911_v6  ;;  %v1055_v59 = vmul.f32 0.70710677, %v913_v23  ;;  %v1057_v1 = vmul.f32 0.70710677, %v986_v24 }
 0x1a9   : > { %2066 = verf.f32 %v1053_v14  ;;  %v916_v25 = vpop.f32.mrb[20].mxu0  ;;  %v989_v2 = vpop.f32.mrb[20].mxu1  ;;  %v2713_v4 = vmul.f32 0.5, %v984_v22  ;;  %v2717_v5 = vmul.f32 0.5, %v913_v23  ;;  %v2721_v14 = vmul.f32 0.5, %v986_v24 }
 0x1aa   : > { %2068 = verf.f32 %v1054_v17  ;;  %v917_v57 = vadd.f32 %v916_v25, %v2613_v28  ;;  %v990_v62 = vadd.f32 %v989_v2, %v2615_v29  ;;  %v918_v63 = vpop.f32.mrb[21].mxu0  ;;  %v991_v7 = vpop.f32.mrb[21].mxu1 }
 0x1ab   : > { %2070 = verf.f32 %v1056_v19  ;;  %v919_v8 = vadd.f32 %v918_v63, %v2617_v30  ;;  %v992_v6 = vadd.f32 %v991_v7, %v2619_v31  ;;  %v920_v11 = vpop.f32.mrb[22].mxu0  ;;  %v993_v12 = vpop.f32.mrb[22].mxu1 }
 0x1ac   : > { %2072 = verf.f32 %v1055_v59  ;;  %v2723_v16 = vmul.f32 0.5, %v917_v57  ;;  %v1058_v17 = vmul.f32 0.70710677, %v917_v57  ;;  %v922_v22 = vpop.f32.mrb[23].mxu0  ;;  %v995_v19 = vpop.f32.mrb[23].mxu1  ;;  %v2725_v25 = vmul.f32 0.5, %v990_v62 }
 0x1ad   : > { %2074 = verf.f32 %v1057_v1  ;;  %v1060_v2 = vmul.f32 0.70710677, %v990_v62  ;;  %v2727_v23 = vmul.f32 0.5, %v919_v8  ;;  %v1059_v59 = vmul.f32 0.70710677, %v919_v8 }
 0x1ae   : > { %2076 = verf.f32 %v1058_v17  ;;  %v1061_v63 = vmul.f32 0.70710677, %v992_v6  ;;  %v921_v7 = vadd.f32 %v920_v11, %v2613_v28  ;;  %v994_v15 = vadd.f32 %v993_v12, %v2615_v29 }
 0x1af   : > { %2078 = verf.f32 %v1060_v2  ;;  %v2731_v1 = vmul.f32 0.5, %v992_v6  ;;  %v923_v57 = vadd.f32 %v922_v22, %v2617_v30  ;;  %v996_v36 = vadd.f32 %v995_v19, %v2619_v31 }
 0x1b0   : > { %v2061_v24 = vpop.eup %2060  ;;  %2080 = verf.f32 %v1059_v59  ;;  %v2735_v62 = vmul.f32 0.5, %v921_v7  ;;  %v1062_v8 = vmul.f32 0.70710677, %v921_v7  ;;  %v2737_v11 = vmul.f32 0.5, %v994_v15 }
 0x1b1   : > { %v2063_v21 = vpop.eup %2062  ;;  %v1114_v3 = vadd.f32 1.0, %v2061_v24  ;;  %v926_v17 = vpop.f32.mrb[24].mxu0  ;;  %2082 = verf.f32 %v1061_v63  ;;  %v1064_v12 = vmul.f32 0.70710677, %v994_v15  ;;  %v2739_v19 = vmul.f32 0.5, %v923_v57 }
 0x1b2   : > { %v2065_v27 = vpop.eup %2064  ;;  %v1116_v20 = vadd.f32 1.0, %v2063_v21  ;;  %v999_v2 = vpop.f32.mrb[24].mxu1  ;;  %2084 = verf.f32 %v1062_v8  ;;  %v1063_v63 = vmul.f32 0.70710677, %v923_v57  ;;  %v2756_v8 = vmul.f32 0.5, %v996_v36 }
 0x1b3   : > { %v928_v6 = vpop.f32.mrb[25].mxu0  ;;  %v2067_v13 = vpop.eup %2066  ;;  %v1146_v61 = vmul.f32 %v1114_v3, %v1018_v0  ;;  %v1115_v22 = vadd.f32 1.0, %v2065_v27  ;;  %2086 = verf.f32 %v1064_v12  ;;  %v1000_v49 = vadd.f32 %v999_v2, %v2615_v29 }
 0x1b4   : > { %v2741_v24 = vpop.f32.mrb[25].mxu1  ;;  %v2743_v59 = vpop.f32.mrb[26].mxu0  ;;  %v1148_v10 = vmul.f32 %v1116_v20, %v2704_v53  ;;  %v1117_v21 = vadd.f32 1.0, %v2067_v13  ;;  %2088 = verf.f32 %v1063_v63 }
 0x1b5   : > { %v2069_v7 = vpop.eup %2068  ;;  %v2746_v9 = vpop.f32.mrb[26].mxu1  ;;  %v2751_v27 = vmul.f32 %v1146_v61, %v2621_v32  ;;  %v2754_v3 = vmul.f32 %v1115_v22, %v2707_v58  ;;  %v1065_v58 = vmul.f32 0.70710677, %v996_v36  ;;  %v927_v22 = vadd.f32 %v926_v17, %v2613_v28 }
 0x1b6   : > { %v2748_v15 = vpop.f32.mrb[27].mxu0  ;;  %v2071_v55 = vpop.eup %2070  ;;  %v1118_v0 = vadd.f32 1.0, %v2069_v7  ;;  %v2761_v13 = vmul.f32 %v1148_v10, %v2623_v33  ;;  %v2764_v53 = vmul.f32 %v1117_v21, %v2709_v18  ;;  %v929_v33 = vadd.f32 %v928_v6, %v2617_v30 }
 0x1b7   : > { %v2758_v50 = vpop.f32.mrb[27].mxu1  ;;  %v2073_v20 = vpop.eup %2072  ;;  %v1120_v57 = vadd.f32 1.0, %v2071_v55  ;;  %2090 = verf.f32 %v1065_v58  ;;  %v1066_v6 = vmul.f32 0.70710677, %v927_v22 }
 0x1b8   : > { %v2075_v12 = vpop.eup %2074  ;;  %v1150_v32 = vmul.f32 %v1118_v0, %v2711_v26  ;;  %v1119_v61 = vadd.f32 1.0, %v2073_v20  ;;  %v2777_v26 = vmul.f32 0.5, %v927_v22 }
 0x1b9   : > { %v1152_v7 = vmul.f32 %v1120_v57, %v2713_v4  ;;  %v1121_v54 = vadd.f32 1.0, %v2075_v12  ;;  %v2077_v10 = vpop.eup %2076  ;;  %v936_v36 = vpop.f32.mrb[28].mxu0  ;;  %v2787_v57 = vmul.f32 0.5, %v1000_v49  ;;  %v1068_v12 = vmul.f32 0.70710677, %v1000_v49 }
 0x1ba   : > { %v2772_v18 = vmul.f32 %v1150_v32, %v2633_v37  ;;  %v2775_v55 = vmul.f32 %v1119_v61, %v2717_v5  ;;  %v2079_v21 = vpop.eup %2078  ;;  %v1122_v2 = vadd.f32 1.0, %v2077_v10  ;;  %v1009_v63 = vpop.f32.mrb[28].mxu1  ;;  %2092 = verf.f32 %v1066_v6 }
 0x1bb   : > { %v2780_v17 = vmul.f32 %v1152_v7, %v2635_v38  ;;  %v2783_v4 = vmul.f32 %v1121_v54, %v2721_v14  ;;  %v938_v0 = vpop.f32.mrb[29].mxu0  ;;  %v2081_v37 = vpop.eup %2080  ;;  %v1124_v20 = vadd.f32 1.0, %v2079_v21  ;;  %2094 = verf.f32 %v1068_v12 }
 0x1bc   : > { %v1011_v32 = vpop.f32.mrb[29].mxu1  ;;  %v940_v61 = vpop.f32.mrb[30].mxu0  ;;  %v2792_v54 = vmul.f32 %v1122_v2, %v2723_v16  ;;  %v1123_v14 = vadd.f32 1.0, %v2081_v37  ;;  %v2801_v5 = vmul.f32 0.5, %v929_v33  ;;  %v1067_v6 = vmul.f32 0.70710677, %v929_v33 }
 0x1bd   : > { %v2083_v58 = vpop.eup %2082  ;;  %v2794_v22 = vpop.f32.mrb[30].mxu1  ;;  %v2799_v21 = vmul.f32 %v1124_v20, %v2725_v25  ;;  %v1002_v37 = vadd.f32 %v2741_v24, %v2619_v31  ;;  %v931_v20 = vadd.f32 %v2743_v59, %v2613_v28  ;;  %v1004_v12 = vadd.f32 %v2746_v9, %v2615_v29 }
 0x1be   : > { %v2796_v7 = vpop.f32.mrb[31].mxu0  ;;  %v2085_v10 = vpop.eup %2084  ;;  %v1125_v49 = vadd.f32 1.0, %v2083_v58  ;;  %v2806_v16 = vmul.f32 %v1123_v14, %v2727_v23  ;;  %2096 = verf.f32 %v1067_v6  ;;  %v933_v9 = vadd.f32 %v2748_v15, %v2617_v30 }
 0x1bf   : > { %v2803_v60 = vpop.f32.mrb[31].mxu1  ;;  %v2087_v38 = vpop.eup %2086  ;;  %v1126_v2 = vadd.f32 1.0, %v2085_v10  ;;  %v2820_v23 = vmul.f32 0.5, %v1002_v37  ;;  %v1069_v33 = vmul.f32 0.70710677, %v1002_v37  ;;  %v2825_v14 = vmul.f32 0.5, %v931_v20 }
 0x1c0   : > { %v2811_v52 = vmul.f32 %v1125_v49, %v2731_v1  ;;  %v1128_v25 = vadd.f32 1.0, %v2087_v38  ;;  %v2089_v58 = vpop.eup %2088  ;;  %v1070_v38 = vmul.f32 0.70710677, %v931_v20  ;;  %v2827_v59 = vmul.f32 0.5, %v1004_v12 }
 0x1c1   : > { %v2818_v56 = vmul.f32 %v1126_v2, %v2735_v62  ;;  %v1127_v1 = vadd.f32 1.0, %v2089_v58  ;;  %2098 = verf.f32 %v1069_v33  ;;  %v1072_v10 = vmul.f32 0.70710677, %v1004_v12  ;;  %v2091_v62 = vpop.eup %2090 }
 0x1c2   : > { %v2823_v24 = vmul.f32 %v1128_v25, %v2737_v11  ;;  %2100 = verf.f32 %v1070_v38  ;;  %v1006_v11 = vadd.f32 %v2758_v50, %v2619_v31  ;;  %v937_v2 = vadd.f32 %v936_v36, %v2613_v28 }
 0x1c3   : > { %v2832_v49 = vmul.f32 %v1127_v1, %v2739_v19  ;;  %v1129_v6 = vadd.f32 1.0, %v2091_v62  ;;  %2102 = verf.f32 %v1072_v10  ;;  %v2837_v37 = vmul.f32 0.5, %v933_v9 }
 0x1c4   : > { %v1071_v25 = vmul.f32 0.70710677, %v933_v9  ;;  %v2839_v20 = vmul.f32 0.5, %v1006_v11  ;;  %v1073_v12 = vmul.f32 0.70710677, %v1006_v11  ;;  %v2841_v58 = vmul.f32 0.5, %v937_v2  ;;  %v2093_v33 = vpop.eup %2092 }
 0x1c5   : > { %v1074_v15 = vmul.f32 0.70710677, %v937_v2  ;;  %v2844_v19 = vmul.f32 %v1129_v6, %v2756_v8  ;;  %v1010_v50 = vadd.f32 %v1009_v63, %v2615_v29  ;;  %v939_v36 = vadd.f32 %v938_v0, %v2617_v30  ;;  %v2095_v1 = vpop.eup %2094 }
 0x1c6   : > { %2104 = verf.f32 %v1071_v25  ;;  %v1130_v38 = vadd.f32 1.0, %v2093_v33  ;;  %v1012_v10 = vadd.f32 %v1011_v32, %v2619_v31  ;;  %v941_v9 = vadd.f32 %v940_v61, %v2613_v28 }
 0x1c7   : > { %2106 = verf.f32 %v1073_v12  ;;  %v1132_v62 = vadd.f32 1.0, %v2095_v1  ;;  %v2850_v11 = vmul.f32 0.5, %v1010_v50  ;;  %v1076_v2 = vmul.f32 0.70710677, %v1010_v50 }
 0x1c8   : > { %2108 = verf.f32 %v1074_v15  ;;  %v2853_v8 = vmul.f32 %v1130_v38, %v2777_v26  ;;  %v2855_v6 = vmul.f32 0.5, %v939_v36  ;;  %v1075_v63 = vmul.f32 0.70710677, %v939_v36  ;;  %v2097_v0 = vpop.eup %2096 }
 0x1c9   : > { %v2857_v25 = vmul.f32 0.5, %v1012_v10  ;;  %v2860_v12 = vmul.f32 %v1132_v62, %v2787_v57  ;;  %2110 = verf.f32 %v1076_v2  ;;  %v1077_v32 = vmul.f32 0.70710677, %v1012_v10 }
 0x1ca   : > { %v2862_v28 = vmul.f32 0.5, %v941_v9  ;;  %v1131_v61 = vadd.f32 1.0, %v2097_v0  ;;  %2112 = verf.f32 %v1075_v63  ;;  %v1078_v15 = vmul.f32 0.70710677, %v941_v9 }
 0x1cb   : > { %v1014_v26 = vadd.f32 %v2794_v22, %v2615_v29  ;;  %v2099_v33 = vpop.eup %2098  ;;  %2114 = verf.f32 %v1077_v32  ;;  %v943_v50 = vadd.f32 %v2796_v7, %v2617_v30  ;;  %v1016_v36 = vadd.f32 %v2803_v60, %v2619_v31 }
 0x1cc   : > { %v1179_v57 = vmul.f32 %v2754_v3, %v2626_v34  ;;  %v2101_v1 = vpop.eup %2100  ;;  %v1163_v38 = vmul.f32 %v1131_v61, %v2801_v5  ;;  %v1133_v10 = vadd.f32 1.0, %v2099_v33  ;;  %2116 = verf.f32 %v1078_v15 }
 0x1cd   : > { %v2873_v9 = vmul.f32 0.5, %v1014_v26  ;;  %v2103_v62 = vpop.eup %2102  ;;  %v1134_v29 = vadd.f32 1.0, %v2101_v1  ;;  %v1080_v22 = vmul.f32 0.70710677, %v1014_v26  ;;  %v2875_v2 = vmul.f32 0.5, %v943_v50 }
 0x1ce   : > { %v1079_v63 = vmul.f32 0.70710677, %v943_v50  ;;  %v1165_v30 = vmul.f32 %v1133_v10, %v2820_v23  ;;  %v1136_v7 = vadd.f32 1.0, %v2103_v62  ;;  %v2878_v31 = vmul.f32 0.5, %v1016_v36 }
 0x1cf   : > { %v1081_v60 = vmul.f32 0.70710677, %v1016_v36  ;;  %v1166_v3 = vmul.f32 %v1134_v29, %v2825_v14  ;;  %2118 = verf.f32 %v1080_v22  ;;  %v1183_v5 = vmul.f32 %v2775_v55, %v2638_v39  ;;  %v3063_v22 = vld [vmem:[#allocation19_spill] sm:$0xff] }
 0x1d0   : > { %v2105_v34 = vpop.eup %2104  ;;  %v1181_v0 = vmul.f32 %v2764_v53, %v2629_v35  ;;  %v1168_v61 = vmul.f32 %v1136_v7, %v2827_v59  ;;  %2120 = verf.f32 %v1079_v63  ;;  %v1185_v23 = vmul.f32 %v2783_v4, %v2641_v40 }
 0x1d1   : > { %v2107_v32 = vpop.eup %2106  ;;  %v1135_v15 = vadd.f32 1.0, %v2105_v34  ;;  %2122 = verf.f32 %v1081_v60  ;;  %v1211_v50 = vpack.c.bf16 %v1183_v5, %v1179_v57  ;;  %v1187_v14 = vmul.f32 %v2806_v16, %v2648_v43  ;;  %v3065_v60 = vld [vmem:[#allocation20_spill] sm:$0xff] }
 0x1d2   : > { %v2109_v26 = vpop.eup %2108  ;;  %v1137_v33 = vadd.f32 1.0, %v2107_v32  ;;  %v1213_v36 = vpack.c.bf16 %v1185_v23, %v1181_v0  ;;  %v1191_v35 = vmul.f32 %v2832_v49, %v2658_v47  ;;  %v1189_v40 = vmul.f32 %v2811_v52, %v2651_v44 }
 0x1d3   : > { %v1167_v39 = vmul.f32 %v1135_v15, %v2837_v37  ;;  %v1138_v55 = vadd.f32 1.0, %v2109_v26  ;;  %v2111_v53 = vpop.eup %2110  ;;  %1521 = vmatprep.mubr.bf16.mxu0 %v1211_v50  ;;  %v1193_v4 = vmul.f32 %v2844_v19, %v2661_v48  ;;  %v1186_v43 = vmul.f32 %v2792_v54, %v2643_v41 }
 0x1d4   : > { %v1169_v59 = vmul.f32 %v1137_v33, %v2839_v20  ;;  %v2113_v16 = vpop.eup %2112  ;;  %v1140_v57 = vadd.f32 1.0, %v2111_v53  ;;  %1586 = vmatprep.mubr.bf16.mxu1 %v1213_v36  ;;  %v3058_v47 = vpack.c.bf16 %v2772_v18, %v2751_v27  ;;  %v1215_v49 = vpack.c.bf16 %v1191_v35, %v1187_v14  ;;  %v3071_v53 = vld [vmem:[#allocation15_spill] sm:$0xff] }
 0x1d5   : > { %v1170_v37 = vmul.f32 %v1138_v55, %v2841_v58  ;;  %v1190_v20 = vmul.f32 %v2818_v56, %v2653_v45  ;;  %v2115_v44 = vpop.eup %2114  ;;  %v1139_v52 = vadd.f32 1.0, %v2113_v16  ;;  %v3059_v48 = vpack.c.bf16 %v2780_v17, %v2761_v13  ;;  %v3060_v17 = vld [vmem:[#allocation24_spill] sm:$0xff] }
 0x1d6   : > { %1522 = vmatmul.mubr.bf16.vlgmr.msra.gmra.mrb[32].mxu0 %v3058_v47  ;;  %v1217_v41 = vpack.c.bf16 %v1193_v4, %v1189_v40  ;;  %v1188_v54 = vmul.f32 %v2799_v21, %v2645_v42  ;;  %v1192_v58 = vmul.f32 %v2823_v24, %v2655_v46  ;;  %v2117_v19 = vpop.eup %2116  ;;  %v1172_v27 = vmul.f32 %v1140_v57, %v2850_v11  ;;  %v3061_v21 = vld [vmem:[#allocation21_spill] sm:$0xff]  ;;  %v3073_v4 = vld [vmem:[#allocation27_spill] sm:$0xff]  ;;  %v3074_v16 = vld [vmem:[#allocation16_spill] sm:$0xff] }
 0x1d7   : > { %1587 = vmatmul.mubr.bf16.vlgmr.msra.gmra.mrb[32].mxu1 %v3059_v48  ;;  %v1141_v18 = vadd.f32 1.0, %v2115_v44  ;;  %1529 = vmatprep.mubr.bf16.mxu0 %v1215_v49  ;;  %v1214_v1 = vpack.c.bf16 %v1190_v20, %v1186_v43  ;;  %v1195_v45 = vmul.f32 %v1163_v38, %v2668_v51  ;;  %v1171_v56 = vmul.f32 %v1139_v52, %v2855_v6  ;;  %v3062_v46 = vld [vmem:[#allocation25_spill] sm:$0xff]  ;;  %v3064_v38 = vld [vmem:[#allocation22_spill] sm:$0xff]  ;;  %v3076_v49 = vld [vmem:[#allocation31_spill] sm:$0xff] }
 0x1d8   : > { %v1142_v10 = vadd.f32 1.0, %v2117_v19  ;;  %1594 = vmatprep.mubr.bf16.mxu1 %v1217_v41  ;;  %v1216_v13 = vpack.c.bf16 %v1192_v58, %v1188_v54  ;;  %v1199_v62 = vmul.f32 %v1167_v39, %v3060_v17  ;;  %v1197_v29 = vmul.f32 %v1165_v30, %v3061_v21  ;;  %v3067_v30 = vld [vmem:[#allocation28_spill] sm:$0xff]  ;;  %v3069_v39 = vld [vmem:[#allocation26_spill] sm:$0xff] }
 0x1d9   : > { %v1173_v42 = vmul.f32 %v1141_v18, %v2857_v25  ;;  %v1201_v24 = vmul.f32 %v1169_v59, %v3062_v46  ;;  %v1194_v11 = vmul.f32 %v2853_v8, %v3063_v22  ;;  %v2119_v63 = vpop.eup %2118  ;;  %v1198_v6 = vmul.f32 %v1166_v3, %v3064_v38  ;;  %v3066_v25 = vld [vmem:[#allocation23_spill] sm:$0xff]  ;;  %v3068_v8 = vld [vmem:[#allocation29_spill] sm:$0xff]  ;;  %v3075_v57 = vld [vmem:[#allocation18_spill] sm:$0xff] }
 0x1da   : > { %v1174_v7 = vmul.f32 %v1142_v10, %v2862_v28  ;;  %v1219_v51 = vpack.c.bf16 %v1199_v62, %v1195_v45  ;;  %v1196_v34 = vmul.f32 %v2860_v12, %v3065_v60  ;;  %v2121_v5 = vpop.eup %2120  ;;  %v1144_v0 = vadd.f32 1.0, %v2119_v63  ;;  %v3070_v12 = vld [vmem:[#allocation30_spill] sm:$0xff]  ;;  %v3072_v59 = vld [vmem:[#allocation17_spill] sm:$0xff] }
 0x1db   : > { %v1221_v32 = vpack.c.bf16 %v1201_v24, %v1197_v29  ;;  %v1200_v15 = vmul.f32 %v1168_v61, %v3066_v25  ;;  %v1203_v23 = vmul.f32 %v1171_v56, %v3067_v30  ;;  %v2123_v26 = vpop.eup %2122  ;;  %v1143_v33 = vadd.f32 1.0, %v2121_v5 }
 0x1dc   : > { %v1218_v50 = vpack.c.bf16 %v1198_v6, %v1194_v11  ;;  %v1205_v14 = vmul.f32 %v1173_v42, %v3068_v8  ;;  %v1202_v28 = vmul.f32 %v1170_v37, %v3069_v39  ;;  %v1176_v55 = vmul.f32 %v1144_v0, %v2873_v9 }
 0x1dd   : > { %v1145_v3 = vadd.f32 1.0, %v2123_v26  ;;  %v1220_v36 = vpack.c.bf16 %v1200_v15, %v1196_v34  ;;  %v1206_v35 = vmul.f32 %v1174_v7, %v3070_v12  ;;  %v797_v40 = vadd.f32 %v3072_v59, %v3071_v53 }
 0x1de   : > { %1530 = vmatmul.mubr.bf16.gmra.mrb[36].mxu0 %v1214_v1  ;;  %v1175_v61 = vmul.f32 %v1143_v33, %v2875_v2  ;;  %v1204_v43 = vmul.f32 %v1172_v27, %v3073_v4  ;;  %v870_v47 = vadd.f32 %v3075_v57, %v3074_v16  ;;  %v1208_v20 = vmul.f32 %v1176_v55, %v3076_v49 }
 0x1df   : > { %1595 = vmatmul.mubr.bf16.gmra.mrb[36].mxu1 %v1216_v13  ;;  %1537 = vmatprep.mubr.bf16.mxu0 %v1219_v51  ;;  %v1177_v37 = vmul.f32 %v1145_v3, %v2878_v31  ;;  %v1222_v9 = vpack.c.bf16 %v1206_v35, %v1202_v28  ;;  %v2943_v31 = vld [vmem:[%s3020_s4] ss:$0 sm:$0xff] }
 0x1e0   : > { %1602 = vmatprep.mubr.bf16.mxu1 %v1221_v32  ;;  %v1207_v44 = vmul.f32 %v1175_v61, %v797_v40  ;;  %v1224_v48 = vpack.c.bf16 %v1208_v20, %v1204_v43 }
 0x1e1   : > { %v1209_v52 = vmul.f32 %v1177_v37, %v870_v47 }
 0x1e2   : > { %v1223_v41 = vpack.c.bf16 %v1207_v44, %v1203_v23 }
 0x1e3   : > { %v1225_v54 = vpack.c.bf16 %v1209_v52, %v1205_v14 }
 0x1e6   : > { %1538 = vmatmul.mubr.bf16.gmra.mrb[40].mxu0 %v1218_v50 }
 0x1e7   : > { %1603 = vmatmul.mubr.bf16.gmra.mrb[40].mxu1 %v1220_v36  ;;  %1545 = vmatprep.mubr.bf16.mxu0 %v1223_v41 }
 0x1e8   : > { %1610 = vmatprep.mubr.bf16.mxu1 %v1225_v54 }
 0x1ee   : > { %1546 = vmatmul.mubr.bf16.gmra.mrb[44].mxu0 %v1222_v9 }
 0x1ef   : > { %1611 = vmatmul.mubr.bf16.gmra.mrb[44].mxu1 %v1224_v48 }
 0x2a9   : > { %v1878_v2 = vpop.f32.mrb[32].mxu0 }
 0x2aa   : > { %v1918_v58 = vpop.f32.mrb[32].mxu1  ;;  %v1879_v19 = vpop.f32.mrb[33].mxu0 }
 0x2ab   : > { %v1880_v27 = vadd.f32 %v1879_v19, %v1878_v2  ;;  %v1919_v18 = vpop.f32.mrb[33].mxu1  ;;  %v1881_v1 = vpop.f32.mrb[34].mxu0 }
 0x2ac   : > { %v1920_v45 = vadd.f32 %v1919_v18, %v1918_v58  ;;  %v1921_v56 = vpop.f32.mrb[34].mxu1  ;;  %v1882_v10 = vpop.f32.mrb[35].mxu0 }
 0x2ad   : > { %v1524_v13 = vadd.f32 %v1880_v27, %v2943_v31  ;;  %v1883_v17 = vadd.f32 %v1882_v10, %v1881_v1  ;;  %v1922_v62 = vpop.f32.mrb[35].mxu1 }
 0x2ae   : > { %v1923_v42 = vadd.f32 %v1922_v62, %v1921_v56 }
 0x2af   : > { %v1589_v21 = vadd.f32 %v1920_v45, %v1524_v13  ;;  %v1527_v29 = vadd.f32 %v1883_v17, %v2943_v31 }
 0x2b1   : > { %1619 = vst [vmem:[%s2949_s11] sm:$0xff] %v1589_v21  ;;  %v1592_v46 = vadd.f32 %v1923_v42, %v1527_v29  ;;  %v1884_v24 = vpop.f32.mrb[36].mxu0 }
 0x2b2   : > { %v1924_v22 = vpop.f32.mrb[36].mxu1  ;;  %v1885_v11 = vpop.f32.mrb[37].mxu0 }
 0x2b3   : > { %1620 = vst [vmem:[%s2949_s11 + $0x8] sm:$0xff] %v1592_v46  ;;  %v1886_v63 = vadd.f32 %v1885_v11, %v1884_v24  ;;  %v1925_v7 = vpop.f32.mrb[37].mxu1  ;;  %v1887_v51 = vpop.f32.mrb[38].mxu0 }
 0x2b4   : > { %v1926_v38 = vadd.f32 %v1925_v7, %v1924_v22  ;;  %v1927_v6 = vpop.f32.mrb[38].mxu1  ;;  %v1888_v60 = vpop.f32.mrb[39].mxu0 }
 0x2b5   : > { %v1532_v34 = vadd.f32 %v1886_v63, %v2943_v31  ;;  %v1889_v5 = vadd.f32 %v1888_v60, %v1887_v51  ;;  %v1928_v0 = vpop.f32.mrb[39].mxu1 }
 0x2b6   : > { %v1929_v32 = vadd.f32 %v1928_v0, %v1927_v6 }
 0x2b7   : > { %v1597_v25 = vadd.f32 %v1926_v38, %v1532_v34  ;;  %v1535_v15 = vadd.f32 %v1889_v5, %v2943_v31 }
 0x2b9   : > { %1621 = vst [vmem:[%s2949_s11 + $0x10] sm:$0xff] %v1597_v25  ;;  %v1600_v30 = vadd.f32 %v1929_v32, %v1535_v15  ;;  %v1890_v23 = vpop.f32.mrb[40].mxu0 }
 0x2ba   : > { %v1930_v26 = vpop.f32.mrb[40].mxu1  ;;  %v1891_v33 = vpop.f32.mrb[41].mxu0 }
 0x2bb   : > { %1622 = vst [vmem:[%s2949_s11 + $0x18] sm:$0xff] %v1600_v30  ;;  %v1892_v50 = vadd.f32 %v1891_v33, %v1890_v23  ;;  %v1931_v8 = vpop.f32.mrb[41].mxu1  ;;  %v1893_v14 = vpop.f32.mrb[42].mxu0 }
 0x2bc   : > { %v1932_v39 = vadd.f32 %v1931_v8, %v1930_v26  ;;  %v1933_v28 = vpop.f32.mrb[42].mxu1  ;;  %v1894_v55 = vpop.f32.mrb[43].mxu0 }
 0x2bd   : > { %v1540_v3 = vadd.f32 %v1892_v50, %v2943_v31  ;;  %v1895_v36 = vadd.f32 %v1894_v55, %v1893_v14  ;;  %v1934_v12 = vpop.f32.mrb[43].mxu1 }
 0x2be   : > { %v1935_v35 = vadd.f32 %v1934_v12, %v1933_v28 }
 0x2bf   : > { %v1605_v53 = vadd.f32 %v1932_v39, %v1540_v3  ;;  %v1543_v59 = vadd.f32 %v1895_v36, %v2943_v31 }
 0x2c1   : > { %1623 = vst [vmem:[%s2949_s11 + $0x20] sm:$0xff] %v1605_v53  ;;  %v1608_v40 = vadd.f32 %v1935_v35, %v1543_v59  ;;  %v1896_v61 = vpop.f32.mrb[44].mxu0 }
 0x2c2   : > { %v1936_v4 = vpop.f32.mrb[44].mxu1  ;;  %v1897_v43 = vpop.f32.mrb[45].mxu0 }
 0x2c3   : > { %1624 = vst [vmem:[%s2949_s11 + $0x28] sm:$0xff] %v1608_v40  ;;  %v1898_v16 = vadd.f32 %v1897_v43, %v1896_v61  ;;  %v1937_v57 = vpop.f32.mrb[45].mxu1  ;;  %v1899_v47 = vpop.f32.mrb[46].mxu0 }
 0x2c4   : > { %v1938_v37 = vadd.f32 %v1937_v57, %v1936_v4  ;;  %v1939_v9 = vpop.f32.mrb[46].mxu1  ;;  %v1900_v49 = vpop.f32.mrb[47].mxu0 }
 0x2c5   : > { %v1548_v20 = vadd.f32 %v1898_v16, %v2943_v31  ;;  %v1901_v44 = vadd.f32 %v1900_v49, %v1899_v47  ;;  %v1940_v52 = vpop.f32.mrb[47].mxu1 }
 0x2c6   : > { %v1941_v48 = vadd.f32 %v1940_v52, %v1939_v9 }
 0x2c7   : > { %v1613_v41 = vadd.f32 %v1938_v37, %v1548_v20  ;;  %v1551_v54 = vadd.f32 %v1901_v44, %v2943_v31 }
 0x2c9   : > { %1625 = vst [vmem:[%s2949_s11 + $0x30] sm:$0xff] %v1613_v41  ;;  %v1616_v2 = vadd.f32 %v1941_v48, %v1551_v54 }
 0x2cb   : > { %1626 = vst [vmem:[%s2949_s11 + $0x38] sm:$0xff] %v1616_v2 }
 0x2cc   : > { %2251 = shalt.err (!%p2248_p4)
}
 0x2cd   : > { %s2252_s23 = scalar_lea.hbm %s2970_s9, 1024  ;;  %s2256_s24 = scalar_lea.hbm %s3021_s5, 2048 }
 0x2ce   : > { %p2253_p9 = scmp.ne.s32.totalorder %s2970_s9, %s2252_s23  ;;  %p2257_p8 = scmp.lt.u32.totalorder %s2970_s9, %s3021_s5 }
 0x2cf   : > { %p2258_p13 = scmp.lt.u32.totalorder %s2256_s24, %s2252_s23  ;;  %p2260_p10 = scmp.lt.u32.totalorder %s2252_s23, %s2970_s9 }
 0x2d0   : > { %p2254_p0 = pnand %p2253_p9, %p2503_p5 }
 0x2d1   : > { %p2259_p6 = por %p2258_p13, %p2257_p8 }
 0x2d2   : > { %p2255_p11 = pneg %p2254_p0 }
 0x2d3   : > { %p2261_p3 = por %p2260_p10, %p2259_p6 }
 0x2d5   : > { %p2262_p7 = pnand %p2261_p3, %p2255_p11 }
 0x2d7   : > { %2265 = shalt.err (!%p2262_p7)
}
 0x2d8   : > { %s2326_s6 = smov 128   ;;  %s2327_s14 = smov 8  }
 0x2d9   : > { %1956 = dma.vmem_to_hbm [thread:$0]  (%p2503_p5), %s2964_s13, 1024, %s2970_s9, %s1628_s10, %s2326_s6, %s2326_s6, %s2327_s14  }
 0x2da PF: > { %s1656_s29 = sand.u32 1, %s2300_s18   ;;  %p3077_p12 = scmp.ne.s32.totalorder %s3028_s25, 0 }
 0x2db   : > { %p3078_p2 = scmp.ge.s32.totalorder %s2312_s21, 2  ;;  %s1657_s12 = scalar_lea.sflag [#allocation4], %s1656_s29 }
 0x2dd   : > { %p1973_p1 = pnand %p3078_p2, %p3077_p12 }
 0x2df   : > { %2295 = dma.done.wait (!%p1973_p1), %s1657_s12, 1024  }
 0x2e0   : > { %2297 = vsyncadd (!%p1973_p1), %s1657_s12, 4294966272  ;;  %p20_p4 = scmp.ge.s32.totalorder %s2489_s28, 4   ;;  %s3079_s18 = smov %s2304_s19 }
 0x2e1   : > { %s3080_s19 = smov %s2308_s20  ;;  %s3081_s20 = smov %s2499_s27 }
 0x2e2   : > { %s3082_s21 = smov %s2489_s28  ;;  %22 = sbr.rel (!%p20_p4) target bundleno = 7 (0x7), region = 97 }
 0x2e9   :  { %1662 = vsyncpa [#allocation3], 1 }
 0x2ea   :  { %1664 = vsyncpa [#allocation3 + $0x1], 1 }
 0x2eb   :  { %1665 = vsyncpa [#allocation6], 1 }
 0x2ec   :  { %1666 = vsyncpa [#allocation9], 1 }
 0x2ed   :  { %1667 = vsyncpa [#allocation4], 1 }
 0x2ee   :  { %1669 = vsyncpa [#allocation4 + $0x1], 1 }

// kernel: tpu_custom_call.1
= control target key start
LH: loop header
LB: loop body
LE: loop exit
PB: predicated region body
PF: predicated region fallthrough
CT: control target
= control target key end

     0   :  { %10 = vsyncpa [#allocation3], 0  ;;  %s3016_s0 = inlined_call_operand.hbm [shape: f32[128,128], index: 0, kind: input, shape index: {}]   ;;  %s3017_s1 = inlined_call_operand.hbm [shape: bf16[128,1024], index: 1, kind: input, shape index: {}]   ;;  %s3018_s2 = inlined_call_operand.hbm [shape: f32[1,1024], index: 2, kind: input, shape index: {}]   ;;  %s3019_s3 = inlined_call_operand.hbm [shape: bf16[512,128], index: 3, kind: input, shape index: {}]   ;;  %s3020_s4 = inlined_call_operand.vmem [shape: f32[1,128], index: 4, kind: input, shape index: {}]   ;;  %s3021_s5 = inlined_call_operand.hbm [shape: f32[128,128], index: 5, kind: output, shape index: {}]  }
   0x1   :  { %12 = vsyncpa [#allocation3 + $0x1], 0 }
   0x2   :  { %13 = vsyncpa [#allocation6], 0 }
   0x3   :  { %14 = vsyncpa [#allocation9], 0 }
   0x4   :  { %15 = vsyncpa [#allocation4], 0 }
   0x5   :  { %17 = vsyncpa [#allocation4 + $0x1], 0  ;;  %s2358_s18 = smov 0   ;;  %s2360_s19 = smov 0  }
   0x6   :  { %s2362_s20 = smov 0   ;;  %s2364_s21 = smov 0  }
   0x7 LB: > { %s2379_s22 = sadd.s32 4294967295, %s2312_s21   ;;  %s1743_s23 = sadd.s32 4294967294, %s2312_s21   ;;  %s2312_s21 = sphi %s2364_s21, %s3082_s21   ;;  %s2308_s20 = sphi %s2362_s20, %s3081_s20   ;;  %s2304_s19 = sphi %s2360_s19, %s3080_s19   ;;  %s2300_s18 = sphi %s2358_s18, %s3079_s18  }
   0x8   : > { %p43_p0 = scmp.ne.s32.totalorder %s2304_s19, %s2300_s18  ;;  %p3022_p1 = scmp.eq.s32.totalorder %s2379_s22, 0 }
   0x9   : > { %p157_p3 = scmp.eq.s32.totalorder %s1743_s23, 1  ;;  %p1744_p5 = scmp.ge.s32.totalorder %s2312_s21, 1 }
   0xa   : > { %p2388_p4 = por %p3022_p1, %p43_p0  ;;  %p164_p7 = scmp.lt.s32.totalorder %s2312_s21, 3 }
   0xb   : > { %p2393_p6 = por %p157_p3, %p43_p0  ;;  %s2314_s27 = smov [#allocation5]  }
   0xc   : > { %s3027_s24 = scalar_select %p2388_p4, 1, 0 }
   0xd   : > { %s3028_s25 = scalar_select %p2393_p6, 1, 0 }
   0xe   : > { %p2398_p8 = pnand %p1744_p5, %p164_p7  ;;  %s176_s28 = sshll.u32 %s2314_s27, 4  ;;  %s2402_s28 = int_to_ptr.vmem [resolvable:$true] %s176_s28 }
   0xf   : > { %s2315_s30 = smov [#allocation7]   ;;  %s2316_s7 = smov [#allocation8]  }
  0x10   : > { %s3029_s26 = scalar_select %p2398_p8, 1, 0 }
  0x11   : > { %p1958_p9 = pneg %p2398_p8  ;;  %s190_s6 = sshll.u32 %s2315_s30, 4  ;;  %s2413_s6 = int_to_ptr.vmem [resolvable:$true] %s190_s6 }
  0x12   : > { %s2415_s8 = sshll.u32 %s2316_s7, 4  ;;  %s2124_s11 = scalar_lea.hbm %s3017_s1, 8192  ;;  %s201_s8 = int_to_ptr.vmem [resolvable:$true] %s2415_s8 }
  0x13   : > { %p2409_p11 = pnand %p1958_p9, %p3022_p1  ;;  %p2125_p12 = scmp.ne.s32.totalorder %s3017_s1, %s2124_s11 }
  0x14   : > { %p2131_p5 = scmp.lt.u32.totalorder %s2124_s11, %s3017_s1 }
  0x15   : > { %p2425_p13 = pneg %p2409_p11 }
  0x17   : > { %p2127_p0 = pnand %p2425_p13, %p2125_p12 }
  0x19   : > { %p2128_p3 = pneg %p2127_p0 }
  0x1b   : > { %p2133_p7 = pnand %p2131_p5, %p2128_p3 }
  0x1d   : > { %2136 = shalt.err (!%p2133_p7)
}
  0x1e   : > { %s2137_s17 = scalar_lea.vmem %s2402_s28, 8192  ;;  %p2145_p2 = scmp.lt.s32.totalorder %s2402_s28, %s2402_s28 }
  0x1f   : > { %p2138_p9 = scmp.ne.s32.totalorder %s2402_s28, %s2137_s17  ;;  %p2146_p6 = scmp.lt.s32.totalorder %s2137_s17, %s2137_s17 }
  0x21   : > { %p2140_p10 = pnand %p2138_p9, %p2425_p13  ;;  %p2147_p12 = por %p2146_p6, %p2145_p2 }
  0x23   : > { %p2141_p1 = pneg %p2140_p10 }
  0x25   : > { %p2148_p0 = pnand %p2147_p12, %p2141_p1 }
  0x27   : > { %2151 = shalt.err (!%p2148_p0)
}
  0x28   : > { %s2317_s23 = smov 512   ;;  %s2318_s27 = smov 32  }
  0x29   : > { %1961 = dma.hbm_to_vmem [thread:$0]  (!%p2409_p11), %s3017_s1, 8192, %s2402_s28, [#allocation6], %s2317_s23, %s2317_s23, %s2318_s27  }
  0x2a   : > { %s2152_s11 = scalar_lea.hbm %s3018_s2, 128 }
  0x2b   : > { %p2153_p2 = scmp.ne.s32.totalorder %s3018_s2, %s2152_s11  ;;  %p2159_p10 = scmp.lt.u32.totalorder %s2152_s11, %s3018_s2 }
  0x2d   : > { %p2155_p1 = pnand %p2153_p2, %p2425_p13 }
  0x2f   : > { %p2156_p6 = pneg %p2155_p1 }
  0x31   : > { %p2161_p3 = pnand %p2159_p10, %p2156_p6 }
  0x33   : > { %2164 = shalt.err (!%p2161_p3)
}
  0x34   : > { %s2165_s28 = scalar_lea.vmem %s2413_s6, 128  ;;  %p2173_p12 = scmp.lt.s32.totalorder %s2413_s6, %s2413_s6 }
  0x35   : > { %p2166_p5 = scmp.ne.s32.totalorder %s2413_s6, %s2165_s28  ;;  %p2174_p0 = scmp.lt.s32.totalorder %s2165_s28, %s2165_s28 }
  0x37   : > { %p2168_p7 = pnand %p2166_p5, %p2425_p13  ;;  %p2175_p2 = por %p2174_p0, %p2173_p12 }
  0x39   : > { %p2169_p9 = pneg %p2168_p7 }
  0x3b   : > { %p2176_p1 = pnand %p2175_p2, %p2169_p9 }
  0x3d   : > { %2179 = shalt.err (!%p2176_p1)
}
  0x3e   : > { %1964 = dma.hbm_to_vmem [thread:$0]  (!%p2409_p11), %s3018_s2, 128, %s2413_s6, [#allocation6]  }
  0x3f   : > { %s2180_s7 = scalar_lea.hbm %s3019_s3, 4096 }
  0x40   : > { %p2181_p6 = scmp.ne.s32.totalorder %s3019_s3, %s2180_s7  ;;  %p2187_p5 = scmp.lt.u32.totalorder %s2180_s7, %s3019_s3 }
  0x42   : > { %p2183_p10 = pnand %p2181_p6, %p2425_p13 }
  0x44   : > { %p2184_p3 = pneg %p2183_p10 }
  0x46   : > { %p2189_p7 = pnand %p2187_p5, %p2184_p3 }
  0x48   : > { %2192 = shalt.err (!%p2189_p7)
}
  0x49   : > { %s2193_s13 = scalar_lea.vmem %s201_s8, 4096  ;;  %p2201_p2 = scmp.lt.s32.totalorder %s201_s8, %s201_s8 }
  0x4a   : > { %p2194_p9 = scmp.ne.s32.totalorder %s201_s8, %s2193_s13  ;;  %p2202_p1 = scmp.lt.s32.totalorder %s2193_s13, %s2193_s13 }
  0x4c   : > { %p2196_p12 = pnand %p2194_p9, %p2425_p13  ;;  %p2203_p4 = por %p2202_p1, %p2201_p2 }
  0x4e   : > { %p2197_p0 = pneg %p2196_p12 }
  0x50   : > { %p2204_p8 = pnand %p2203_p4, %p2197_p0 }
  0x52   : > { %2207 = shalt.err (!%p2204_p8)
}
  0x53   : > { %s2319_s6 = smov 64   ;;  %s2320_s14 = smov 4  }
  0x54   : > { %1967 = dma.hbm_to_vmem [thread:$0]  (!%p2409_p11), %s3019_s3, 4096, %s201_s8, [#allocation9], %s2319_s6, %s2319_s6, %s2320_s14  }
  0x55   : > { %s2489_s28 = sadd.s32 1, %s2312_s21   ;;  %s30_s23 = sadd.s32 1, %s2308_s20 }
  0x56   : > { %s27_s17 = ssub.s32 %s2312_s21, %s2489_s28  ;;  %p37_p8 = scmp.ne.s32.totalorder %s2308_s20, %s2304_s19 }
  0x57   : > { %p28_p4 = scmp.eq.s32.totalorder %s27_s17, 0  ;;  %p38_p13 = scmp.eq.s32.totalorder %s2312_s21, 0 }
  0x58   : > { %p1979_p6 = scmp.lt.s32.totalorder %s2312_s21, 2  ;;  %p3032_p3 = scmp.eq.s32.totalorder %s2379_s22, 1 }
  0x59   : > { %s2499_s27 = scalar_select %p28_p4, %s2308_s20, %s30_s23  }
  0x5a   : > { %p39_p10 = por %p38_p13, %p37_p8  ;;  %p2503_p5 = por %p3032_p3, %p37_p8 }
  0x5b   : > { %s217_s29 = sand.u32 1, %s2308_s20   ;;  %s1860_s7 = sshll.u32 %s2312_s21, 10 }
  0x5c   : > { %s1749_s8 = sshll.u32 %s217_s29, 6  ;;  %s2512_s11 = scalar_lea.hbm %s3016_s0, %s1860_s7 }
  0x5d   : > { %s221_s12 = scalar_lea.vmem [#allocation2], %s1749_s8  ;;  %p2514_p11 = pnand %p1979_p6, %p39_p10 }
  0x5e   : > { %s228_s13 = sshll.u32 %s221_s12, 4  ;;  %s2520_s14 = scalar_lea.sflag [#allocation3], %s217_s29  ;;  %s2518_s13 = int_to_ptr.vmem [resolvable:$true] %s228_s13 }
  0x5f   : > { %s2208_s15 = scalar_lea.hbm %s2512_s11, 1024  ;;  %p2210_p9 = pneg %p2514_p11 }
  0x60   : > { %p2209_p7 = scmp.ne.s32.totalorder %s2512_s11, %s2208_s15  ;;  %s2213_s23 = scalar_lea.hbm %s3016_s0, 2048 }
  0x61   : > { %p2214_p2 = scmp.lt.u32.totalorder %s2512_s11, %s3016_s0  ;;  %p2215_p1 = scmp.lt.u32.totalorder %s2213_s23, %s2208_s15 }
  0x62   : > { %p2211_p12 = pnand %p2210_p9, %p2209_p7  ;;  %p2217_p8 = scmp.lt.u32.totalorder %s2208_s15, %s2512_s11 }
  0x63   : > { %p2216_p4 = por %p2215_p1, %p2214_p2 }
  0x64   : > { %p2212_p0 = pneg %p2211_p12 }
  0x65   : > { %p2218_p13 = por %p2217_p8, %p2216_p4 }
  0x67   : > { %p2219_p6 = pnand %p2218_p13, %p2212_p0 }
  0x69   : > { %2222 = shalt.err (!%p2219_p6)
}
  0x6a   : > { %s2223_s29 = scalar_lea.vmem %s2518_s13, 1024  ;;  %s2321_s9 = smov [#allocation2]  }
  0x6b   : > { %p2224_p10 = scmp.ne.s32.totalorder %s2518_s13, %s2223_s29  ;;  %s2228_s10 = sshll.u32 %s2321_s9, 4  ;;  %s2229_s10 = int_to_ptr.vmem [resolvable:$false] %s2228_s10 }
  0x6c   : > { %s2230_s12 = scalar_lea.vmem %s2229_s10, 2048  ;;  %p2231_p12 = scmp.lt.s32.totalorder %s2518_s13, %s2229_s10 }
  0x6d   : > { %p2226_p3 = pnand %p2224_p10, %p2210_p9  ;;  %p2232_p2 = scmp.lt.s32.totalorder %s2230_s12, %s2223_s29 }
  0x6f   : > { %p2227_p7 = pneg %p2226_p3  ;;  %p2233_p1 = por %p2232_p2, %p2231_p12 }
  0x71   : > { %p2234_p4 = pnand %p2233_p1, %p2227_p7 }
  0x73   : > { %2237 = shalt.err (!%p2234_p4)
}
  0x74   : > { %s2322_s15 = smov 128   ;;  %s2323_s16 = smov 8  }
  0x75   : > { %1971 = dma.hbm_to_vmem [thread:$0]  (!%p2514_p11), %s2512_s11, 1024, %s2518_s13, %s2520_s14, %s2322_s15, %s2322_s15, %s2323_s16  }
  0x76   : > { %p3035_p9 = scmp.ne.s32.totalorder %s3029_s26, 0 }
  0x78   : > { %240 = sbr.rel (%p3035_p9) target bundleno = 730 (0x2da), region = 40 }
  0x7f   : > { %s2551_s17 = sand.u32 1, %s2304_s19   ;;  %p3036_p0 = scmp.ne.s32.totalorder %s3027_s24, 0 }
  0x80   : > { %s1753_s23 = sshll.u32 %s2551_s17, 6  ;;  %s243_s7 = scalar_lea.sflag [#allocation3], %s2551_s17 }
  0x81   : > { %s2557_s8 = scalar_lea.vmem [#allocation2], %s1753_s23 }
  0x82   : > { %2283 = dma.done.wait (%p3036_p0), %s243_s7, 1024  }
  0x83   : > { %2285 = vsyncadd (%p3036_p0), %s243_s7, 4294966272  ;;  %p3037_p11 = scmp.eq.s32.totalorder %s2379_s22, 0 }
  0x85   : > { %2287 = dma.done.wait (%p3037_p11), [#allocation6], 8320   ;;  %p3038_p8 = pmov %p3037_p11 }
  0x87   : > { %2289 = vsyncadd (%p3038_p8), [#allocation6], 4294958976  ;;  %p3039_p13 = pmov %p3038_p8 }
  0x88   : > { %p3040_p6 = pmov %p3038_p8 }
  0x89   : > { %2291 = dma.done.wait (%p3039_p13), [#allocation9], 4096  }
  0x8a   : > { %2293 = vsyncadd (%p3040_p6), [#allocation9], 4294963200  ;;  %v2324_v0 = vmov 0   ;;  %v300_v1 = vld [vmem:[#allocation5] sm:$0xff]  ;;  %v301_v3 = vld [vmem:[#allocation5 + $0x8] sm:$0xff]  ;;  %s2949_s11 = scalar_lea.vmem [#allocation10], %s1753_s23 }
  0x8b   : > { %758 = vmatprep.mubr.bf16.mxu0 %v2324_v0  ;;  %831 = vmatprep.mubr.bf16.mxu1 %v2324_v0  ;;  %v304_v2 = vld [vmem:[#allocation5 + $0x20] sm:$0xff]  ;;  %v305_v5 = vld [vmem:[#allocation5 + $0x28] sm:$0xff]  ;;  %v302_v60 = vld [vmem:[#allocation5 + $0x10] sm:$0xff]  ;;  %s1641_s13 = sshll.u32 %s2949_s11, 4  ;;  %s1861_s6 = sshll.u32 %s2379_s22, 10  ;;  %s2964_s13 = int_to_ptr.vmem [resolvable:$true] %s1641_s13 }
  0x8c   : > { %v1759_v4 = vcombine.high %v300_v1, %v304_v2  ;;  %v1758_v6 = vcombine.low %v300_v1, %v304_v2  ;;  %v308_v7 = vld [vmem:[#allocation5 + $0x40] sm:$0xff]  ;;  %v1761_v9 = vcombine.high %v301_v3, %v305_v5  ;;  %v1760_v10 = vcombine.low %v301_v3, %v305_v5  ;;  %v309_v12 = vld [vmem:[#allocation5 + $0x48] sm:$0xff]  ;;  %v306_v61 = vld [vmem:[#allocation5 + $0x30] sm:$0xff]  ;;  %s2970_s9 = scalar_lea.hbm %s3021_s5, %s1861_s6  ;;  %s1628_s10 = scalar_lea.sflag [#allocation4], %s2551_s17 }
  0x8d   : > { %v312_v8 = vld [vmem:[#allocation5 + $0x60] sm:$0xff]  ;;  %v313_v13 = vld [vmem:[#allocation5 + $0x68] sm:$0xff]  ;;  %v303_v1 = vld [vmem:[#allocation5 + $0x18] sm:$0xff]  ;;  %s2238_s12 = scalar_lea.vmem %s2964_s13, 1024  ;;  %s2325_s22 = smov [#allocation10]  }
  0x8e   : > { %v1767_v11 = vcombine.high %v308_v7, %v312_v8  ;;  %v316_v14 = vld [vmem:[#allocation5 + $0x80] sm:$0xff]  ;;  %726 = vmatprep.subr.bf16.mxu0 %v1759_v4  ;;  %v1769_v15 = vcombine.high %v309_v12, %v313_v13  ;;  %v317_v17 = vld [vmem:[#allocation5 + $0x88] sm:$0xff]  ;;  %799 = vmatprep.subr.bf16.mxu1 %v1761_v9  ;;  %v1766_v19 = vcombine.low %v308_v7, %v312_v8  ;;  %v307_v2 = vld [vmem:[#allocation5 + $0x38] sm:$0xff]  ;;  %p2239_p10 = scmp.ne.s32.totalorder %s2964_s13, %s2238_s12  ;;  %s2242_s15 = sshll.u32 %s2325_s22, 4  ;;  %s2243_s15 = int_to_ptr.vmem [resolvable:$false] %s2242_s15 }
  0x8f   : > { %v320_v16 = vld [vmem:[#allocation5 + $0xa0] sm:$0xff]  ;;  %v321_v18 = vld [vmem:[#allocation5 + $0xa8] sm:$0xff]  ;;  %727 = vmatpush1.bf16.msra.mxu0 %v1758_v6  ;;  %800 = vmatpush1.bf16.msra.mxu1 %v1760_v10  ;;  %v1768_v20 = vcombine.low %v309_v12, %v313_v13  ;;  %v310_v7 = vld [vmem:[#allocation5 + $0x50] sm:$0xff]  ;;  %v1763_v10 = vcombine.high %v302_v60, %v306_v61  ;;  %v1765_v13 = vcombine.high %v303_v1, %v307_v2  ;;  %s2244_s16 = scalar_lea.vmem %s2243_s15, 2048  ;;  %p2245_p12 = scmp.lt.s32.totalorder %s2964_s13, %s2243_s15 }
  0x90   : > { %728 = vmatprep.subr.bf16.mxu0 %v1767_v11  ;;  %v1775_v21 = vcombine.high %v316_v14, %v320_v16  ;;  %801 = vmatprep.subr.bf16.mxu1 %v1769_v15  ;;  %v1777_v22 = vcombine.high %v317_v17, %v321_v18  ;;  %v324_v23 = vld [vmem:[#allocation5 + $0xc0] sm:$0xff]  ;;  %v325_v25 = vld [vmem:[#allocation5 + $0xc8] sm:$0xff]  ;;  %v1774_v27 = vcombine.low %v316_v14, %v320_v16  ;;  %v314_v8 = vld [vmem:[#allocation5 + $0x70] sm:$0xff]  ;;  %p2240_p3 = pnand %p2239_p10, %p2503_p5  ;;  %p2246_p2 = scmp.lt.s32.totalorder %s2244_s16, %s2238_s12 }
  0x91   : > { %v328_v24 = vld [vmem:[#allocation5 + $0xe0] sm:$0xff]  ;;  %v329_v26 = vld [vmem:[#allocation5 + $0xe8] sm:$0xff]  ;;  %v1776_v28 = vcombine.low %v317_v17, %v321_v18  ;;  %v311_v11 = vld [vmem:[#allocation5 + $0x58] sm:$0xff]  ;;  %v1762_v15 = vcombine.low %v302_v60, %v306_v61  ;;  %v1764_v18 = vcombine.low %v303_v1, %v307_v2 }
  0x92   : > { %v1783_v29 = vcombine.high %v324_v23, %v328_v24  ;;  %v1785_v30 = vcombine.high %v325_v25, %v329_v26  ;;  %v332_v31 = vld [vmem:[#allocation5 + $0x100] sm:$0xff]  ;;  %v333_v33 = vld [vmem:[#allocation5 + $0x108] sm:$0xff]  ;;  %v1782_v35 = vcombine.low %v324_v23, %v328_v24  ;;  %v1784_v36 = vcombine.low %v325_v25, %v329_v26  ;;  %v315_v12 = vld [vmem:[#allocation5 + $0x78] sm:$0xff]  ;;  %p2241_p7 = pneg %p2240_p3  ;;  %p2247_p1 = por %p2246_p2, %p2245_p12 }
  0x93   : > { %729 = vmatpush1.bf16.msra.mxu0 %v1766_v19  ;;  %802 = vmatpush1.bf16.msra.mxu1 %v1768_v20  ;;  %v336_v32 = vld [vmem:[#allocation5 + $0x120] sm:$0xff]  ;;  %v337_v34 = vld [vmem:[#allocation5 + $0x128] sm:$0xff]  ;;  %v318_v16 = vld [vmem:[#allocation5 + $0x90] sm:$0xff]  ;;  %v1771_v19 = vcombine.high %v310_v7, %v314_v8  ;;  %v1770_v25 = vcombine.low %v310_v7, %v314_v8 }
  0x94   : > { %730 = vmatprep.subr.bf16.mxu0 %v1775_v21  ;;  %803 = vmatprep.subr.bf16.mxu1 %v1777_v22  ;;  %v1791_v37 = vcombine.high %v332_v31, %v336_v32  ;;  %v1793_v38 = vcombine.high %v333_v33, %v337_v34  ;;  %v340_v39 = vld [vmem:[#allocation5 + $0x140] sm:$0xff]  ;;  %v341_v41 = vld [vmem:[#allocation5 + $0x148] sm:$0xff]  ;;  %v1790_v43 = vcombine.low %v332_v31, %v336_v32  ;;  %v322_v17 = vld [vmem:[#allocation5 + $0xb0] sm:$0xff]  ;;  %p2248_p4 = pnand %p2247_p1, %p2241_p7 }
  0x95   : > { %v344_v40 = vld [vmem:[#allocation5 + $0x160] sm:$0xff]  ;;  %v345_v42 = vld [vmem:[#allocation5 + $0x168] sm:$0xff]  ;;  %v1792_v44 = vcombine.low %v333_v33, %v337_v34  ;;  %v319_v20 = vld [vmem:[#allocation5 + $0x98] sm:$0xff]  ;;  %v1773_v22 = vcombine.high %v311_v11, %v315_v12  ;;  %v1778_v34 = vcombine.low %v318_v16, %v322_v17 }
  0x96   : > { %v1799_v45 = vcombine.high %v340_v39, %v344_v40  ;;  %v1801_v46 = vcombine.high %v341_v41, %v345_v42  ;;  %v348_v47 = vld [vmem:[#allocation5 + $0x180] sm:$0xff]  ;;  %v349_v49 = vld [vmem:[#allocation5 + $0x188] sm:$0xff]  ;;  %v1798_v51 = vcombine.low %v340_v39, %v344_v40  ;;  %v1800_v52 = vcombine.low %v341_v41, %v345_v42  ;;  %v323_v21 = vld [vmem:[#allocation5 + $0xb8] sm:$0xff] }
  0x97   : > { %731 = vmatpush1.bf16.msra.mxu0 %v1774_v27  ;;  %804 = vmatpush1.bf16.msra.mxu1 %v1776_v28  ;;  %v352_v48 = vld [vmem:[#allocation5 + $0x1a0] sm:$0xff]  ;;  %v353_v50 = vld [vmem:[#allocation5 + $0x1a8] sm:$0xff]  ;;  %v290_v23 = vld [vmem:[%s2557_s8 + $0x10] sm:$0xff]  ;;  %v1772_v28 = vcombine.low %v311_v11, %v315_v12  ;;  %v1781_v32 = vcombine.high %v319_v20, %v323_v21 }
  0x98   : > { %732 = vmatprep.subr.bf16.mxu0 %v1783_v29  ;;  %805 = vmatprep.subr.bf16.mxu1 %v1785_v30  ;;  %v1807_v53 = vcombine.high %v348_v47, %v352_v48  ;;  %v1809_v54 = vcombine.high %v349_v49, %v353_v50  ;;  %v356_v55 = vld [vmem:[#allocation5 + $0x1c0] sm:$0xff]  ;;  %v357_v57 = vld [vmem:[#allocation5 + $0x1c8] sm:$0xff]  ;;  %v1806_v59 = vcombine.low %v348_v47, %v352_v48  ;;  %v291_v24 = vld [vmem:[%s2557_s8 + $0x18] sm:$0xff] }
  0x99   : > { %v360_v56 = vld [vmem:[#allocation5 + $0x1e0] sm:$0xff]  ;;  %v361_v58 = vld [vmem:[#allocation5 + $0x1e8] sm:$0xff]  ;;  %v1808_v62 = vcombine.low %v349_v49, %v353_v50  ;;  %v326_v26 = vld [vmem:[#allocation5 + $0xd0] sm:$0xff]  ;;  %v1779_v29 = vcombine.high %v318_v16, %v322_v17  ;;  %v2583_v33 = vpack.c.bf16 %v291_v24, %v290_v23 }
  0x9a   : > { %v1815_v63 = vcombine.high %v356_v55, %v360_v56  ;;  %v1817_v3 = vcombine.high %v357_v57, %v361_v58  ;;  %v288_v4 = vld [vmem:[%s2557_s8] sm:$0xff]  ;;  %v289_v5 = vld [vmem:[%s2557_s8 + $0x8] sm:$0xff]  ;;  %v1814_v6 = vcombine.low %v356_v55, %v360_v56  ;;  %v1816_v9 = vcombine.low %v357_v57, %v361_v58  ;;  %v330_v27 = vld [vmem:[#allocation5 + $0xf0] sm:$0xff] }
  0x9b   : > { %733 = vmatpush1.bf16.msra.mxu0 %v1782_v35  ;;  %806 = vmatpush1.bf16.msra.mxu1 %v1784_v36  ;;  %v2575_v14 = vpack.c.bf16 %v289_v5, %v288_v4  ;;  %v327_v30 = vld [vmem:[#allocation5 + $0xd8] sm:$0xff]  ;;  %v334_v35 = vld [vmem:[#allocation5 + $0x110] sm:$0xff]  ;;  %v292_v42 = vld [vmem:[%s2557_s8 + $0x20] sm:$0xff] }
  0x9c   : > { %734 = vmatprep.subr.bf16.mxu0 %v1791_v37  ;;  %807 = vmatprep.subr.bf16.mxu1 %v1793_v38  ;;  %v331_v31 = vld [vmem:[#allocation5 + $0xf8] sm:$0xff]  ;;  %v338_v36 = vld [vmem:[#allocation5 + $0x130] sm:$0xff]  ;;  %v1780_v37 = vcombine.low %v319_v20, %v323_v21  ;;  %v1787_v38 = vcombine.high %v326_v26, %v330_v27  ;;  %v2029_v16 = vld [vmem:[#allocation8 + $0xc0] sm:$0xff]  }
  0x9d   : > { %v335_v39 = vld [vmem:[#allocation5 + $0x118] sm:$0xff]  ;;  %v1789_v41 = vcombine.high %v327_v30, %v331_v31  ;;  %v342_v48 = vld [vmem:[#allocation5 + $0x150] sm:$0xff]  ;;  %v2030_v17 = vld [vmem:[#allocation8] sm:$0xff]  }
  0x9e   : > { %v339_v40 = vld [vmem:[#allocation5 + $0x138] sm:$0xff]  ;;  %v346_v49 = vld [vmem:[#allocation5 + $0x170] sm:$0xff] }
  0x9f   : > { %735 = vmatpush1.bf16.msra.mxu0 %v1790_v43  ;;  %808 = vmatpush1.bf16.msra.mxu1 %v1792_v44  ;;  %v293_v43 = vld [vmem:[%s2557_s8 + $0x28] sm:$0xff]  ;;  %v1786_v44 = vcombine.low %v326_v26, %v330_v27  ;;  %v1797_v47 = vcombine.high %v335_v39, %v339_v40  ;;  %v1803_v55 = vcombine.high %v342_v48, %v346_v49  ;;  %v350_v57 = vld [vmem:[#allocation5 + $0x190] sm:$0xff]  ;;  %v355_v60 = vld [vmem:[#allocation5 + $0x1b8] sm:$0xff] }
  0xa0   : > { %736 = vmatprep.subr.bf16.mxu0 %v1799_v45  ;;  %809 = vmatprep.subr.bf16.mxu1 %v1801_v46  ;;  %v1788_v45 = vcombine.low %v327_v30, %v331_v31  ;;  %v1795_v46 = vcombine.high %v334_v35, %v338_v36  ;;  %v298_v50 = vpack.c.bf16 %v293_v43, %v292_v42  ;;  %v354_v58 = vld [vmem:[#allocation5 + $0x1b0] sm:$0xff]  ;;  %v359_v7 = vld [vmem:[#allocation5 + $0x1d8] sm:$0xff]  ;;  %v2040_v26 = vld [vmem:[#allocation8 + $0x58] sm:$0xff]  }
  0xa1   : > { %v1802_v61 = vcombine.low %v342_v48, %v346_v49  ;;  %v1811_v2 = vcombine.high %v350_v57, %v354_v58  ;;  %v358_v4 = vld [vmem:[#allocation5 + $0x1d0] sm:$0xff]  ;;  %v363_v8 = vld [vmem:[#allocation5 + $0x1f8] sm:$0xff]  ;;  %v2041_v27 = vld [vmem:[#allocation8 + $0xd8] sm:$0xff]  }
  0xa2   : > { %v362_v5 = vld [vmem:[#allocation5 + $0x1f0] sm:$0xff]  ;;  %v1821_v12 = vcombine.high %v359_v7, %v363_v8  ;;  %v2036_v23 = vld [vmem:[#allocation8 + $0x50] sm:$0xff]   ;;  %v2044_v30 = vld [vmem:[#allocation8 + $0x60] sm:$0xff]  }
  0xa3   : > { %737 = vmatpush1.bf16.msra.mxu0 %v1798_v51  ;;  %810 = vmatpush1.bf16.msra.mxu1 %v1800_v52  ;;  %v343_v51 = vld [vmem:[#allocation5 + $0x158] sm:$0xff]  ;;  %v1819_v11 = vcombine.high %v358_v4, %v362_v5  ;;  %v2033_v20 = vld [vmem:[#allocation8 + $0xc8] sm:$0xff]   ;;  %v2045_v31 = vld [vmem:[#allocation8 + $0xe0] sm:$0xff]  }
  0xa4   : > { %738 = vmatprep.subr.bf16.mxu0 %v1807_v53  ;;  %811 = vmatprep.subr.bf16.mxu1 %v1809_v54  ;;  %v347_v52 = vld [vmem:[#allocation5 + $0x178] sm:$0xff]  ;;  %v1794_v53 = vcombine.low %v334_v35, %v338_v36  ;;  %v1796_v54 = vcombine.low %v335_v39, %v339_v40  ;;  %v2034_v21 = vld [vmem:[#allocation8 + $0x8] sm:$0xff]   ;;  %v2056_v42 = vld [vmem:[#allocation8 + $0x78] sm:$0xff]  }
  0xa5   : > { %v1805_v56 = vcombine.high %v343_v51, %v347_v52  ;;  %v1804_v1 = vcombine.low %v343_v51, %v347_v52  ;;  %v2038_v24 = vld [vmem:[#allocation8 + $0x10] sm:$0xff]   ;;  %v2049_v35 = vld [vmem:[#allocation8 + $0xe8] sm:$0xff]   ;;  %v2057_v43 = vld [vmem:[#allocation8 + $0xf8] sm:$0xff]  }
  0xa6   : > { %v2050_v36 = vld [vmem:[#allocation8 + $0x28] sm:$0xff]   ;;  %v2053_v39 = vld [vmem:[#allocation8 + $0xf0] sm:$0xff]  }
  0xa7   : > { %739 = vmatpush1.bf16.msra.mxu0 %v1806_v59  ;;  %812 = vmatpush1.bf16.msra.mxu1 %v1808_v62  ;;  %v351_v59 = vld [vmem:[#allocation5 + $0x198] sm:$0xff]  ;;  %v294_v62 = vld [vmem:[%s2557_s8 + $0x30] sm:$0xff] }
  0xa8   : > { %740 = vmatprep.subr.bf16.mxu0 %v1815_v63  ;;  %813 = vmatprep.subr.bf16.mxu1 %v1817_v3  ;;  %v295_v63 = vld [vmem:[%s2557_s8 + $0x38] sm:$0xff]  ;;  %v1813_v3 = vcombine.high %v351_v59, %v355_v60 }
  0xa9   : > { %v2054_v40 = vld [vmem:[#allocation8 + $0x30] sm:$0xff]  }
  0xab   : > { %741 = vmatpush1.bf16.msra.mxu0 %v1814_v6  ;;  %814 = vmatpush1.bf16.msra.mxu1 %v1816_v9  ;;  %v299_v6 = vpack.c.bf16 %v295_v63, %v294_v62  ;;  %v1810_v9 = vcombine.low %v350_v57, %v354_v58 }
  0xac   : > { %872 = vmatprep.subr.bf16.mxu0 %v1763_v10  ;;  %945 = vmatprep.subr.bf16.mxu1 %v1765_v13  ;;  %v1812_v10 = vcombine.low %v351_v59, %v355_v60  ;;  %v1818_v13 = vcombine.low %v358_v4, %v362_v5 }
  0xae   : > { %759 = vmatmul.mubr.bf16.vlgmr.msra.gmra.mrb[0].mxu0 %v2575_v14  ;;  %832 = vmatmul.mubr.bf16.vlgmr.msra.gmra.mrb[0].mxu1 %v2575_v14 }
  0xaf   : > { %873 = vmatpush1.bf16.msra.mxu0 %v1762_v15  ;;  %946 = vmatpush1.bf16.msra.mxu1 %v1764_v18  ;;  %v1820_v15 = vcombine.low %v359_v7, %v363_v8  ;;  %v2031_v18 = vld [vmem:[#allocation8 + $0x80] sm:$0xff]  }
  0xb0   : > { %874 = vmatprep.subr.bf16.mxu0 %v1771_v19  ;;  %947 = vmatprep.subr.bf16.mxu1 %v1773_v22  ;;  %v2032_v19 = vld [vmem:[#allocation8 + $0x48] sm:$0xff]  }
  0xb1   : > { %768 = vmatprep.mubr.bf16.mxu0 %v2324_v0  ;;  %841 = vmatprep.mubr.bf16.mxu1 %v2324_v0  ;;  %v2035_v22 = vld [vmem:[#allocation8 + $0x88] sm:$0xff]  }
  0xb3   : > { %875 = vmatpush1.bf16.msra.mxu0 %v1770_v25  ;;  %948 = vmatpush1.bf16.msra.mxu1 %v1772_v28  ;;  %v2039_v25 = vld [vmem:[#allocation8 + $0x90] sm:$0xff]   ;;  %v2042_v28 = vld [vmem:[#allocation8 + $0x18] sm:$0xff]  }
  0xb4   : > { %876 = vmatprep.subr.bf16.mxu0 %v1779_v29  ;;  %949 = vmatprep.subr.bf16.mxu1 %v1781_v32  ;;  %v2043_v29 = vld [vmem:[#allocation8 + $0x98] sm:$0xff]   ;;  %v2046_v32 = vld [vmem:[#allocation8 + $0x20] sm:$0xff]  }
  0xb6   : > { %769 = vmatmul.mubr.bf16.gmra.mrb[4].mxu0 %v2583_v33  ;;  %842 = vmatmul.mubr.bf16.gmra.mrb[4].mxu1 %v2583_v33 }
  0xb7   : > { %877 = vmatpush1.bf16.msra.mxu0 %v1778_v34  ;;  %950 = vmatpush1.bf16.msra.mxu1 %v1780_v37  ;;  %v2048_v34 = vld [vmem:[#allocation8 + $0x68] sm:$0xff]  }
  0xb8   : > { %878 = vmatprep.subr.bf16.mxu0 %v1787_v38  ;;  %951 = vmatprep.subr.bf16.mxu1 %v1789_v41  ;;  %v2051_v37 = vld [vmem:[#allocation8 + $0xa8] sm:$0xff]   ;;  %v2052_v38 = vld [vmem:[#allocation8 + $0x70] sm:$0xff]  }
  0xb9   : > { %778 = vmatprep.mubr.bf16.mxu0 %v2324_v0  ;;  %851 = vmatprep.mubr.bf16.mxu1 %v2324_v0  ;;  %v2055_v41 = vld [vmem:[#allocation8 + $0xb0] sm:$0xff]  }
  0xbb   : > { %879 = vmatpush1.bf16.msra.mxu0 %v1786_v44  ;;  %952 = vmatpush1.bf16.msra.mxu1 %v1788_v45  ;;  %v2058_v44 = vld [vmem:[#allocation8 + $0x38] sm:$0xff]  }
  0xbc   : > { %880 = vmatprep.subr.bf16.mxu0 %v1795_v46  ;;  %953 = vmatprep.subr.bf16.mxu1 %v1797_v47  ;;  %v2059_v45 = vld [vmem:[#allocation8 + $0xb8] sm:$0xff]  }
  0xbe   : > { %779 = vmatmul.mubr.bf16.gmra.mrb[8].mxu0 %v298_v50  ;;  %852 = vmatmul.mubr.bf16.gmra.mrb[8].mxu1 %v298_v50 }
  0xbf   : > { %881 = vmatpush1.bf16.msra.mxu0 %v1794_v53  ;;  %954 = vmatpush1.bf16.msra.mxu1 %v1796_v54 }
  0xc0   : > { %882 = vmatprep.subr.bf16.mxu0 %v1803_v55  ;;  %955 = vmatprep.subr.bf16.mxu1 %v1805_v56 }
  0xc1   : > { %788 = vmatprep.mubr.bf16.mxu0 %v2324_v0  ;;  %861 = vmatprep.mubr.bf16.mxu1 %v2324_v0 }
  0xc3   : > { %883 = vmatpush1.bf16.msra.mxu0 %v1802_v61  ;;  %956 = vmatpush1.bf16.msra.mxu1 %v1804_v1  ;;  %v366_v61 = vlaneseq }
  0xc4   : > { %884 = vmatprep.subr.bf16.mxu0 %v1811_v2  ;;  %957 = vmatprep.subr.bf16.mxu1 %v1813_v3 }
  0xc5   : > { %v367_v63 = vshrl.u32 %v366_v61, 7 }
  0xc6   : > { %789 = vmatmul.mubr.bf16.gmra.mrb[12].mxu0 %v299_v6  ;;  %862 = vmatmul.mubr.bf16.gmra.mrb[12].mxu1 %v299_v6 }
  0xc7   : > { %885 = vmatpush1.bf16.msra.mxu0 %v1810_v9  ;;  %958 = vmatpush1.bf16.msra.mxu1 %v1812_v10  ;;  %v368_v8 = vsub.s32 0, %v367_v63  ;;  %v376_v9 = vsub.s32 2, %v367_v63  ;;  %v372_v10 = vsub.s32 1, %v367_v63 }
  0xc8   : > { %886 = vmatprep.subr.bf16.mxu0 %v1819_v11  ;;  %959 = vmatprep.subr.bf16.mxu1 %v1821_v12  ;;  %v380_v11 = vsub.s32 3, %v367_v63 }
  0xc9   : > { %904 = vmatprep.mubr.bf16.mxu0 %v2324_v0  ;;  %977 = vmatprep.mubr.bf16.mxu1 %v2324_v0 }
  0xcb   : > { %887 = vmatpush1.bf16.msra.mxu0 %v1818_v13  ;;  %960 = vmatpush1.bf16.msra.mxu1 %v1820_v15  ;;  %v364_v13 = vld [vmem:[#allocation7] sm:$0xff]  ;;  %v384_v15 = vsub.s32 4, %v367_v63 }
  0xcc   : > { %1902 = vmatprep.subr.bf16.mxu1 %v2029_v16  ;;  %v388_v16 = vsub.s32 5, %v367_v63 }
  0xce   : > { %905 = vmatmul.mubr.bf16.vlgmr.msra.gmra.mrb[16].mxu0 %v2575_v14  ;;  %978 = vmatmul.mubr.bf16.vlgmr.msra.gmra.mrb[16].mxu1 %v2575_v14  ;;  %v2028_v14 = vld [vmem:[#allocation8 + $0x40] sm:$0xff]  }
  0xcf   : > { %914 = vmatprep.mubr.bf16.mxu0 %v2324_v0  ;;  %987 = vmatprep.mubr.bf16.mxu1 %v2324_v0 }
  0xd0   : > { %1862 = vmatprep.subr.bf16.mxu0 %v2028_v14  ;;  %1903 = vmatpush3.bf16.msra.mxu1 %v2031_v18  ;;  %v392_v14 = vsub.s32 6, %v367_v63  ;;  %v369_v18 = vrot.slane %v364_v13, %v368_v8 }
  0xd1   : > { %1863 = vmatpush3.bf16.msra.mxu0 %v2030_v17  ;;  %1904 = vmatprep.subr.bf16.mxu1 %v2033_v20  ;;  %v396_v17 = vsub.s32 7, %v367_v63  ;;  %v2607_v20 = vrot.slane %v364_v13, %v372_v10 }
  0xd2   : > { %1864 = vmatprep.subr.bf16.mxu0 %v2032_v19  ;;  %v377_v19 = vrot.slane %v364_v13, %v376_v9 }
  0xd3   : > { %3041 = vst [vmem:[#allocation15_spill] sm:$0xff] %v2607_v20 }
  0xd4   : > { %1905 = vmatpush3.bf16.msra.mxu1 %v2035_v22 }
  0xd5   : > { %1865 = vmatpush3.bf16.msra.mxu0 %v2034_v21  ;;  %v2609_v21 = vrot.slane %v364_v13, %v380_v11 }
  0xd6   : > { %915 = vmatmul.mubr.bf16.gmra.mrb[20].mxu0 %v2583_v33  ;;  %988 = vmatmul.mubr.bf16.gmra.mrb[20].mxu1 %v2583_v33  ;;  %v2047_v33 = vld [vmem:[#allocation8 + $0xa0] sm:$0xff]  }
  0xd7   : > { %924 = vmatprep.mubr.bf16.mxu0 %v2324_v0  ;;  %997 = vmatprep.mubr.bf16.mxu1 %v2324_v0  ;;  %3042 = vst [vmem:[#allocation16_spill] sm:$0xff] %v2609_v21 }
  0xd8   : > { %1866 = vmatprep.subr.bf16.mxu0 %v2036_v23 }
  0xd9   : > { %1867 = vmatpush3.bf16.msra.mxu0 %v2038_v24 }
  0xda   : > { %1868 = vmatprep.subr.bf16.mxu0 %v2040_v26 }
  0xdd   : > { %1869 = vmatpush3.bf16.msra.mxu0 %v2042_v28  ;;  %v2613_v28 = vrot.slane %v364_v13, %v384_v15 }
  0xde   : > { %925 = vmatmul.mubr.bf16.gmra.mrb[24].mxu0 %v298_v50  ;;  %998 = vmatmul.mubr.bf16.gmra.mrb[24].mxu1 %v298_v50 }
  0xdf   : > { %934 = vmatprep.mubr.bf16.mxu0 %v2324_v0  ;;  %1007 = vmatprep.mubr.bf16.mxu1 %v2324_v0  ;;  %v2037_v0 = vld [vmem:[#allocation8 + $0xd0] sm:$0xff]  }
  0xe0   : > { %1906 = vmatprep.subr.bf16.mxu1 %v2037_v0  ;;  %1870 = vmatprep.subr.bf16.mxu0 %v2044_v30  ;;  %v2617_v30 = vrot.slane %v364_v13, %v388_v16 }
  0xe1   : > { %1907 = vmatpush3.bf16.msra.mxu1 %v2039_v25  ;;  %1871 = vmatpush3.bf16.msra.mxu0 %v2046_v32 }
  0xe2   : > { %1908 = vmatprep.subr.bf16.mxu1 %v2041_v27  ;;  %1872 = vmatprep.subr.bf16.mxu0 %v2048_v34 }
  0xe5   : > { %1909 = vmatpush3.bf16.msra.mxu1 %v2043_v29  ;;  %1873 = vmatpush3.bf16.msra.mxu0 %v2050_v36  ;;  %v2615_v29 = vrot.slane %v364_v13, %v392_v14 }
  0xe6   : > { %935 = vmatmul.mubr.bf16.gmra.mrb[28].mxu0 %v299_v6  ;;  %1008 = vmatmul.mubr.bf16.gmra.mrb[28].mxu1 %v299_v6 }
  0xe7   : > { %1910 = vmatprep.subr.bf16.mxu1 %v2045_v31  ;;  %1874 = vmatprep.subr.bf16.mxu0 %v2052_v38  ;;  %v2619_v31 = vrot.slane %v364_v13, %v396_v17 }
  0xe9   : > { %1911 = vmatpush3.bf16.msra.mxu1 %v2047_v33  ;;  %1875 = vmatpush3.bf16.msra.mxu0 %v2054_v40 }
  0xea   : > { %1912 = vmatprep.subr.bf16.mxu1 %v2049_v35  ;;  %1876 = vmatprep.subr.bf16.mxu0 %v2056_v42 }
  0xed   : > { %1913 = vmatpush3.bf16.msra.mxu1 %v2051_v37  ;;  %1877 = vmatpush3.bf16.msra.mxu0 %v2058_v44 }
  0xee   : > { %1914 = vmatprep.subr.bf16.mxu1 %v2053_v39 }
  0xf1   : > { %1915 = vmatpush3.bf16.msra.mxu1 %v2055_v41 }
  0xf2   : > { %1916 = vmatprep.subr.bf16.mxu1 %v2057_v43 }
  0xf5   : > { %1917 = vmatpush3.bf16.msra.mxu1 %v2059_v45 }
 0x181   : > { %v760_v46 = vpop.f32.mrb[0].mxu0  ;;  %v833_v47 = vpop.f32.mrb[0].mxu1 }
 0x182   : > { %v762_v48 = vpop.f32.mrb[1].mxu0  ;;  %v835_v49 = vpop.f32.mrb[1].mxu1  ;;  %v2621_v32 = vadd.f32 %v760_v46, %v369_v18  ;;  %v2623_v33 = vadd.f32 %v833_v47, %v377_v19 }
 0x183   : > { %v764_v50 = vpop.f32.mrb[2].mxu0  ;;  %v837_v51 = vpop.f32.mrb[2].mxu1  ;;  %v2626_v34 = vadd.f32 %v762_v48, %v2607_v20  ;;  %v2629_v35 = vadd.f32 %v835_v49, %v2609_v21 }
 0x184   : > { %v766_v52 = vpop.f32.mrb[3].mxu0  ;;  %v839_v53 = vpop.f32.mrb[3].mxu1  ;;  %v2633_v37 = vadd.f32 %v764_v50, %v369_v18  ;;  %v2635_v38 = vadd.f32 %v837_v51, %v377_v19 }
 0x185   : > { %v2638_v39 = vadd.f32 %v766_v52, %v2607_v20  ;;  %v2641_v40 = vadd.f32 %v839_v53, %v2609_v21 }
 0x189   : > { %v770_v54 = vpop.f32.mrb[4].mxu0  ;;  %v843_v55 = vpop.f32.mrb[4].mxu1 }
 0x18a   : > { %v772_v56 = vpop.f32.mrb[5].mxu0  ;;  %v845_v57 = vpop.f32.mrb[5].mxu1  ;;  %v2643_v41 = vadd.f32 %v770_v54, %v369_v18  ;;  %v2645_v42 = vadd.f32 %v843_v55, %v377_v19 }
 0x18b   : > { %v774_v58 = vpop.f32.mrb[6].mxu0  ;;  %v847_v59 = vpop.f32.mrb[6].mxu1  ;;  %v2648_v43 = vadd.f32 %v772_v56, %v2607_v20  ;;  %v2651_v44 = vadd.f32 %v845_v57, %v2609_v21 }
 0x18c   : > { %v776_v60 = vpop.f32.mrb[7].mxu0  ;;  %v849_v62 = vpop.f32.mrb[7].mxu1  ;;  %v2653_v45 = vadd.f32 %v774_v58, %v369_v18  ;;  %v2655_v46 = vadd.f32 %v847_v59, %v377_v19 }
 0x18d   : > { %v2658_v47 = vadd.f32 %v776_v60, %v2607_v20  ;;  %v2661_v48 = vadd.f32 %v849_v62, %v2609_v21 }
 0x191   : > { %v780_v1 = vpop.f32.mrb[8].mxu0  ;;  %v853_v2 = vpop.f32.mrb[8].mxu1 }
 0x192   : > { %v782_v3 = vpop.f32.mrb[9].mxu0  ;;  %v855_v4 = vpop.f32.mrb[9].mxu1  ;;  %v2663_v49 = vadd.f32 %v780_v1, %v369_v18  ;;  %v2665_v50 = vadd.f32 %v853_v2, %v377_v19 }
 0x193   : > { %v784_v5 = vpop.f32.mrb[10].mxu0  ;;  %v857_v6 = vpop.f32.mrb[10].mxu1  ;;  %v2668_v51 = vadd.f32 %v782_v3, %v2607_v20  ;;  %v2671_v52 = vadd.f32 %v855_v4, %v2609_v21 }
 0x194   : > { %v786_v7 = vpop.f32.mrb[11].mxu0  ;;  %v859_v12 = vpop.f32.mrb[11].mxu1  ;;  %3045 = vst [vmem:[#allocation19_spill] sm:$0xff] %v2663_v49  ;;  %3046 = vst [vmem:[#allocation20_spill] sm:$0xff] %v2665_v50  ;;  %v2673_v54 = vadd.f32 %v784_v5, %v369_v18  ;;  %v2675_v55 = vadd.f32 %v857_v6, %v377_v19 }
 0x195   : > { %3047 = vst [vmem:[#allocation21_spill] sm:$0xff] %v2671_v52  ;;  %v2678_v56 = vadd.f32 %v786_v7, %v2607_v20  ;;  %v2682_v60 = vadd.f32 %v859_v12, %v2609_v21 }
 0x196   : > { %3048 = vst [vmem:[#allocation22_spill] sm:$0xff] %v2673_v54  ;;  %3049 = vst [vmem:[#allocation23_spill] sm:$0xff] %v2675_v55 }
 0x197   : > { %3050 = vst [vmem:[#allocation24_spill] sm:$0xff] %v2678_v56  ;;  %3051 = vst [vmem:[#allocation25_spill] sm:$0xff] %v2682_v60 }
 0x199   : > { %v790_v22 = vpop.f32.mrb[12].mxu0  ;;  %v863_v23 = vpop.f32.mrb[12].mxu1 }
 0x19a   : > { %v792_v0 = vpop.f32.mrb[13].mxu0  ;;  %v865_v24 = vpop.f32.mrb[13].mxu1  ;;  %v2684_v61 = vadd.f32 %v790_v22, %v369_v18  ;;  %v2688_v3 = vadd.f32 %v863_v23, %v377_v19 }
 0x19b   : > { %v794_v25 = vpop.f32.mrb[14].mxu0  ;;  %v867_v26 = vpop.f32.mrb[14].mxu1  ;;  %v2693_v9 = vadd.f32 %v792_v0, %v2607_v20  ;;  %v2696_v10 = vadd.f32 %v865_v24, %v2609_v21 }
 0x19c   : > { %v2611_v27 = vpop.f32.mrb[15].mxu0  ;;  %v2631_v36 = vpop.f32.mrb[15].mxu1  ;;  %3052 = vst [vmem:[#allocation26_spill] sm:$0xff] %v2684_v61  ;;  %3053 = vst [vmem:[#allocation27_spill] sm:$0xff] %v2688_v3  ;;  %v2698_v13 = vadd.f32 %v794_v25, %v369_v18  ;;  %v2700_v15 = vadd.f32 %v867_v26, %v377_v19 }
 0x19d   : > { %3043 = vst [vmem:[#allocation17_spill] sm:$0xff] %v2611_v27  ;;  %3044 = vst [vmem:[#allocation18_spill] sm:$0xff] %v2631_v36 }
 0x19e   : > { %3054 = vst [vmem:[#allocation28_spill] sm:$0xff] %v2693_v9  ;;  %3055 = vst [vmem:[#allocation29_spill] sm:$0xff] %v2696_v10 }
 0x19f   : > { %3056 = vst [vmem:[#allocation30_spill] sm:$0xff] %v2698_v13  ;;  %3057 = vst [vmem:[#allocation31_spill] sm:$0xff] %v2700_v15 }
 0x1a1   : > { %v906_v53 = vpop.f32.mrb[16].mxu0  ;;  %v979_v58 = vpop.f32.mrb[16].mxu1 }
 0x1a2   : > { %v907_v57 = vadd.f32 %v906_v53, %v2613_v28  ;;  %v908_v59 = vpop.f32.mrb[17].mxu0  ;;  %v980_v62 = vadd.f32 %v979_v58, %v2615_v29  ;;  %v981_v1 = vpop.f32.mrb[17].mxu1 }
 0x1a3   : > { %v909_v63 = vadd.f32 %v908_v59, %v2617_v30  ;;  %v910_v2 = vpop.f32.mrb[18].mxu0  ;;  %v982_v5 = vadd.f32 %v981_v1, %v2619_v31  ;;  %v983_v7 = vpop.f32.mrb[18].mxu1 }
 0x1a4   : > { %v1050_v4 = vmul.f32 0.70710677, %v907_v57  ;;  %v911_v6 = vadd.f32 %v910_v2, %v2613_v28  ;;  %v912_v8 = vpop.f32.mrb[19].mxu0  ;;  %v1052_v11 = vmul.f32 0.70710677, %v980_v62  ;;  %v985_v16 = vpop.f32.mrb[19].mxu1  ;;  %v984_v22 = vadd.f32 %v983_v7, %v2615_v29 }
 0x1a5   : > { %v1051_v12 = vmul.f32 0.70710677, %v909_v63  ;;  %v1053_v14 = vmul.f32 0.70710677, %v982_v5  ;;  %v913_v23 = vadd.f32 %v912_v8, %v2617_v30  ;;  %v1018_v0 = vmul.f32 0.5, %v907_v57 }
 0x1a6   : > { %2060 = verf.f32 %v1050_v4  ;;  %v1054_v17 = vmul.f32 0.70710677, %v911_v6  ;;  %v2704_v53 = vmul.f32 0.5, %v980_v62  ;;  %v986_v24 = vadd.f32 %v985_v16, %v2619_v31 }
 0x1a7   : > { %2062 = verf.f32 %v1052_v11  ;;  %v2707_v58 = vmul.f32 0.5, %v909_v63  ;;  %v2709_v18 = vmul.f32 0.5, %v982_v5  ;;  %v1056_v19 = vmul.f32 0.70710677, %v984_v22 }
 0x1a8   : > { %2064 = verf.f32 %v1051_v12  ;;  %v2711_v26 = vmul.f32 0.5, %v911_v6  ;;  %v1055_v59 = vmul.f32 0.70710677, %v913_v23  ;;  %v1057_v1 = vmul.f32 0.70710677, %v986_v24 }
 0x1a9   : > { %2066 = verf.f32 %v1053_v14  ;;  %v916_v25 = vpop.f32.mrb[20].mxu0  ;;  %v989_v2 = vpop.f32.mrb[20].mxu1  ;;  %v2713_v4 = vmul.f32 0.5, %v984_v22  ;;  %v2717_v5 = vmul.f32 0.5, %v913_v23  ;;  %v2721_v14 = vmul.f32 0.5, %v986_v24 }
 0x1aa   : > { %2068 = verf.f32 %v1054_v17  ;;  %v917_v57 = vadd.f32 %v916_v25, %v2613_v28  ;;  %v990_v62 = vadd.f32 %v989_v2, %v2615_v29  ;;  %v918_v63 = vpop.f32.mrb[21].mxu0  ;;  %v991_v7 = vpop.f32.mrb[21].mxu1 }
 0x1ab   : > { %2070 = verf.f32 %v1056_v19  ;;  %v919_v8 = vadd.f32 %v918_v63, %v2617_v30  ;;  %v992_v6 = vadd.f32 %v991_v7, %v2619_v31  ;;  %v920_v11 = vpop.f32.mrb[22].mxu0  ;;  %v993_v12 = vpop.f32.mrb[22].mxu1 }
 0x1ac   : > { %2072 = verf.f32 %v1055_v59  ;;  %v2723_v16 = vmul.f32 0.5, %v917_v57  ;;  %v1058_v17 = vmul.f32 0.70710677, %v917_v57  ;;  %v922_v22 = vpop.f32.mrb[23].mxu0  ;;  %v995_v19 = vpop.f32.mrb[23].mxu1  ;;  %v2725_v25 = vmul.f32 0.5, %v990_v62 }
 0x1ad   : > { %2074 = verf.f32 %v1057_v1  ;;  %v1060_v2 = vmul.f32 0.70710677, %v990_v62  ;;  %v2727_v23 = vmul.f32 0.5, %v919_v8  ;;  %v1059_v59 = vmul.f32 0.70710677, %v919_v8 }
 0x1ae   : > { %2076 = verf.f32 %v1058_v17  ;;  %v1061_v63 = vmul.f32 0.70710677, %v992_v6  ;;  %v921_v7 = vadd.f32 %v920_v11, %v2613_v28  ;;  %v994_v15 = vadd.f32 %v993_v12, %v2615_v29 }
 0x1af   : > { %2078 = verf.f32 %v1060_v2  ;;  %v2731_v1 = vmul.f32 0.5, %v992_v6  ;;  %v923_v57 = vadd.f32 %v922_v22, %v2617_v30  ;;  %v996_v36 = vadd.f32 %v995_v19, %v2619_v31 }
 0x1b0   : > { %v2061_v24 = vpop.eup %2060  ;;  %2080 = verf.f32 %v1059_v59  ;;  %v2735_v62 = vmul.f32 0.5, %v921_v7  ;;  %v1062_v8 = vmul.f32 0.70710677, %v921_v7  ;;  %v2737_v11 = vmul.f32 0.5, %v994_v15 }
 0x1b1   : > { %v2063_v21 = vpop.eup %2062  ;;  %v1114_v3 = vadd.f32 1.0, %v2061_v24  ;;  %v926_v17 = vpop.f32.mrb[24].mxu0  ;;  %2082 = verf.f32 %v1061_v63  ;;  %v1064_v12 = vmul.f32 0.70710677, %v994_v15  ;;  %v2739_v19 = vmul.f32 0.5, %v923_v57 }
 0x1b2   : > { %v2065_v27 = vpop.eup %2064  ;;  %v1116_v20 = vadd.f32 1.0, %v2063_v21  ;;  %v999_v2 = vpop.f32.mrb[24].mxu1  ;;  %2084 = verf.f32 %v1062_v8  ;;  %v1063_v63 = vmul.f32 0.70710677, %v923_v57  ;;  %v2756_v8 = vmul.f32 0.5, %v996_v36 }
 0x1b3   : > { %v928_v6 = vpop.f32.mrb[25].mxu0  ;;  %v2067_v13 = vpop.eup %2066  ;;  %v1146_v61 = vmul.f32 %v1114_v3, %v1018_v0  ;;  %v1115_v22 = vadd.f32 1.0, %v2065_v27  ;;  %2086 = verf.f32 %v1064_v12  ;;  %v1000_v49 = vadd.f32 %v999_v2, %v2615_v29 }
 0x1b4   : > { %v2741_v24 = vpop.f32.mrb[25].mxu1  ;;  %v2743_v59 = vpop.f32.mrb[26].mxu0  ;;  %v1148_v10 = vmul.f32 %v1116_v20, %v2704_v53  ;;  %v1117_v21 = vadd.f32 1.0, %v2067_v13  ;;  %2088 = verf.f32 %v1063_v63 }
 0x1b5   : > { %v2069_v7 = vpop.eup %2068  ;;  %v2746_v9 = vpop.f32.mrb[26].mxu1  ;;  %v2751_v27 = vmul.f32 %v1146_v61, %v2621_v32  ;;  %v2754_v3 = vmul.f32 %v1115_v22, %v2707_v58  ;;  %v1065_v58 = vmul.f32 0.70710677, %v996_v36  ;;  %v927_v22 = vadd.f32 %v926_v17, %v2613_v28 }
 0x1b6   : > { %v2748_v15 = vpop.f32.mrb[27].mxu0  ;;  %v2071_v55 = vpop.eup %2070  ;;  %v1118_v0 = vadd.f32 1.0, %v2069_v7  ;;  %v2761_v13 = vmul.f32 %v1148_v10, %v2623_v33  ;;  %v2764_v53 = vmul.f32 %v1117_v21, %v2709_v18  ;;  %v929_v33 = vadd.f32 %v928_v6, %v2617_v30 }
 0x1b7   : > { %v2758_v50 = vpop.f32.mrb[27].mxu1  ;;  %v2073_v20 = vpop.eup %2072  ;;  %v1120_v57 = vadd.f32 1.0, %v2071_v55  ;;  %2090 = verf.f32 %v1065_v58  ;;  %v1066_v6 = vmul.f32 0.70710677, %v927_v22 }
 0x1b8   : > { %v2075_v12 = vpop.eup %2074  ;;  %v1150_v32 = vmul.f32 %v1118_v0, %v2711_v26  ;;  %v1119_v61 = vadd.f32 1.0, %v2073_v20  ;;  %v2777_v26 = vmul.f32 0.5, %v927_v22 }
 0x1b9   : > { %v1152_v7 = vmul.f32 %v1120_v57, %v2713_v4  ;;  %v1121_v54 = vadd.f32 1.0, %v2075_v12  ;;  %v2077_v10 = vpop.eup %2076  ;;  %v936_v36 = vpop.f32.mrb[28].mxu0  ;;  %v2787_v57 = vmul.f32 0.5, %v1000_v49  ;;  %v1068_v12 = vmul.f32 0.70710677, %v1000_v49 }
 0x1ba   : > { %v2772_v18 = vmul.f32 %v1150_v32, %v2633_v37  ;;  %v2775_v55 = vmul.f32 %v1119_v61, %v2717_v5  ;;  %v2079_v21 = vpop.eup %2078  ;;  %v1122_v2 = vadd.f32 1.0, %v2077_v10  ;;  %v1009_v63 = vpop.f32.mrb[28].mxu1  ;;  %2092 = verf.f32 %v1066_v6 }
 0x1bb   : > { %v2780_v17 = vmul.f32 %v1152_v7, %v2635_v38  ;;  %v2783_v4 = vmul.f32 %v1121_v54, %v2721_v14  ;;  %v938_v0 = vpop.f32.mrb[29].mxu0  ;;  %v2081_v37 = vpop.eup %2080  ;;  %v1124_v20 = vadd.f32 1.0, %v2079_v21  ;;  %2094 = verf.f32 %v1068_v12 }
 0x1bc   : > { %v1011_v32 = vpop.f32.mrb[29].mxu1  ;;  %v940_v61 = vpop.f32.mrb[30].mxu0  ;;  %v2792_v54 = vmul.f32 %v1122_v2, %v2723_v16  ;;  %v1123_v14 = vadd.f32 1.0, %v2081_v37  ;;  %v2801_v5 = vmul.f32 0.5, %v929_v33  ;;  %v1067_v6 = vmul.f32 0.70710677, %v929_v33 }
 0x1bd   : > { %v2083_v58 = vpop.eup %2082  ;;  %v2794_v22 = vpop.f32.mrb[30].mxu1  ;;  %v2799_v21 = vmul.f32 %v1124_v20, %v2725_v25  ;;  %v1002_v37 = vadd.f32 %v2741_v24, %v2619_v31  ;;  %v931_v20 = vadd.f32 %v2743_v59, %v2613_v28  ;;  %v1004_v12 = vadd.f32 %v2746_v9, %v2615_v29 }
 0x1be   : > { %v2796_v7 = vpop.f32.mrb[31].mxu0  ;;  %v2085_v10 = vpop.eup %2084  ;;  %v1125_v49 = vadd.f32 1.0, %v2083_v58  ;;  %v2806_v16 = vmul.f32 %v1123_v14, %v2727_v23  ;;  %2096 = verf.f32 %v1067_v6  ;;  %v933_v9 = vadd.f32 %v2748_v15, %v2617_v30 }
 0x1bf   : > { %v2803_v60 = vpop.f32.mrb[31].mxu1  ;;  %v2087_v38 = vpop.eup %2086  ;;  %v1126_v2 = vadd.f32 1.0, %v2085_v10  ;;  %v2820_v23 = vmul.f32 0.5, %v1002_v37  ;;  %v1069_v33 = vmul.f32 0.70710677, %v1002_v37  ;;  %v2825_v14 = vmul.f32 0.5, %v931_v20 }
 0x1c0   : > { %v2811_v52 = vmul.f32 %v1125_v49, %v2731_v1  ;;  %v1128_v25 = vadd.f32 1.0, %v2087_v38  ;;  %v2089_v58 = vpop.eup %2088  ;;  %v1070_v38 = vmul.f32 0.70710677, %v931_v20  ;;  %v2827_v59 = vmul.f32 0.5, %v1004_v12 }
 0x1c1   : > { %v2818_v56 = vmul.f32 %v1126_v2, %v2735_v62  ;;  %v1127_v1 = vadd.f32 1.0, %v2089_v58  ;;  %2098 = verf.f32 %v1069_v33  ;;  %v1072_v10 = vmul.f32 0.70710677, %v1004_v12  ;;  %v2091_v62 = vpop.eup %2090 }
 0x1c2   : > { %v2823_v24 = vmul.f32 %v1128_v25, %v2737_v11  ;;  %2100 = verf.f32 %v1070_v38  ;;  %v1006_v11 = vadd.f32 %v2758_v50, %v2619_v31  ;;  %v937_v2 = vadd.f32 %v936_v36, %v2613_v28 }
 0x1c3   : > { %v2832_v49 = vmul.f32 %v1127_v1, %v2739_v19  ;;  %v1129_v6 = vadd.f32 1.0, %v2091_v62  ;;  %2102 = verf.f32 %v1072_v10  ;;  %v2837_v37 = vmul.f32 0.5, %v933_v9 }
 0x1c4   : > { %v1071_v25 = vmul.f32 0.70710677, %v933_v9  ;;  %v2839_v20 = vmul.f32 0.5, %v1006_v11  ;;  %v1073_v12 = vmul.f32 0.70710677, %v1006_v11  ;;  %v2841_v58 = vmul.f32 0.5, %v937_v2  ;;  %v2093_v33 = vpop.eup %2092 }
 0x1c5   : > { %v1074_v15 = vmul.f32 0.70710677, %v937_v2  ;;  %v2844_v19 = vmul.f32 %v1129_v6, %v2756_v8  ;;  %v1010_v50 = vadd.f32 %v1009_v63, %v2615_v29  ;;  %v939_v36 = vadd.f32 %v938_v0, %v2617_v30  ;;  %v2095_v1 = vpop.eup %2094 }
 0x1c6   : > { %2104 = verf.f32 %v1071_v25  ;;  %v1130_v38 = vadd.f32 1.0, %v2093_v33  ;;  %v1012_v10 = vadd.f32 %v1011_v32, %v2619_v31  ;;  %v941_v9 = vadd.f32 %v940_v61, %v2613_v28 }
 0x1c7   : > { %2106 = verf.f32 %v1073_v12  ;;  %v1132_v62 = vadd.f32 1.0, %v2095_v1  ;;  %v2850_v11 = vmul.f32 0.5, %v1010_v50  ;;  %v1076_v2 = vmul.f32 0.70710677, %v1010_v50 }
 0x1c8   : > { %2108 = verf.f32 %v1074_v15  ;;  %v2853_v8 = vmul.f32 %v1130_v38, %v2777_v26  ;;  %v2855_v6 = vmul.f32 0.5, %v939_v36  ;;  %v1075_v63 = vmul.f32 0.70710677, %v939_v36  ;;  %v2097_v0 = vpop.eup %2096 }
 0x1c9   : > { %v2857_v25 = vmul.f32 0.5, %v1012_v10  ;;  %v2860_v12 = vmul.f32 %v1132_v62, %v2787_v57  ;;  %2110 = verf.f32 %v1076_v2  ;;  %v1077_v32 = vmul.f32 0.70710677, %v1012_v10 }
 0x1ca   : > { %v2862_v28 = vmul.f32 0.5, %v941_v9  ;;  %v1131_v61 = vadd.f32 1.0, %v2097_v0  ;;  %2112 = verf.f32 %v1075_v63  ;;  %v1078_v15 = vmul.f32 0.70710677, %v941_v9 }
 0x1cb   : > { %v1014_v26 = vadd.f32 %v2794_v22, %v2615_v29  ;;  %v2099_v33 = vpop.eup %2098  ;;  %2114 = verf.f32 %v1077_v32  ;;  %v943_v50 = vadd.f32 %v2796_v7, %v2617_v30  ;;  %v1016_v36 = vadd.f32 %v2803_v60, %v2619_v31 }
 0x1cc   : > { %v1179_v57 = vmul.f32 %v2754_v3, %v2626_v34  ;;  %v2101_v1 = vpop.eup %2100  ;;  %v1163_v38 = vmul.f32 %v1131_v61, %v2801_v5  ;;  %v1133_v10 = vadd.f32 1.0, %v2099_v33  ;;  %2116 = verf.f32 %v1078_v15 }
 0x1cd   : > { %v2873_v9 = vmul.f32 0.5, %v1014_v26  ;;  %v2103_v62 = vpop.eup %2102  ;;  %v1134_v29 = vadd.f32 1.0, %v2101_v1  ;;  %v1080_v22 = vmul.f32 0.70710677, %v1014_v26  ;;  %v2875_v2 = vmul.f32 0.5, %v943_v50 }
 0x1ce   : > { %v1079_v63 = vmul.f32 0.70710677, %v943_v50  ;;  %v1165_v30 = vmul.f32 %v1133_v10, %v2820_v23  ;;  %v1136_v7 = vadd.f32 1.0, %v2103_v62  ;;  %v2878_v31 = vmul.f32 0.5, %v1016_v36 }
 0x1cf   : > { %v1081_v60 = vmul.f32 0.70710677, %v1016_v36  ;;  %v1166_v3 = vmul.f32 %v1134_v29, %v2825_v14  ;;  %2118 = verf.f32 %v1080_v22  ;;  %v1183_v5 = vmul.f32 %v2775_v55, %v2638_v39  ;;  %v3063_v22 = vld [vmem:[#allocation19_spill] sm:$0xff] }
 0x1d0   : > { %v2105_v34 = vpop.eup %2104  ;;  %v1181_v0 = vmul.f32 %v2764_v53, %v2629_v35  ;;  %v1168_v61 = vmul.f32 %v1136_v7, %v2827_v59  ;;  %2120 = verf.f32 %v1079_v63  ;;  %v1185_v23 = vmul.f32 %v2783_v4, %v2641_v40 }
 0x1d1   : > { %v2107_v32 = vpop.eup %2106  ;;  %v1135_v15 = vadd.f32 1.0, %v2105_v34  ;;  %2122 = verf.f32 %v1081_v60  ;;  %v1211_v50 = vpack.c.bf16 %v1183_v5, %v1179_v57  ;;  %v1187_v14 = vmul.f32 %v2806_v16, %v2648_v43  ;;  %v3065_v60 = vld [vmem:[#allocation20_spill] sm:$0xff] }
 0x1d2   : > { %v2109_v26 = vpop.eup %2108  ;;  %v1137_v33 = vadd.f32 1.0, %v2107_v32  ;;  %v1213_v36 = vpack.c.bf16 %v1185_v23, %v1181_v0  ;;  %v1191_v35 = vmul.f32 %v2832_v49, %v2658_v47  ;;  %v1189_v40 = vmul.f32 %v2811_v52, %v2651_v44 }
 0x1d3   : > { %v1167_v39 = vmul.f32 %v1135_v15, %v2837_v37  ;;  %v1138_v55 = vadd.f32 1.0, %v2109_v26  ;;  %v2111_v53 = vpop.eup %2110  ;;  %1521 = vmatprep.mubr.bf16.mxu0 %v1211_v50  ;;  %v1193_v4 = vmul.f32 %v2844_v19, %v2661_v48  ;;  %v1186_v43 = vmul.f32 %v2792_v54, %v2643_v41 }
 0x1d4   : > { %v1169_v59 = vmul.f32 %v1137_v33, %v2839_v20  ;;  %v2113_v16 = vpop.eup %2112  ;;  %v1140_v57 = vadd.f32 1.0, %v2111_v53  ;;  %1586 = vmatprep.mubr.bf16.mxu1 %v1213_v36  ;;  %v3058_v47 = vpack.c.bf16 %v2772_v18, %v2751_v27  ;;  %v1215_v49 = vpack.c.bf16 %v1191_v35, %v1187_v14  ;;  %v3071_v53 = vld [vmem:[#allocation15_spill] sm:$0xff] }
 0x1d5   : > { %v1170_v37 = vmul.f32 %v1138_v55, %v2841_v58  ;;  %v1190_v20 = vmul.f32 %v2818_v56, %v2653_v45  ;;  %v2115_v44 = vpop.eup %2114  ;;  %v1139_v52 = vadd.f32 1.0, %v2113_v16  ;;  %v3059_v48 = vpack.c.bf16 %v2780_v17, %v2761_v13  ;;  %v3060_v17 = vld [vmem:[#allocation24_spill] sm:$0xff] }
 0x1d6   : > { %1522 = vmatmul.mubr.bf16.vlgmr.msra.gmra.mrb[32].mxu0 %v3058_v47  ;;  %v1217_v41 = vpack.c.bf16 %v1193_v4, %v1189_v40  ;;  %v1188_v54 = vmul.f32 %v2799_v21, %v2645_v42  ;;  %v1192_v58 = vmul.f32 %v2823_v24, %v2655_v46  ;;  %v2117_v19 = vpop.eup %2116  ;;  %v1172_v27 = vmul.f32 %v1140_v57, %v2850_v11  ;;  %v3061_v21 = vld [vmem:[#allocation21_spill] sm:$0xff]  ;;  %v3073_v4 = vld [vmem:[#allocation27_spill] sm:$0xff]  ;;  %v3074_v16 = vld [vmem:[#allocation16_spill] sm:$0xff] }
 0x1d7   : > { %1587 = vmatmul.mubr.bf16.vlgmr.msra.gmra.mrb[32].mxu1 %v3059_v48  ;;  %v1141_v18 = vadd.f32 1.0, %v2115_v44  ;;  %1529 = vmatprep.mubr.bf16.mxu0 %v1215_v49  ;;  %v1214_v1 = vpack.c.bf16 %v1190_v20, %v1186_v43  ;;  %v1195_v45 = vmul.f32 %v1163_v38, %v2668_v51  ;;  %v1171_v56 = vmul.f32 %v1139_v52, %v2855_v6  ;;  %v3062_v46 = vld [vmem:[#allocation25_spill] sm:$0xff]  ;;  %v3064_v38 = vld [vmem:[#allocation22_spill] sm:$0xff]  ;;  %v3076_v49 = vld [vmem:[#allocation31_spill] sm:$0xff] }
 0x1d8   : > { %v1142_v10 = vadd.f32 1.0, %v2117_v19  ;;  %1594 = vmatprep.mubr.bf16.mxu1 %v1217_v41  ;;  %v1216_v13 = vpack.c.bf16 %v1192_v58, %v1188_v54  ;;  %v1199_v62 = vmul.f32 %v1167_v39, %v3060_v17  ;;  %v1197_v29 = vmul.f32 %v1165_v30, %v3061_v21  ;;  %v3067_v30 = vld [vmem:[#allocation28_spill] sm:$0xff]  ;;  %v3069_v39 = vld [vmem:[#allocation26_spill] sm:$0xff] }
 0x1d9   : > { %v1173_v42 = vmul.f32 %v1141_v18, %v2857_v25  ;;  %v1201_v24 = vmul.f32 %v1169_v59, %v3062_v46  ;;  %v1194_v11 = vmul.f32 %v2853_v8, %v3063_v22  ;;  %v2119_v63 = vpop.eup %2118  ;;  %v1198_v6 = vmul.f32 %v1166_v3, %v3064_v38  ;;  %v3066_v25 = vld [vmem:[#allocation23_spill] sm:$0xff]  ;;  %v3068_v8 = vld [vmem:[#allocation29_spill] sm:$0xff]  ;;  %v3075_v57 = vld [vmem:[#allocation18_spill] sm:$0xff] }
 0x1da   : > { %v1174_v7 = vmul.f32 %v1142_v10, %v2862_v28  ;;  %v1219_v51 = vpack.c.bf16 %v1199_v62, %v1195_v45  ;;  %v1196_v34 = vmul.f32 %v2860_v12, %v3065_v60  ;;  %v2121_v5 = vpop.eup %2120  ;;  %v1144_v0 = vadd.f32 1.0, %v2119_v63  ;;  %v3070_v12 = vld [vmem:[#allocation30_spill] sm:$0xff]  ;;  %v3072_v59 = vld [vmem:[#allocation17_spill] sm:$0xff] }
 0x1db   : > { %v1221_v32 = vpack.c.bf16 %v1201_v24, %v1197_v29  ;;  %v1200_v15 = vmul.f32 %v1168_v61, %v3066_v25  ;;  %v1203_v23 = vmul.f32 %v1171_v56, %v3067_v30  ;;  %v2123_v26 = vpop.eup %2122  ;;  %v1143_v33 = vadd.f32 1.0, %v2121_v5 }
 0x1dc   : > { %v1218_v50 = vpack.c.bf16 %v1198_v6, %v1194_v11  ;;  %v1205_v14 = vmul.f32 %v1173_v42, %v3068_v8  ;;  %v1202_v28 = vmul.f32 %v1170_v37, %v3069_v39  ;;  %v1176_v55 = vmul.f32 %v1144_v0, %v2873_v9 }
 0x1dd   : > { %v1145_v3 = vadd.f32 1.0, %v2123_v26  ;;  %v1220_v36 = vpack.c.bf16 %v1200_v15, %v1196_v34  ;;  %v1206_v35 = vmul.f32 %v1174_v7, %v3070_v12  ;;  %v797_v40 = vadd.f32 %v3072_v59, %v3071_v53 }
 0x1de   : > { %1530 = vmatmul.mubr.bf16.gmra.mrb[36].mxu0 %v1214_v1  ;;  %v1175_v61 = vmul.f32 %v1143_v33, %v2875_v2  ;;  %v1204_v43 = vmul.f32 %v1172_v27, %v3073_v4  ;;  %v870_v47 = vadd.f32 %v3075_v57, %v3074_v16  ;;  %v1208_v20 = vmul.f32 %v1176_v55, %v3076_v49 }
 0x1df   : > { %1595 = vmatmul.mubr.bf16.gmra.mrb[36].mxu1 %v1216_v13  ;;  %1537 = vmatprep.mubr.bf16.mxu0 %v1219_v51  ;;  %v1177_v37 = vmul.f32 %v1145_v3, %v2878_v31  ;;  %v1222_v9 = vpack.c.bf16 %v1206_v35, %v1202_v28  ;;  %v2943_v31 = vld [vmem:[%s3020_s4] ss:$0 sm:$0xff] }
 0x1e0   : > { %1602 = vmatprep.mubr.bf16.mxu1 %v1221_v32  ;;  %v1207_v44 = vmul.f32 %v1175_v61, %v797_v40  ;;  %v1224_v48 = vpack.c.bf16 %v1208_v20, %v1204_v43 }
 0x1e1   : > { %v1209_v52 = vmul.f32 %v1177_v37, %v870_v47 }
 0x1e2   : > { %v1223_v41 = vpack.c.bf16 %v1207_v44, %v1203_v23 }
 0x1e3   : > { %v1225_v54 = vpack.c.bf16 %v1209_v52, %v1205_v14 }
 0x1e6   : > { %1538 = vmatmul.mubr.bf16.gmra.mrb[40].mxu0 %v1218_v50 }
 0x1e7   : > { %1603 = vmatmul.mubr.bf16.gmra.mrb[40].mxu1 %v1220_v36  ;;  %1545 = vmatprep.mubr.bf16.mxu0 %v1223_v41 }
 0x1e8   : > { %1610 = vmatprep.mubr.bf16.mxu1 %v1225_v54 }
 0x1ee   : > { %1546 = vmatmul.mubr.bf16.gmra.mrb[44].mxu0 %v1222_v9 }
 0x1ef   : > { %1611 = vmatmul.mubr.bf16.gmra.mrb[44].mxu1 %v1224_v48 }
 0x2a9   : > { %v1878_v2 = vpop.f32.mrb[32].mxu0 }
 0x2aa   : > { %v1918_v58 = vpop.f32.mrb[32].mxu1  ;;  %v1879_v19 = vpop.f32.mrb[33].mxu0 }
 0x2ab   : > { %v1880_v27 = vadd.f32 %v1879_v19, %v1878_v2  ;;  %v1919_v18 = vpop.f32.mrb[33].mxu1  ;;  %v1881_v1 = vpop.f32.mrb[34].mxu0 }
 0x2ac   : > { %v1920_v45 = vadd.f32 %v1919_v18, %v1918_v58  ;;  %v1921_v56 = vpop.f32.mrb[34].mxu1  ;;  %v1882_v10 = vpop.f32.mrb[35].mxu0 }
 0x2ad   : > { %v1524_v13 = vadd.f32 %v1880_v27, %v2943_v31  ;;  %v1883_v17 = vadd.f32 %v1882_v10, %v1881_v1  ;;  %v1922_v62 = vpop.f32.mrb[35].mxu1 }
 0x2ae   : > { %v1923_v42 = vadd.f32 %v1922_v62, %v1921_v56 }
 0x2af   : > { %v1589_v21 = vadd.f32 %v1920_v45, %v1524_v13  ;;  %v1527_v29 = vadd.f32 %v1883_v17, %v2943_v31 }
 0x2b1   : > { %1619 = vst [vmem:[%s2949_s11] sm:$0xff] %v1589_v21  ;;  %v1592_v46 = vadd.f32 %v1923_v42, %v1527_v29  ;;  %v1884_v24 = vpop.f32.mrb[36].mxu0 }
 0x2b2   : > { %v1924_v22 = vpop.f32.mrb[36].mxu1  ;;  %v1885_v11 = vpop.f32.mrb[37].mxu0 }
 0x2b3   : > { %1620 = vst [vmem:[%s2949_s11 + $0x8] sm:$0xff] %v1592_v46  ;;  %v1886_v63 = vadd.f32 %v1885_v11, %v1884_v24  ;;  %v1925_v7 = vpop.f32.mrb[37].mxu1  ;;  %v1887_v51 = vpop.f32.mrb[38].mxu0 }
 0x2b4   : > { %v1926_v38 = vadd.f32 %v1925_v7, %v1924_v22  ;;  %v1927_v6 = vpop.f32.mrb[38].mxu1  ;;  %v1888_v60 = vpop.f32.mrb[39].mxu0 }
 0x2b5   : > { %v1532_v34 = vadd.f32 %v1886_v63, %v2943_v31  ;;  %v1889_v5 = vadd.f32 %v1888_v60, %v1887_v51  ;;  %v1928_v0 = vpop.f32.mrb[39].mxu1 }
 0x2b6   : > { %v1929_v32 = vadd.f32 %v1928_v0, %v1927_v6 }
 0x2b7   : > { %v1597_v25 = vadd.f32 %v1926_v38, %v1532_v34  ;;  %v1535_v15 = vadd.f32 %v1889_v5, %v2943_v31 }
 0x2b9   : > { %1621 = vst [vmem:[%s2949_s11 + $0x10] sm:$0xff] %v1597_v25  ;;  %v1600_v30 = vadd.f32 %v1929_v32, %v1535_v15  ;;  %v1890_v23 = vpop.f32.mrb[40].mxu0 }
 0x2ba   : > { %v1930_v26 = vpop.f32.mrb[40].mxu1  ;;  %v1891_v33 = vpop.f32.mrb[41].mxu0 }
 0x2bb   : > { %1622 = vst [vmem:[%s2949_s11 + $0x18] sm:$0xff] %v1600_v30  ;;  %v1892_v50 = vadd.f32 %v1891_v33, %v1890_v23  ;;  %v1931_v8 = vpop.f32.mrb[41].mxu1  ;;  %v1893_v14 = vpop.f32.mrb[42].mxu0 }
 0x2bc   : > { %v1932_v39 = vadd.f32 %v1931_v8, %v1930_v26  ;;  %v1933_v28 = vpop.f32.mrb[42].mxu1  ;;  %v1894_v55 = vpop.f32.mrb[43].mxu0 }
 0x2bd   : > { %v1540_v3 = vadd.f32 %v1892_v50, %v2943_v31  ;;  %v1895_v36 = vadd.f32 %v1894_v55, %v1893_v14  ;;  %v1934_v12 = vpop.f32.mrb[43].mxu1 }
 0x2be   : > { %v1935_v35 = vadd.f32 %v1934_v12, %v1933_v28 }
 0x2bf   : > { %v1605_v53 = vadd.f32 %v1932_v39, %v1540_v3  ;;  %v1543_v59 = vadd.f32 %v1895_v36, %v2943_v31 }
 0x2c1   : > { %1623 = vst [vmem:[%s2949_s11 + $0x20] sm:$0xff] %v1605_v53  ;;  %v1608_v40 = vadd.f32 %v1935_v35, %v1543_v59  ;;  %v1896_v61 = vpop.f32.mrb[44].mxu0 }
 0x2c2   : > { %v1936_v4 = vpop.f32.mrb[44].mxu1  ;;  %v1897_v43 = vpop.f32.mrb[45].mxu0 }
 0x2c3   : > { %1624 = vst [vmem:[%s2949_s11 + $0x28] sm:$0xff] %v1608_v40  ;;  %v1898_v16 = vadd.f32 %v1897_v43, %v1896_v61  ;;  %v1937_v57 = vpop.f32.mrb[45].mxu1  ;;  %v1899_v47 = vpop.f32.mrb[46].mxu0 }
 0x2c4   : > { %v1938_v37 = vadd.f32 %v1937_v57, %v1936_v4  ;;  %v1939_v9 = vpop.f32.mrb[46].mxu1  ;;  %v1900_v49 = vpop.f32.mrb[47].mxu0 }
 0x2c5   : > { %v1548_v20 = vadd.f32 %v1898_v16, %v2943_v31  ;;  %v1901_v44 = vadd.f32 %v1900_v49, %v1899_v47  ;;  %v1940_v52 = vpop.f32.mrb[47].mxu1 }
 0x2c6   : > { %v1941_v48 = vadd.f32 %v1940_v52, %v1939_v9 }
 0x2c7   : > { %v1613_v41 = vadd.f32 %v1938_v37, %v1548_v20  ;;  %v1551_v54 = vadd.f32 %v1901_v44, %v2943_v31 }
 0x2c9   : > { %1625 = vst [vmem:[%s2949_s11 + $0x30] sm:$0xff] %v1613_v41  ;;  %v1616_v2 = vadd.f32 %v1941_v48, %v1551_v54 }
 0x2cb   : > { %1626 = vst [vmem:[%s2949_s11 + $0x38] sm:$0xff] %v1616_v2 }
 0x2cc   : > { %2251 = shalt.err (!%p2248_p4)
}
 0x2cd   : > { %s2252_s23 = scalar_lea.hbm %s2970_s9, 1024  ;;  %s2256_s24 = scalar_lea.hbm %s3021_s5, 2048 }
 0x2ce   : > { %p2253_p9 = scmp.ne.s32.totalorder %s2970_s9, %s2252_s23  ;;  %p2257_p8 = scmp.lt.u32.totalorder %s2970_s9, %s3021_s5 }
 0x2cf   : > { %p2258_p13 = scmp.lt.u32.totalorder %s2256_s24, %s2252_s23  ;;  %p2260_p10 = scmp.lt.u32.totalorder %s2252_s23, %s2970_s9 }
 0x2d0   : > { %p2254_p0 = pnand %p2253_p9, %p2503_p5 }
 0x2d1   : > { %p2259_p6 = por %p2258_p13, %p2257_p8 }
 0x2d2   : > { %p2255_p11 = pneg %p2254_p0 }
 0x2d3   : > { %p2261_p3 = por %p2260_p10, %p2259_p6 }
 0x2d5   : > { %p2262_p7 = pnand %p2261_p3, %p2255_p11 }
 0x2d7   : > { %2265 = shalt.err (!%p2262_p7)
}
 0x2d8   : > { %s2326_s6 = smov 128   ;;  %s2327_s14 = smov 8  }
 0x2d9   : > { %1956 = dma.vmem_to_hbm [thread:$0]  (%p2503_p5), %s2964_s13, 1024, %s2970_s9, %s1628_s10, %s2326_s6, %s2326_s6, %s2327_s14  }
 0x2da PF: > { %s1656_s29 = sand.u32 1, %s2300_s18   ;;  %p3077_p12 = scmp.ne.s32.totalorder %s3028_s25, 0 }
 0x2db   : > { %p3078_p2 = scmp.ge.s32.totalorder %s2312_s21, 2  ;;  %s1657_s12 = scalar_lea.sflag [#allocation4], %s1656_s29 }
 0x2dd   : > { %p1973_p1 = pnand %p3078_p2, %p3077_p12 }
 0x2df   : > { %2295 = dma.done.wait (!%p1973_p1), %s1657_s12, 1024  }
 0x2e0   : > { %2297 = vsyncadd (!%p1973_p1), %s1657_s12, 4294966272  ;;  %p20_p4 = scmp.ge.s32.totalorder %s2489_s28, 4   ;;  %s3079_s18 = smov %s2304_s19 }
 0x2e1   : > { %s3080_s19 = smov %s2308_s20  ;;  %s3081_s20 = smov %s2499_s27 }
 0x2e2   : > { %s3082_s21 = smov %s2489_s28  ;;  %22 = sbr.rel (!%p20_p4) target bundleno = 7 (0x7), region = 97 }
 0x2e9   :  { %1662 = vsyncpa [#allocation3], 1 }
 0x2ea   :  { %1664 = vsyncpa [#allocation3 + $0x1], 1 }
 0x2eb   :  { %1665 = vsyncpa [#allocation6], 1 }
 0x2ec   :  { %1666 = vsyncpa [#allocation9], 1 }
 0x2ed   :  { %1667 = vsyncpa [#allocation4], 1 }
 0x2ee   :  { %1669 = vsyncpa [#allocation4 + $0x1], 1 }

</bundles_post_ra>
